<compile_context>
chip_gen: v5e
topology: v5e:2x2
jax: 0.10.0
libtpu: 0.0.40
codegen_flags: <defaults>
</compile_context>

<pallas_src>
import math

import jax
import jax.numpy as jnp
from jax.experimental import pallas as pl
from jax.experimental.pallas import tpu as pltpu  # noqa: F401  (TPU backend)

# ---------------- config (mini-BERT, small TPU-friendly shapes) ----------------
B = 2          # batch
S = 16         # sequence length
H = 128        # hidden size         (bert-base: 768)
HEADS = 2      # attention heads     (bert-base: 12)
DH = H // HEADS
FF = 512       # intermediate size   (bert-base: 3072)
LAYERS = 2     # encoder layers      (bert-base: 12)
VOCAB = 128
MAXPOS = 32
TYPES = 2
NUM_TAG = 8
TAG_PAD = 128  # lane-dense padded width of the tag head
N = B * S
LN_EPS = 1e-12
ATT_SCALE = 1.0 / math.sqrt(DH)


# ---------------- fused Pallas kernel ----------------
def _layernorm(y, g, b):
    mu = jnp.mean(y, axis=-1, keepdims=True)
    var = jnp.mean((y - mu) ** 2, axis=-1, keepdims=True)
    return (y - mu) * jax.lax.rsqrt(var + LN_EPS) * g + b


def _fused_bert_kernel(emb_ref, bias_ref, onehot_ref,
                       emb_ln_g_ref, emb_ln_b_ref,
                       wqkv_ref, bqkv_ref, wo_ref, bo_ref,
                       ln1_g_ref, ln1_b_ref,
                       w1_ref, b1_ref, w2_ref, b2_ref,
                       ln2_g_ref, ln2_b_ref,
                       w_tag_ref, b_tag_ref,
                       tag_ref, loss_ref):
    """Whole NER forward in one kernel; weights + activations VMEM-resident."""
    # --- embedding LayerNorm (plain LN, no zero-residual add) ---
    x = _layernorm(emb_ref[...], emb_ln_g_ref[...], emb_ln_b_ref[...])   # (N, H) f32
    bias_all = bias_ref[...]                                             # (B, S) f32

    for l in range(LAYERS):                       # static unroll (LAYERS = 2)
        # ---- fused QKV projection: one (N, H) @ (H, 3H) MXU pass ----
        qkv = jnp.dot(x.astype(jnp.bfloat16), wqkv_ref[l],
                      preferred_element_type=jnp.float32) + bqkv_ref[l]  # (N, 3H)
        q = qkv[:, 0:H]
        k = qkv[:, H:2 * H]
        v = qkv[:, 2 * H:3 * H]

        # ---- multi-head attention: all batches/heads, no grid ----
        ctx_rows = []
        for b in range(B):
            r0 = b * S
            bias_b = bias_all[b:b + 1, :]                                # (1, S)
            head_ctx = []
            for h in range(HEADS):
                c0 = h * DH
                q_bh = q[r0:r0 + S, c0:c0 + DH].astype(jnp.bfloat16)
                k_bh = k[r0:r0 + S, c0:c0 + DH].astype(jnp.bfloat16)
                v_bh = v[r0:r0 + S, c0:c0 + DH].astype(jnp.bfloat16)
                # scores = q @ k^T (contract head dim), f32 accumulation
                s = jax.lax.dot_general(
                    q_bh, k_bh, (((1,), (1,)), ((), ())),
                    preferred_element_type=jnp.float32) * ATT_SCALE + bias_b
                m = jnp.max(s, axis=-1, keepdims=True)
                p = jnp.exp(s - m)
                p = p * pl.reciprocal(jnp.sum(p, axis=-1, keepdims=True),
                                      approx=False)
                head_ctx.append(jnp.dot(p.astype(jnp.bfloat16), v_bh,
                                        preferred_element_type=jnp.float32))
            ctx_rows.append(jnp.concatenate(head_ctx, axis=-1))          # (S, H)
        ctx = jnp.concatenate(ctx_rows, axis=0)                          # (N, H)

        attn_out = jnp.dot(ctx.astype(jnp.bfloat16), wo_ref[l],
                           preferred_element_type=jnp.float32) + bo_ref[l]
        x = _layernorm(attn_out + x, ln1_g_ref[l], ln1_b_ref[l])

        # ---- feed-forward ----
        ffn = jnp.dot(x.astype(jnp.bfloat16), w1_ref[l],
                      preferred_element_type=jnp.float32) + b1_ref[l]
        # TODO(synk): BERT uses exact (erf) GELU; tanh approximation used here.
        ffn = jax.nn.gelu(ffn, approximate=True)
        ffn_out = jnp.dot(ffn.astype(jnp.bfloat16), w2_ref[l],
                          preferred_element_type=jnp.float32) + b2_ref[l]
        x = _layernorm(ffn_out + x, ln2_g_ref[l], ln2_b_ref[l])

    # TODO(synk): Dropout(p=0.3) applied as eval-mode identity (deterministic).

    # ---- tag head: lane-dense 128-wide logits slab ----
    # Padded weight columns are zero; padded bias is -1e30 so those lanes
    # vanish from max / logsumexp and the wrapper just slices the first NUM_TAG.
    logits = jnp.dot(x.astype(jnp.bfloat16), w_tag_ref[...],
                     preferred_element_type=jnp.float32) + b_tag_ref[...]  # (N, 128)
    tag_ref[...] = logits

    # ---- masked mean cross-entropy (ignore_index=-100, PyTorch semantics) ----
    m = jnp.max(logits, axis=-1, keepdims=True)
    z = logits - m
    lse = jnp.log(jnp.sum(jnp.exp(z), axis=-1, keepdims=True))
    logp = z - lse
    onehot = onehot_ref[...]                    # (N, 128); all-zero rows = ignored
    total = jnp.sum(-logp * onehot)
    count = jnp.sum(onehot)
    loss_ref[...] = jnp.full((1, 1), total / count, dtype=jnp.float32)


# ---------------- parameters (deterministic synthetic init) ----------------
def init_params(key):
    keys = iter(jax.random.split(key, 32))

    def rnd(shape, scale=0.02):
        return scale * jax.random.normal(next(keys), shape, dtype=jnp.float32)

    w_tag = jnp.zeros((H, TAG_PAD), jnp.float32).at[:, :NUM_TAG].set(rnd((H, NUM_TAG)))
    b_tag = jnp.full((1, TAG_PAD), -1e30, jnp.float32).at[:, :NUM_TAG].set(0.0)

    return {
        "word_emb": rnd((VOCAB, H)),
        "pos_emb": rnd((MAXPOS, H)),
        "type_emb": rnd((TYPES, H)),
        "emb_ln_g": jnp.ones((1, H), jnp.float32),
        "emb_ln_b": jnp.zeros((1, H), jnp.float32),
        # fused QKV weight per layer, stacked across layers; matmul weights in bf16
        "wqkv": rnd((LAYERS, H, 3 * H)).astype(jnp.bfloat16),
        "bqkv": jnp.zeros((LAYERS, 1, 3 * H), jnp.float32),
        "wo": rnd((LAYERS, H, H)).astype(jnp.bfloat16),
        "bo": jnp.zeros((LAYERS, 1, H), jnp.float32),
        "ln1_g": jnp.ones((LAYERS, 1, H), jnp.float32),
        "ln1_b": jnp.zeros((LAYERS, 1, H), jnp.float32),
        "w1": rnd((LAYERS, H, FF)).astype(jnp.bfloat16),
        "b1": jnp.zeros((LAYERS, 1, FF), jnp.float32),
        "w2": rnd((LAYERS, FF, H)).astype(jnp.bfloat16),
        "b2": jnp.zeros((LAYERS, 1, H), jnp.float32),
        "ln2_g": jnp.ones((LAYERS, 1, H), jnp.float32),
        "ln2_b": jnp.zeros((LAYERS, 1, H), jnp.float32),
        "w_tag": w_tag.astype(jnp.bfloat16),
        "b_tag": b_tag,
    }


# ---------------- forward pass (mirrors Model.forward) ----------------
@jax.jit
def ner_forward(params, ids, mask, token_type_ids, target_tags):
    # Embedding gathers + one-hot label encoding are tiny XLA glue; the rest of
    # the forward runs inside one fused Pallas kernel.
    pos = jnp.arange(S)
    emb = (params["word_emb"][ids]
           + params["pos_emb"][pos][None, :, :]
           + params["type_emb"][token_type_ids]).reshape(N, H).astype(jnp.float32)

    # HF-BERT additive attention-mask bias: (1 - mask) * -10000, kept in f32
    bias = (1.0 - mask.astype(jnp.float32)) * -10000.0               # (B, S)

    # ignore_index=-100 semantics: one-hot rows of ignored tokens are all-zero
    active = mask.reshape(-1) == 1
    labels = jnp.where(active, target_tags.reshape(-1), -100).astype(jnp.int32)
    onehot = jax.nn.one_hot(labels, TAG_PAD, dtype=jnp.float32)       # (N, 128)

    tag_pad, loss = pl.pallas_call(
        _fused_bert_kernel,
        out_shape=(jax.ShapeDtypeStruct((N, TAG_PAD), jnp.float32),
                   jax.ShapeDtypeStruct((1, 1), jnp.float32)),
    )(emb, bias, onehot,
      params["emb_ln_g"], params["emb_ln_b"],
      params["wqkv"], params["bqkv"], params["wo"], params["bo"],
      params["ln1_g"], params["ln1_b"],
      params["w1"], params["b1"], params["w2"], params["b2"],
      params["ln2_g"], params["ln2_b"],
      params["w_tag"], params["b_tag"])

    tag = tag_pad[:, :NUM_TAG].reshape(B, S, NUM_TAG)
    return tag, loss[0, 0]


# ---------------- main ----------------
if __name__ == "__main__":
    root = jax.random.PRNGKey(0)
    kp, kids, ktags = jax.random.split(root, 3)

    params = init_params(kp)

    ids = jax.random.randint(kids, (B, S), 0, VOCAB, dtype=jnp.int32)
    # variable-length sequences: first row full, second row length 10
    lens = jnp.array([[S], [10]], dtype=jnp.int32)
    mask = (jnp.arange(S)[None, :] < lens).astype(jnp.int32)
    token_type_ids = jnp.zeros((B, S), dtype=jnp.int32)
    target_tags = jax.random.randint(ktags, (B, S), 0, NUM_TAG, dtype=jnp.int32)

    tag, loss = ner_forward(params, ids, mask, token_type_ids, target_tags)
    jax.block_until_ready((tag, loss))

    assert tag.shape == (B, S, NUM_TAG)
    assert loss.shape == ()
    assert bool(jnp.isfinite(loss))
    print("KERNEL_OK")
</pallas_src>

<mosaic_0001>
module attributes {stable_mosaic.version = 11 : i64} {
  func.func @_fused_bert_kernel(%arg0: memref<32x128xf32, #tpu.memory_space<vmem>>, %arg1: memref<2x16xf32, #tpu.memory_space<vmem>>, %arg2: memref<32x128xf32, #tpu.memory_space<vmem>>, %arg3: memref<1x128xf32, #tpu.memory_space<vmem>>, %arg4: memref<1x128xf32, #tpu.memory_space<vmem>>, %arg5: memref<2x128x384xbf16, #tpu.memory_space<vmem>>, %arg6: memref<2x1x384xf32, #tpu.memory_space<vmem>>, %arg7: memref<2x128x128xbf16, #tpu.memory_space<vmem>>, %arg8: memref<2x1x128xf32, #tpu.memory_space<vmem>>, %arg9: memref<2x1x128xf32, #tpu.memory_space<vmem>>, %arg10: memref<2x1x128xf32, #tpu.memory_space<vmem>>, %arg11: memref<2x128x512xbf16, #tpu.memory_space<vmem>>, %arg12: memref<2x1x512xf32, #tpu.memory_space<vmem>>, %arg13: memref<2x512x128xbf16, #tpu.memory_space<vmem>>, %arg14: memref<2x1x128xf32, #tpu.memory_space<vmem>>, %arg15: memref<2x1x128xf32, #tpu.memory_space<vmem>>, %arg16: memref<2x1x128xf32, #tpu.memory_space<vmem>>, %arg17: memref<128x128xbf16, #tpu.memory_space<vmem>>, %arg18: memref<1x128xf32, #tpu.memory_space<vmem>>, %arg19: memref<32x128xf32, #tpu.memory_space<vmem>>, %arg20: memref<1x1xf32, #tpu.memory_space<vmem>>) attributes {dimension_semantics = [], scalar_prefetch = 0 : i64, scratch_operands = 0 : i64, tpu.core_type = #tpu.core_type<tc>} {
    %c0 = arith.constant 0 : index
    %c0_0 = arith.constant 0 : index
    %0 = vector.load %arg0[%c0, %c0_0] : memref<32x128xf32, #tpu.memory_space<vmem>>, vector<32x128xf32>
    %c0_1 = arith.constant 0 : index
    %c0_2 = arith.constant 0 : index
    %1 = vector.load %arg3[%c0_1, %c0_2] : memref<1x128xf32, #tpu.memory_space<vmem>>, vector<1x128xf32>
    %c0_3 = arith.constant 0 : index
    %c0_4 = arith.constant 0 : index
    %2 = vector.load %arg4[%c0_3, %c0_4] : memref<1x128xf32, #tpu.memory_space<vmem>>, vector<1x128xf32>
    %cst = arith.constant dense<0.000000e+00> : vector<32xf32>
    %3 = vector.multi_reduction <add>, %0, %cst [1] : vector<32x128xf32> to vector<32xf32>
    %4 = vector.shape_cast %3 : vector<32xf32> to vector<32x1xf32>
    %cst_5 = arith.constant 1.280000e+02 : f32
    %5 = vector.broadcast %cst_5 : f32 to vector<32x1xf32>
    %6 = arith.divf %4, %5 : vector<32x1xf32>
    %7 = vector.broadcast %6 : vector<32x1xf32> to vector<32x128xf32>
    %8 = arith.subf %0, %7 : vector<32x128xf32>
    %9 = arith.mulf %8, %8 : vector<32x128xf32>
    %cst_6 = arith.constant dense<0.000000e+00> : vector<32xf32>
    %10 = vector.multi_reduction <add>, %9, %cst_6 [1] : vector<32x128xf32> to vector<32xf32>
    %11 = vector.shape_cast %10 : vector<32xf32> to vector<32x1xf32>
    %cst_7 = arith.constant 1.280000e+02 : f32
    %12 = vector.broadcast %cst_7 : f32 to vector<32x1xf32>
    %13 = arith.divf %11, %12 : vector<32x1xf32>
    %14 = vector.broadcast %6 : vector<32x1xf32> to vector<32x128xf32>
    %15 = arith.subf %0, %14 : vector<32x128xf32>
    %cst_8 = arith.constant 9.99999996E-13 : f32
    %16 = vector.broadcast %cst_8 : f32 to vector<32x1xf32>
    %17 = arith.addf %13, %16 : vector<32x1xf32>
    %18 = math.rsqrt %17 : vector<32x1xf32>
    %19 = vector.broadcast %18 : vector<32x1xf32> to vector<32x128xf32>
    %20 = arith.mulf %15, %19 : vector<32x128xf32>
    %21 = vector.broadcast %1 : vector<1x128xf32> to vector<32x128xf32>
    %22 = arith.mulf %20, %21 : vector<32x128xf32>
    %23 = vector.broadcast %2 : vector<1x128xf32> to vector<32x128xf32>
    %24 = arith.addf %22, %23 : vector<32x128xf32>
    %c0_9 = arith.constant 0 : index
    %c0_10 = arith.constant 0 : index
    %25 = vector.load %arg1[%c0_9, %c0_10] : memref<2x16xf32, #tpu.memory_space<vmem>>, vector<2x16xf32>
    %26 = arith.truncf %24 : vector<32x128xf32> to vector<32x128xbf16>
    %c0_11 = arith.constant 0 : index
    %c0_12 = arith.constant 0 : index
    %c0_13 = arith.constant 0 : index
    %27 = vector.load %arg5[%c0_11, %c0_12, %c0_13] : memref<2x128x384xbf16, #tpu.memory_space<vmem>>, vector<1x128x384xbf16>
    %28 = vector.shape_cast %27 : vector<1x128x384xbf16> to vector<128x384xbf16>
    %cst_14 = arith.constant dense<0.000000e+00> : vector<32x384xf32>
    %29 = tpu.matmul %26, %28, %cst_14 {dimension_numbers = #tpu.dot_dimension_numbers<[1], [0], [0], [1], [0, 0, 1, 1], [], []>} : vector<32x128xbf16>, vector<128x384xbf16>, vector<32x384xf32> -> vector<32x384xf32>
    %c0_15 = arith.constant 0 : index
    %c0_16 = arith.constant 0 : index
    %c0_17 = arith.constant 0 : index
    %30 = vector.load %arg6[%c0_15, %c0_16, %c0_17] : memref<2x1x384xf32, #tpu.memory_space<vmem>>, vector<1x1x384xf32>
    %31 = vector.shape_cast %30 : vector<1x1x384xf32> to vector<1x384xf32>
    %32 = vector.broadcast %31 : vector<1x384xf32> to vector<32x384xf32>
    %33 = arith.addf %29, %32 : vector<32x384xf32>
    %34 = vector.extract_strided_slice %33 {offsets = [0, 0], sizes = [32, 128], strides = [1, 1]} : vector<32x384xf32> to vector<32x128xf32>
    %35 = vector.extract_strided_slice %33 {offsets = [0, 128], sizes = [32, 128], strides = [1, 1]} : vector<32x384xf32> to vector<32x128xf32>
    %36 = vector.extract_strided_slice %33 {offsets = [0, 256], sizes = [32, 128], strides = [1, 1]} : vector<32x384xf32> to vector<32x128xf32>
    %37 = vector.extract_strided_slice %25 {offsets = [0, 0], sizes = [1, 16], strides = [1, 1]} : vector<2x16xf32> to vector<1x16xf32>
    %38 = vector.extract_strided_slice %34 {offsets = [0, 0], sizes = [16, 64], strides = [1, 1]} : vector<32x128xf32> to vector<16x64xf32>
    %39 = arith.truncf %38 : vector<16x64xf32> to vector<16x64xbf16>
    %40 = vector.extract_strided_slice %35 {offsets = [0, 0], sizes = [16, 64], strides = [1, 1]} : vector<32x128xf32> to vector<16x64xf32>
    %41 = arith.truncf %40 : vector<16x64xf32> to vector<16x64xbf16>
    %42 = vector.extract_strided_slice %36 {offsets = [0, 0], sizes = [16, 64], strides = [1, 1]} : vector<32x128xf32> to vector<16x64xf32>
    %43 = arith.truncf %42 : vector<16x64xf32> to vector<16x64xbf16>
    %cst_18 = arith.constant dense<0.000000e+00> : vector<16x16xf32>
    %44 = tpu.matmul %39, %41, %cst_18 {dimension_numbers = #tpu.dot_dimension_numbers<[1], [1], [0], [0], [0, 0, 1, 0], [], []>} : vector<16x64xbf16>, vector<16x64xbf16>, vector<16x16xf32> -> vector<16x16xf32>
    %cst_19 = arith.constant 1.250000e-01 : f32
    %45 = vector.broadcast %cst_19 : f32 to vector<16x16xf32>
    %46 = arith.mulf %44, %45 : vector<16x16xf32>
    %47 = vector.broadcast %37 : vector<1x16xf32> to vector<16x16xf32>
    %48 = arith.addf %46, %47 : vector<16x16xf32>
    %cst_20 = arith.constant dense<0xFF800000> : vector<16xf32>
    %49 = vector.multi_reduction <maximumf>, %48, %cst_20 [1] : vector<16x16xf32> to vector<16xf32>
    %50 = vector.shape_cast %49 : vector<16xf32> to vector<16x1xf32>
    %51 = vector.broadcast %50 : vector<16x1xf32> to vector<16x16xf32>
    %52 = arith.subf %48, %51 : vector<16x16xf32>
    %53 = math.exp %52 : vector<16x16xf32>
    %cst_21 = arith.constant dense<0.000000e+00> : vector<16xf32>
    %54 = vector.multi_reduction <add>, %53, %cst_21 [1] : vector<16x16xf32> to vector<16xf32>
    %55 = vector.shape_cast %54 : vector<16xf32> to vector<16x1xf32>
    %56 = tpu.reciprocal %55 : vector<16x1xf32> -> vector<16x1xf32>
    %57 = vector.broadcast %56 : vector<16x1xf32> to vector<16x16xf32>
    %58 = arith.mulf %53, %57 : vector<16x16xf32>
    %59 = arith.truncf %58 : vector<16x16xf32> to vector<16x16xbf16>
    %cst_22 = arith.constant dense<0.000000e+00> : vector<16x64xf32>
    %60 = tpu.matmul %59, %43, %cst_22 {dimension_numbers = #tpu.dot_dimension_numbers<[1], [0], [0], [1], [0, 0, 1, 1], [], []>} : vector<16x16xbf16>, vector<16x64xbf16>, vector<16x64xf32> -> vector<16x64xf32>
    %61 = vector.extract_strided_slice %34 {offsets = [0, 64], sizes = [16, 64], strides = [1, 1]} : vector<32x128xf32> to vector<16x64xf32>
    %62 = arith.truncf %61 : vector<16x64xf32> to vector<16x64xbf16>
    %63 = vector.extract_strided_slice %35 {offsets = [0, 64], sizes = [16, 64], strides = [1, 1]} : vector<32x128xf32> to vector<16x64xf32>
    %64 = arith.truncf %63 : vector<16x64xf32> to vector<16x64xbf16>
    %65 = vector.extract_strided_slice %36 {offsets = [0, 64], sizes = [16, 64], strides = [1, 1]} : vector<32x128xf32> to vector<16x64xf32>
    %66 = arith.truncf %65 : vector<16x64xf32> to vector<16x64xbf16>
    %cst_23 = arith.constant dense<0.000000e+00> : vector<16x16xf32>
    %67 = tpu.matmul %62, %64, %cst_23 {dimension_numbers = #tpu.dot_dimension_numbers<[1], [1], [0], [0], [0, 0, 1, 0], [], []>} : vector<16x64xbf16>, vector<16x64xbf16>, vector<16x16xf32> -> vector<16x16xf32>
    %cst_24 = arith.constant 1.250000e-01 : f32
    %68 = vector.broadcast %cst_24 : f32 to vector<16x16xf32>
    %69 = arith.mulf %67, %68 : vector<16x16xf32>
    %70 = vector.broadcast %37 : vector<1x16xf32> to vector<16x16xf32>
    %71 = arith.addf %69, %70 : vector<16x16xf32>
    %cst_25 = arith.constant dense<0xFF800000> : vector<16xf32>
    %72 = vector.multi_reduction <maximumf>, %71, %cst_25 [1] : vector<16x16xf32> to vector<16xf32>
    %73 = vector.shape_cast %72 : vector<16xf32> to vector<16x1xf32>
    %74 = vector.broadcast %73 : vector<16x1xf32> to vector<16x16xf32>
    %75 = arith.subf %71, %74 : vector<16x16xf32>
    %76 = math.exp %75 : vector<16x16xf32>
    %cst_26 = arith.constant dense<0.000000e+00> : vector<16xf32>
    %77 = vector.multi_reduction <add>, %76, %cst_26 [1] : vector<16x16xf32> to vector<16xf32>
    %78 = vector.shape_cast %77 : vector<16xf32> to vector<16x1xf32>
    %79 = tpu.reciprocal %78 : vector<16x1xf32> -> vector<16x1xf32>
    %80 = vector.broadcast %79 : vector<16x1xf32> to vector<16x16xf32>
    %81 = arith.mulf %76, %80 : vector<16x16xf32>
    %82 = arith.truncf %81 : vector<16x16xf32> to vector<16x16xbf16>
    %cst_27 = arith.constant dense<0.000000e+00> : vector<16x64xf32>
    %83 = tpu.matmul %82, %66, %cst_27 {dimension_numbers = #tpu.dot_dimension_numbers<[1], [0], [0], [1], [0, 0, 1, 1], [], []>} : vector<16x16xbf16>, vector<16x64xbf16>, vector<16x64xf32> -> vector<16x64xf32>
    %84 = tpu.concatenate %60, %83 in 1 : vector<16x64xf32>, vector<16x64xf32> -> vector<16x128xf32>
    %85 = vector.extract_strided_slice %25 {offsets = [1, 0], sizes = [1, 16], strides = [1, 1]} : vector<2x16xf32> to vector<1x16xf32>
    %86 = vector.extract_strided_slice %34 {offsets = [16, 0], sizes = [16, 64], strides = [1, 1]} : vector<32x128xf32> to vector<16x64xf32>
    %87 = arith.truncf %86 : vector<16x64xf32> to vector<16x64xbf16>
    %88 = vector.extract_strided_slice %35 {offsets = [16, 0], sizes = [16, 64], strides = [1, 1]} : vector<32x128xf32> to vector<16x64xf32>
    %89 = arith.truncf %88 : vector<16x64xf32> to vector<16x64xbf16>
    %90 = vector.extract_strided_slice %36 {offsets = [16, 0], sizes = [16, 64], strides = [1, 1]} : vector<32x128xf32> to vector<16x64xf32>
    %91 = arith.truncf %90 : vector<16x64xf32> to vector<16x64xbf16>
    %cst_28 = arith.constant dense<0.000000e+00> : vector<16x16xf32>
    %92 = tpu.matmul %87, %89, %cst_28 {dimension_numbers = #tpu.dot_dimension_numbers<[1], [1], [0], [0], [0, 0, 1, 0], [], []>} : vector<16x64xbf16>, vector<16x64xbf16>, vector<16x16xf32> -> vector<16x16xf32>
    %cst_29 = arith.constant 1.250000e-01 : f32
    %93 = vector.broadcast %cst_29 : f32 to vector<16x16xf32>
    %94 = arith.mulf %92, %93 : vector<16x16xf32>
    %95 = vector.broadcast %85 : vector<1x16xf32> to vector<16x16xf32>
    %96 = arith.addf %94, %95 : vector<16x16xf32>
    %cst_30 = arith.constant dense<0xFF800000> : vector<16xf32>
    %97 = vector.multi_reduction <maximumf>, %96, %cst_30 [1] : vector<16x16xf32> to vector<16xf32>
    %98 = vector.shape_cast %97 : vector<16xf32> to vector<16x1xf32>
    %99 = vector.broadcast %98 : vector<16x1xf32> to vector<16x16xf32>
    %100 = arith.subf %96, %99 : vector<16x16xf32>
    %101 = math.exp %100 : vector<16x16xf32>
    %cst_31 = arith.constant dense<0.000000e+00> : vector<16xf32>
    %102 = vector.multi_reduction <add>, %101, %cst_31 [1] : vector<16x16xf32> to vector<16xf32>
    %103 = vector.shape_cast %102 : vector<16xf32> to vector<16x1xf32>
    %104 = tpu.reciprocal %103 : vector<16x1xf32> -> vector<16x1xf32>
    %105 = vector.broadcast %104 : vector<16x1xf32> to vector<16x16xf32>
    %106 = arith.mulf %101, %105 : vector<16x16xf32>
    %107 = arith.truncf %106 : vector<16x16xf32> to vector<16x16xbf16>
    %cst_32 = arith.constant dense<0.000000e+00> : vector<16x64xf32>
    %108 = tpu.matmul %107, %91, %cst_32 {dimension_numbers = #tpu.dot_dimension_numbers<[1], [0], [0], [1], [0, 0, 1, 1], [], []>} : vector<16x16xbf16>, vector<16x64xbf16>, vector<16x64xf32> -> vector<16x64xf32>
    %109 = vector.extract_strided_slice %34 {offsets = [16, 64], sizes = [16, 64], strides = [1, 1]} : vector<32x128xf32> to vector<16x64xf32>
    %110 = arith.truncf %109 : vector<16x64xf32> to vector<16x64xbf16>
    %111 = vector.extract_strided_slice %35 {offsets = [16, 64], sizes = [16, 64], strides = [1, 1]} : vector<32x128xf32> to vector<16x64xf32>
    %112 = arith.truncf %111 : vector<16x64xf32> to vector<16x64xbf16>
    %113 = vector.extract_strided_slice %36 {offsets = [16, 64], sizes = [16, 64], strides = [1, 1]} : vector<32x128xf32> to vector<16x64xf32>
    %114 = arith.truncf %113 : vector<16x64xf32> to vector<16x64xbf16>
    %cst_33 = arith.constant dense<0.000000e+00> : vector<16x16xf32>
    %115 = tpu.matmul %110, %112, %cst_33 {dimension_numbers = #tpu.dot_dimension_numbers<[1], [1], [0], [0], [0, 0, 1, 0], [], []>} : vector<16x64xbf16>, vector<16x64xbf16>, vector<16x16xf32> -> vector<16x16xf32>
    %cst_34 = arith.constant 1.250000e-01 : f32
    %116 = vector.broadcast %cst_34 : f32 to vector<16x16xf32>
    %117 = arith.mulf %115, %116 : vector<16x16xf32>
    %118 = vector.broadcast %85 : vector<1x16xf32> to vector<16x16xf32>
    %119 = arith.addf %117, %118 : vector<16x16xf32>
    %cst_35 = arith.constant dense<0xFF800000> : vector<16xf32>
    %120 = vector.multi_reduction <maximumf>, %119, %cst_35 [1] : vector<16x16xf32> to vector<16xf32>
    %121 = vector.shape_cast %120 : vector<16xf32> to vector<16x1xf32>
    %122 = vector.broadcast %121 : vector<16x1xf32> to vector<16x16xf32>
    %123 = arith.subf %119, %122 : vector<16x16xf32>
    %124 = math.exp %123 : vector<16x16xf32>
    %cst_36 = arith.constant dense<0.000000e+00> : vector<16xf32>
    %125 = vector.multi_reduction <add>, %124, %cst_36 [1] : vector<16x16xf32> to vector<16xf32>
    %126 = vector.shape_cast %125 : vector<16xf32> to vector<16x1xf32>
    %127 = tpu.reciprocal %126 : vector<16x1xf32> -> vector<16x1xf32>
    %128 = vector.broadcast %127 : vector<16x1xf32> to vector<16x16xf32>
    %129 = arith.mulf %124, %128 : vector<16x16xf32>
    %130 = arith.truncf %129 : vector<16x16xf32> to vector<16x16xbf16>
    %cst_37 = arith.constant dense<0.000000e+00> : vector<16x64xf32>
    %131 = tpu.matmul %130, %114, %cst_37 {dimension_numbers = #tpu.dot_dimension_numbers<[1], [0], [0], [1], [0, 0, 1, 1], [], []>} : vector<16x16xbf16>, vector<16x64xbf16>, vector<16x64xf32> -> vector<16x64xf32>
    %132 = tpu.concatenate %108, %131 in 1 : vector<16x64xf32>, vector<16x64xf32> -> vector<16x128xf32>
    %133 = tpu.concatenate %84, %132 in 0 : vector<16x128xf32>, vector<16x128xf32> -> vector<32x128xf32>
    %134 = arith.truncf %133 : vector<32x128xf32> to vector<32x128xbf16>
    %c0_38 = arith.constant 0 : index
    %c0_39 = arith.constant 0 : index
    %c0_40 = arith.constant 0 : index
    %135 = vector.load %arg7[%c0_38, %c0_39, %c0_40] : memref<2x128x128xbf16, #tpu.memory_space<vmem>>, vector<1x128x128xbf16>
    %136 = vector.shape_cast %135 : vector<1x128x128xbf16> to vector<128x128xbf16>
    %cst_41 = arith.constant dense<0.000000e+00> : vector<32x128xf32>
    %137 = tpu.matmul %134, %136, %cst_41 {dimension_numbers = #tpu.dot_dimension_numbers<[1], [0], [0], [1], [0, 0, 1, 1], [], []>} : vector<32x128xbf16>, vector<128x128xbf16>, vector<32x128xf32> -> vector<32x128xf32>
    %c0_42 = arith.constant 0 : index
    %c0_43 = arith.constant 0 : index
    %c0_44 = arith.constant 0 : index
    %138 = vector.load %arg8[%c0_42, %c0_43, %c0_44] : memref<2x1x128xf32, #tpu.memory_space<vmem>>, vector<1x1x128xf32>
    %139 = vector.shape_cast %138 : vector<1x1x128xf32> to vector<1x128xf32>
    %140 = vector.broadcast %139 : vector<1x128xf32> to vector<32x128xf32>
    %141 = arith.addf %137, %140 : vector<32x128xf32>
    %142 = arith.addf %141, %24 : vector<32x128xf32>
    %c0_45 = arith.constant 0 : index
    %c0_46 = arith.constant 0 : index
    %c0_47 = arith.constant 0 : index
    %143 = vector.load %arg9[%c0_45, %c0_46, %c0_47] : memref<2x1x128xf32, #tpu.memory_space<vmem>>, vector<1x1x128xf32>
    %144 = vector.shape_cast %143 : vector<1x1x128xf32> to vector<1x128xf32>
    %c0_48 = arith.constant 0 : index
    %c0_49 = arith.constant 0 : index
    %c0_50 = arith.constant 0 : index
    %145 = vector.load %arg10[%c0_48, %c0_49, %c0_50] : memref<2x1x128xf32, #tpu.memory_space<vmem>>, vector<1x1x128xf32>
    %146 = vector.shape_cast %145 : vector<1x1x128xf32> to vector<1x128xf32>
    %cst_51 = arith.constant dense<0.000000e+00> : vector<32xf32>
    %147 = vector.multi_reduction <add>, %142, %cst_51 [1] : vector<32x128xf32> to vector<32xf32>
    %148 = vector.shape_cast %147 : vector<32xf32> to vector<32x1xf32>
    %cst_52 = arith.constant 1.280000e+02 : f32
    %149 = vector.broadcast %cst_52 : f32 to vector<32x1xf32>
    %150 = arith.divf %148, %149 : vector<32x1xf32>
    %151 = vector.broadcast %150 : vector<32x1xf32> to vector<32x128xf32>
    %152 = arith.subf %142, %151 : vector<32x128xf32>
    %153 = arith.mulf %152, %152 : vector<32x128xf32>
    %cst_53 = arith.constant dense<0.000000e+00> : vector<32xf32>
    %154 = vector.multi_reduction <add>, %153, %cst_53 [1] : vector<32x128xf32> to vector<32xf32>
    %155 = vector.shape_cast %154 : vector<32xf32> to vector<32x1xf32>
    %cst_54 = arith.constant 1.280000e+02 : f32
    %156 = vector.broadcast %cst_54 : f32 to vector<32x1xf32>
    %157 = arith.divf %155, %156 : vector<32x1xf32>
    %158 = vector.broadcast %150 : vector<32x1xf32> to vector<32x128xf32>
    %159 = arith.subf %142, %158 : vector<32x128xf32>
    %cst_55 = arith.constant 9.99999996E-13 : f32
    %160 = vector.broadcast %cst_55 : f32 to vector<32x1xf32>
    %161 = arith.addf %157, %160 : vector<32x1xf32>
    %162 = math.rsqrt %161 : vector<32x1xf32>
    %163 = vector.broadcast %162 : vector<32x1xf32> to vector<32x128xf32>
    %164 = arith.mulf %159, %163 : vector<32x128xf32>
    %165 = vector.broadcast %144 : vector<1x128xf32> to vector<32x128xf32>
    %166 = arith.mulf %164, %165 : vector<32x128xf32>
    %167 = vector.broadcast %146 : vector<1x128xf32> to vector<32x128xf32>
    %168 = arith.addf %166, %167 : vector<32x128xf32>
    %169 = arith.truncf %168 : vector<32x128xf32> to vector<32x128xbf16>
    %c0_56 = arith.constant 0 : index
    %c0_57 = arith.constant 0 : index
    %c0_58 = arith.constant 0 : index
    %170 = vector.load %arg11[%c0_56, %c0_57, %c0_58] : memref<2x128x512xbf16, #tpu.memory_space<vmem>>, vector<1x128x512xbf16>
    %171 = vector.shape_cast %170 : vector<1x128x512xbf16> to vector<128x512xbf16>
    %cst_59 = arith.constant dense<0.000000e+00> : vector<32x512xf32>
    %172 = tpu.matmul %169, %171, %cst_59 {dimension_numbers = #tpu.dot_dimension_numbers<[1], [0], [0], [1], [0, 0, 1, 1], [], []>} : vector<32x128xbf16>, vector<128x512xbf16>, vector<32x512xf32> -> vector<32x512xf32>
    %c0_60 = arith.constant 0 : index
    %c0_61 = arith.constant 0 : index
    %c0_62 = arith.constant 0 : index
    %173 = vector.load %arg12[%c0_60, %c0_61, %c0_62] : memref<2x1x512xf32, #tpu.memory_space<vmem>>, vector<1x1x512xf32>
    %174 = vector.shape_cast %173 : vector<1x1x512xf32> to vector<1x512xf32>
    %175 = vector.broadcast %174 : vector<1x512xf32> to vector<32x512xf32>
    %176 = arith.addf %172, %175 : vector<32x512xf32>
    %177 = arith.mulf %176, %176 : vector<32x512xf32>
    %178 = arith.mulf %176, %177 : vector<32x512xf32>
    %cst_63 = arith.constant 4.471500e-02 : f32
    %179 = vector.broadcast %cst_63 : f32 to vector<32x512xf32>
    %180 = arith.mulf %179, %178 : vector<32x512xf32>
    %181 = arith.addf %176, %180 : vector<32x512xf32>
    %cst_64 = arith.constant 0.797884583 : f32
    %182 = vector.broadcast %cst_64 : f32 to vector<32x512xf32>
    %183 = arith.mulf %182, %181 : vector<32x512xf32>
    %184 = math.tanh %183 : vector<32x512xf32>
    %cst_65 = arith.constant 1.000000e+00 : f32
    %185 = vector.broadcast %cst_65 : f32 to vector<32x512xf32>
    %186 = arith.addf %185, %184 : vector<32x512xf32>
    %cst_66 = arith.constant 5.000000e-01 : f32
    %187 = vector.broadcast %cst_66 : f32 to vector<32x512xf32>
    %188 = arith.mulf %187, %186 : vector<32x512xf32>
    %189 = arith.mulf %176, %188 : vector<32x512xf32>
    %190 = arith.truncf %189 : vector<32x512xf32> to vector<32x512xbf16>
    %c0_67 = arith.constant 0 : index
    %c0_68 = arith.constant 0 : index
    %c0_69 = arith.constant 0 : index
    %191 = vector.load %arg13[%c0_67, %c0_68, %c0_69] : memref<2x512x128xbf16, #tpu.memory_space<vmem>>, vector<1x512x128xbf16>
    %192 = vector.shape_cast %191 : vector<1x512x128xbf16> to vector<512x128xbf16>
    %cst_70 = arith.constant dense<0.000000e+00> : vector<32x128xf32>
    %193 = tpu.matmul %190, %192, %cst_70 {dimension_numbers = #tpu.dot_dimension_numbers<[1], [0], [0], [1], [0, 0, 1, 1], [], []>} : vector<32x512xbf16>, vector<512x128xbf16>, vector<32x128xf32> -> vector<32x128xf32>
    %c0_71 = arith.constant 0 : index
    %c0_72 = arith.constant 0 : index
    %c0_73 = arith.constant 0 : index
    %194 = vector.load %arg14[%c0_71, %c0_72, %c0_73] : memref<2x1x128xf32, #tpu.memory_space<vmem>>, vector<1x1x128xf32>
    %195 = vector.shape_cast %194 : vector<1x1x128xf32> to vector<1x128xf32>
    %196 = vector.broadcast %195 : vector<1x128xf32> to vector<32x128xf32>
    %197 = arith.addf %193, %196 : vector<32x128xf32>
    %198 = arith.addf %197, %168 : vector<32x128xf32>
    %c0_74 = arith.constant 0 : index
    %c0_75 = arith.constant 0 : index
    %c0_76 = arith.constant 0 : index
    %199 = vector.load %arg15[%c0_74, %c0_75, %c0_76] : memref<2x1x128xf32, #tpu.memory_space<vmem>>, vector<1x1x128xf32>
    %200 = vector.shape_cast %199 : vector<1x1x128xf32> to vector<1x128xf32>
    %c0_77 = arith.constant 0 : index
    %c0_78 = arith.constant 0 : index
    %c0_79 = arith.constant 0 : index
    %201 = vector.load %arg16[%c0_77, %c0_78, %c0_79] : memref<2x1x128xf32, #tpu.memory_space<vmem>>, vector<1x1x128xf32>
    %202 = vector.shape_cast %201 : vector<1x1x128xf32> to vector<1x128xf32>
    %cst_80 = arith.constant dense<0.000000e+00> : vector<32xf32>
    %203 = vector.multi_reduction <add>, %198, %cst_80 [1] : vector<32x128xf32> to vector<32xf32>
    %204 = vector.shape_cast %203 : vector<32xf32> to vector<32x1xf32>
    %cst_81 = arith.constant 1.280000e+02 : f32
    %205 = vector.broadcast %cst_81 : f32 to vector<32x1xf32>
    %206 = arith.divf %204, %205 : vector<32x1xf32>
    %207 = vector.broadcast %206 : vector<32x1xf32> to vector<32x128xf32>
    %208 = arith.subf %198, %207 : vector<32x128xf32>
    %209 = arith.mulf %208, %208 : vector<32x128xf32>
    %cst_82 = arith.constant dense<0.000000e+00> : vector<32xf32>
    %210 = vector.multi_reduction <add>, %209, %cst_82 [1] : vector<32x128xf32> to vector<32xf32>
    %211 = vector.shape_cast %210 : vector<32xf32> to vector<32x1xf32>
    %cst_83 = arith.constant 1.280000e+02 : f32
    %212 = vector.broadcast %cst_83 : f32 to vector<32x1xf32>
    %213 = arith.divf %211, %212 : vector<32x1xf32>
    %214 = vector.broadcast %206 : vector<32x1xf32> to vector<32x128xf32>
    %215 = arith.subf %198, %214 : vector<32x128xf32>
    %cst_84 = arith.constant 9.99999996E-13 : f32
    %216 = vector.broadcast %cst_84 : f32 to vector<32x1xf32>
    %217 = arith.addf %213, %216 : vector<32x1xf32>
    %218 = math.rsqrt %217 : vector<32x1xf32>
    %219 = vector.broadcast %218 : vector<32x1xf32> to vector<32x128xf32>
    %220 = arith.mulf %215, %219 : vector<32x128xf32>
    %221 = vector.broadcast %200 : vector<1x128xf32> to vector<32x128xf32>
    %222 = arith.mulf %220, %221 : vector<32x128xf32>
    %223 = vector.broadcast %202 : vector<1x128xf32> to vector<32x128xf32>
    %224 = arith.addf %222, %223 : vector<32x128xf32>
    %225 = arith.truncf %224 : vector<32x128xf32> to vector<32x128xbf16>
    %c1 = arith.constant 1 : index
    %c0_85 = arith.constant 0 : index
    %c0_86 = arith.constant 0 : index
    %226 = vector.load %arg5[%c1, %c0_85, %c0_86] : memref<2x128x384xbf16, #tpu.memory_space<vmem>>, vector<1x128x384xbf16>
    %227 = vector.shape_cast %226 : vector<1x128x384xbf16> to vector<128x384xbf16>
    %cst_87 = arith.constant dense<0.000000e+00> : vector<32x384xf32>
    %228 = tpu.matmul %225, %227, %cst_87 {dimension_numbers = #tpu.dot_dimension_numbers<[1], [0], [0], [1], [0, 0, 1, 1], [], []>} : vector<32x128xbf16>, vector<128x384xbf16>, vector<32x384xf32> -> vector<32x384xf32>
    %c1_88 = arith.constant 1 : index
    %c0_89 = arith.constant 0 : index
    %c0_90 = arith.constant 0 : index
    %229 = vector.load %arg6[%c1_88, %c0_89, %c0_90] : memref<2x1x384xf32, #tpu.memory_space<vmem>>, vector<1x1x384xf32>
    %230 = vector.shape_cast %229 : vector<1x1x384xf32> to vector<1x384xf32>
    %231 = vector.broadcast %230 : vector<1x384xf32> to vector<32x384xf32>
    %232 = arith.addf %228, %231 : vector<32x384xf32>
    %233 = vector.extract_strided_slice %232 {offsets = [0, 0], sizes = [32, 128], strides = [1, 1]} : vector<32x384xf32> to vector<32x128xf32>
    %234 = vector.extract_strided_slice %232 {offsets = [0, 128], sizes = [32, 128], strides = [1, 1]} : vector<32x384xf32> to vector<32x128xf32>
    %235 = vector.extract_strided_slice %232 {offsets = [0, 256], sizes = [32, 128], strides = [1, 1]} : vector<32x384xf32> to vector<32x128xf32>
    %236 = vector.extract_strided_slice %25 {offsets = [0, 0], sizes = [1, 16], strides = [1, 1]} : vector<2x16xf32> to vector<1x16xf32>
    %237 = vector.extract_strided_slice %233 {offsets = [0, 0], sizes = [16, 64], strides = [1, 1]} : vector<32x128xf32> to vector<16x64xf32>
    %238 = arith.truncf %237 : vector<16x64xf32> to vector<16x64xbf16>
    %239 = vector.extract_strided_slice %234 {offsets = [0, 0], sizes = [16, 64], strides = [1, 1]} : vector<32x128xf32> to vector<16x64xf32>
    %240 = arith.truncf %239 : vector<16x64xf32> to vector<16x64xbf16>
    %241 = vector.extract_strided_slice %235 {offsets = [0, 0], sizes = [16, 64], strides = [1, 1]} : vector<32x128xf32> to vector<16x64xf32>
    %242 = arith.truncf %241 : vector<16x64xf32> to vector<16x64xbf16>
    %cst_91 = arith.constant dense<0.000000e+00> : vector<16x16xf32>
    %243 = tpu.matmul %238, %240, %cst_91 {dimension_numbers = #tpu.dot_dimension_numbers<[1], [1], [0], [0], [0, 0, 1, 0], [], []>} : vector<16x64xbf16>, vector<16x64xbf16>, vector<16x16xf32> -> vector<16x16xf32>
    %cst_92 = arith.constant 1.250000e-01 : f32
    %244 = vector.broadcast %cst_92 : f32 to vector<16x16xf32>
    %245 = arith.mulf %243, %244 : vector<16x16xf32>
    %246 = vector.broadcast %236 : vector<1x16xf32> to vector<16x16xf32>
    %247 = arith.addf %245, %246 : vector<16x16xf32>
    %cst_93 = arith.constant dense<0xFF800000> : vector<16xf32>
    %248 = vector.multi_reduction <maximumf>, %247, %cst_93 [1] : vector<16x16xf32> to vector<16xf32>
    %249 = vector.shape_cast %248 : vector<16xf32> to vector<16x1xf32>
    %250 = vector.broadcast %249 : vector<16x1xf32> to vector<16x16xf32>
    %251 = arith.subf %247, %250 : vector<16x16xf32>
    %252 = math.exp %251 : vector<16x16xf32>
    %cst_94 = arith.constant dense<0.000000e+00> : vector<16xf32>
    %253 = vector.multi_reduction <add>, %252, %cst_94 [1] : vector<16x16xf32> to vector<16xf32>
    %254 = vector.shape_cast %253 : vector<16xf32> to vector<16x1xf32>
    %255 = tpu.reciprocal %254 : vector<16x1xf32> -> vector<16x1xf32>
    %256 = vector.broadcast %255 : vector<16x1xf32> to vector<16x16xf32>
    %257 = arith.mulf %252, %256 : vector<16x16xf32>
    %258 = arith.truncf %257 : vector<16x16xf32> to vector<16x16xbf16>
    %cst_95 = arith.constant dense<0.000000e+00> : vector<16x64xf32>
    %259 = tpu.matmul %258, %242, %cst_95 {dimension_numbers = #tpu.dot_dimension_numbers<[1], [0], [0], [1], [0, 0, 1, 1], [], []>} : vector<16x16xbf16>, vector<16x64xbf16>, vector<16x64xf32> -> vector<16x64xf32>
    %260 = vector.extract_strided_slice %233 {offsets = [0, 64], sizes = [16, 64], strides = [1, 1]} : vector<32x128xf32> to vector<16x64xf32>
    %261 = arith.truncf %260 : vector<16x64xf32> to vector<16x64xbf16>
    %262 = vector.extract_strided_slice %234 {offsets = [0, 64], sizes = [16, 64], strides = [1, 1]} : vector<32x128xf32> to vector<16x64xf32>
    %263 = arith.truncf %262 : vector<16x64xf32> to vector<16x64xbf16>
    %264 = vector.extract_strided_slice %235 {offsets = [0, 64], sizes = [16, 64], strides = [1, 1]} : vector<32x128xf32> to vector<16x64xf32>
    %265 = arith.truncf %264 : vector<16x64xf32> to vector<16x64xbf16>
    %cst_96 = arith.constant dense<0.000000e+00> : vector<16x16xf32>
    %266 = tpu.matmul %261, %263, %cst_96 {dimension_numbers = #tpu.dot_dimension_numbers<[1], [1], [0], [0], [0, 0, 1, 0], [], []>} : vector<16x64xbf16>, vector<16x64xbf16>, vector<16x16xf32> -> vector<16x16xf32>
    %cst_97 = arith.constant 1.250000e-01 : f32
    %267 = vector.broadcast %cst_97 : f32 to vector<16x16xf32>
    %268 = arith.mulf %266, %267 : vector<16x16xf32>
    %269 = vector.broadcast %236 : vector<1x16xf32> to vector<16x16xf32>
    %270 = arith.addf %268, %269 : vector<16x16xf32>
    %cst_98 = arith.constant dense<0xFF800000> : vector<16xf32>
    %271 = vector.multi_reduction <maximumf>, %270, %cst_98 [1] : vector<16x16xf32> to vector<16xf32>
    %272 = vector.shape_cast %271 : vector<16xf32> to vector<16x1xf32>
    %273 = vector.broadcast %272 : vector<16x1xf32> to vector<16x16xf32>
    %274 = arith.subf %270, %273 : vector<16x16xf32>
    %275 = math.exp %274 : vector<16x16xf32>
    %cst_99 = arith.constant dense<0.000000e+00> : vector<16xf32>
    %276 = vector.multi_reduction <add>, %275, %cst_99 [1] : vector<16x16xf32> to vector<16xf32>
    %277 = vector.shape_cast %276 : vector<16xf32> to vector<16x1xf32>
    %278 = tpu.reciprocal %277 : vector<16x1xf32> -> vector<16x1xf32>
    %279 = vector.broadcast %278 : vector<16x1xf32> to vector<16x16xf32>
    %280 = arith.mulf %275, %279 : vector<16x16xf32>
    %281 = arith.truncf %280 : vector<16x16xf32> to vector<16x16xbf16>
    %cst_100 = arith.constant dense<0.000000e+00> : vector<16x64xf32>
    %282 = tpu.matmul %281, %265, %cst_100 {dimension_numbers = #tpu.dot_dimension_numbers<[1], [0], [0], [1], [0, 0, 1, 1], [], []>} : vector<16x16xbf16>, vector<16x64xbf16>, vector<16x64xf32> -> vector<16x64xf32>
    %283 = tpu.concatenate %259, %282 in 1 : vector<16x64xf32>, vector<16x64xf32> -> vector<16x128xf32>
    %284 = vector.extract_strided_slice %25 {offsets = [1, 0], sizes = [1, 16], strides = [1, 1]} : vector<2x16xf32> to vector<1x16xf32>
    %285 = vector.extract_strided_slice %233 {offsets = [16, 0], sizes = [16, 64], strides = [1, 1]} : vector<32x128xf32> to vector<16x64xf32>
    %286 = arith.truncf %285 : vector<16x64xf32> to vector<16x64xbf16>
    %287 = vector.extract_strided_slice %234 {offsets = [16, 0], sizes = [16, 64], strides = [1, 1]} : vector<32x128xf32> to vector<16x64xf32>
    %288 = arith.truncf %287 : vector<16x64xf32> to vector<16x64xbf16>
    %289 = vector.extract_strided_slice %235 {offsets = [16, 0], sizes = [16, 64], strides = [1, 1]} : vector<32x128xf32> to vector<16x64xf32>
    %290 = arith.truncf %289 : vector<16x64xf32> to vector<16x64xbf16>
    %cst_101 = arith.constant dense<0.000000e+00> : vector<16x16xf32>
    %291 = tpu.matmul %286, %288, %cst_101 {dimension_numbers = #tpu.dot_dimension_numbers<[1], [1], [0], [0], [0, 0, 1, 0], [], []>} : vector<16x64xbf16>, vector<16x64xbf16>, vector<16x16xf32> -> vector<16x16xf32>
    %cst_102 = arith.constant 1.250000e-01 : f32
    %292 = vector.broadcast %cst_102 : f32 to vector<16x16xf32>
    %293 = arith.mulf %291, %292 : vector<16x16xf32>
    %294 = vector.broadcast %284 : vector<1x16xf32> to vector<16x16xf32>
    %295 = arith.addf %293, %294 : vector<16x16xf32>
    %cst_103 = arith.constant dense<0xFF800000> : vector<16xf32>
    %296 = vector.multi_reduction <maximumf>, %295, %cst_103 [1] : vector<16x16xf32> to vector<16xf32>
    %297 = vector.shape_cast %296 : vector<16xf32> to vector<16x1xf32>
    %298 = vector.broadcast %297 : vector<16x1xf32> to vector<16x16xf32>
    %299 = arith.subf %295, %298 : vector<16x16xf32>
    %300 = math.exp %299 : vector<16x16xf32>
    %cst_104 = arith.constant dense<0.000000e+00> : vector<16xf32>
    %301 = vector.multi_reduction <add>, %300, %cst_104 [1] : vector<16x16xf32> to vector<16xf32>
    %302 = vector.shape_cast %301 : vector<16xf32> to vector<16x1xf32>
    %303 = tpu.reciprocal %302 : vector<16x1xf32> -> vector<16x1xf32>
    %304 = vector.broadcast %303 : vector<16x1xf32> to vector<16x16xf32>
    %305 = arith.mulf %300, %304 : vector<16x16xf32>
    %306 = arith.truncf %305 : vector<16x16xf32> to vector<16x16xbf16>
    %cst_105 = arith.constant dense<0.000000e+00> : vector<16x64xf32>
    %307 = tpu.matmul %306, %290, %cst_105 {dimension_numbers = #tpu.dot_dimension_numbers<[1], [0], [0], [1], [0, 0, 1, 1], [], []>} : vector<16x16xbf16>, vector<16x64xbf16>, vector<16x64xf32> -> vector<16x64xf32>
    %308 = vector.extract_strided_slice %233 {offsets = [16, 64], sizes = [16, 64], strides = [1, 1]} : vector<32x128xf32> to vector<16x64xf32>
    %309 = arith.truncf %308 : vector<16x64xf32> to vector<16x64xbf16>
    %310 = vector.extract_strided_slice %234 {offsets = [16, 64], sizes = [16, 64], strides = [1, 1]} : vector<32x128xf32> to vector<16x64xf32>
    %311 = arith.truncf %310 : vector<16x64xf32> to vector<16x64xbf16>
    %312 = vector.extract_strided_slice %235 {offsets = [16, 64], sizes = [16, 64], strides = [1, 1]} : vector<32x128xf32> to vector<16x64xf32>
    %313 = arith.truncf %312 : vector<16x64xf32> to vector<16x64xbf16>
    %cst_106 = arith.constant dense<0.000000e+00> : vector<16x16xf32>
    %314 = tpu.matmul %309, %311, %cst_106 {dimension_numbers = #tpu.dot_dimension_numbers<[1], [1], [0], [0], [0, 0, 1, 0], [], []>} : vector<16x64xbf16>, vector<16x64xbf16>, vector<16x16xf32> -> vector<16x16xf32>
    %cst_107 = arith.constant 1.250000e-01 : f32
    %315 = vector.broadcast %cst_107 : f32 to vector<16x16xf32>
    %316 = arith.mulf %314, %315 : vector<16x16xf32>
    %317 = vector.broadcast %284 : vector<1x16xf32> to vector<16x16xf32>
    %318 = arith.addf %316, %317 : vector<16x16xf32>
    %cst_108 = arith.constant dense<0xFF800000> : vector<16xf32>
    %319 = vector.multi_reduction <maximumf>, %318, %cst_108 [1] : vector<16x16xf32> to vector<16xf32>
    %320 = vector.shape_cast %319 : vector<16xf32> to vector<16x1xf32>
    %321 = vector.broadcast %320 : vector<16x1xf32> to vector<16x16xf32>
    %322 = arith.subf %318, %321 : vector<16x16xf32>
    %323 = math.exp %322 : vector<16x16xf32>
    %cst_109 = arith.constant dense<0.000000e+00> : vector<16xf32>
    %324 = vector.multi_reduction <add>, %323, %cst_109 [1] : vector<16x16xf32> to vector<16xf32>
    %325 = vector.shape_cast %324 : vector<16xf32> to vector<16x1xf32>
    %326 = tpu.reciprocal %325 : vector<16x1xf32> -> vector<16x1xf32>
    %327 = vector.broadcast %326 : vector<16x1xf32> to vector<16x16xf32>
    %328 = arith.mulf %323, %327 : vector<16x16xf32>
    %329 = arith.truncf %328 : vector<16x16xf32> to vector<16x16xbf16>
    %cst_110 = arith.constant dense<0.000000e+00> : vector<16x64xf32>
    %330 = tpu.matmul %329, %313, %cst_110 {dimension_numbers = #tpu.dot_dimension_numbers<[1], [0], [0], [1], [0, 0, 1, 1], [], []>} : vector<16x16xbf16>, vector<16x64xbf16>, vector<16x64xf32> -> vector<16x64xf32>
    %331 = tpu.concatenate %307, %330 in 1 : vector<16x64xf32>, vector<16x64xf32> -> vector<16x128xf32>
    %332 = tpu.concatenate %283, %331 in 0 : vector<16x128xf32>, vector<16x128xf32> -> vector<32x128xf32>
    %333 = arith.truncf %332 : vector<32x128xf32> to vector<32x128xbf16>
    %c1_111 = arith.constant 1 : index
    %c0_112 = arith.constant 0 : index
    %c0_113 = arith.constant 0 : index
    %334 = vector.load %arg7[%c1_111, %c0_112, %c0_113] : memref<2x128x128xbf16, #tpu.memory_space<vmem>>, vector<1x128x128xbf16>
    %335 = vector.shape_cast %334 : vector<1x128x128xbf16> to vector<128x128xbf16>
    %cst_114 = arith.constant dense<0.000000e+00> : vector<32x128xf32>
    %336 = tpu.matmul %333, %335, %cst_114 {dimension_numbers = #tpu.dot_dimension_numbers<[1], [0], [0], [1], [0, 0, 1, 1], [], []>} : vector<32x128xbf16>, vector<128x128xbf16>, vector<32x128xf32> -> vector<32x128xf32>
    %c1_115 = arith.constant 1 : index
    %c0_116 = arith.constant 0 : index
    %c0_117 = arith.constant 0 : index
    %337 = vector.load %arg8[%c1_115, %c0_116, %c0_117] : memref<2x1x128xf32, #tpu.memory_space<vmem>>, vector<1x1x128xf32>
    %338 = vector.shape_cast %337 : vector<1x1x128xf32> to vector<1x128xf32>
    %339 = vector.broadcast %338 : vector<1x128xf32> to vector<32x128xf32>
    %340 = arith.addf %336, %339 : vector<32x128xf32>
    %341 = arith.addf %340, %224 : vector<32x128xf32>
    %c1_118 = arith.constant 1 : index
    %c0_119 = arith.constant 0 : index
    %c0_120 = arith.constant 0 : index
    %342 = vector.load %arg9[%c1_118, %c0_119, %c0_120] : memref<2x1x128xf32, #tpu.memory_space<vmem>>, vector<1x1x128xf32>
    %343 = vector.shape_cast %342 : vector<1x1x128xf32> to vector<1x128xf32>
    %c1_121 = arith.constant 1 : index
    %c0_122 = arith.constant 0 : index
    %c0_123 = arith.constant 0 : index
    %344 = vector.load %arg10[%c1_121, %c0_122, %c0_123] : memref<2x1x128xf32, #tpu.memory_space<vmem>>, vector<1x1x128xf32>
    %345 = vector.shape_cast %344 : vector<1x1x128xf32> to vector<1x128xf32>
    %cst_124 = arith.constant dense<0.000000e+00> : vector<32xf32>
    %346 = vector.multi_reduction <add>, %341, %cst_124 [1] : vector<32x128xf32> to vector<32xf32>
    %347 = vector.shape_cast %346 : vector<32xf32> to vector<32x1xf32>
    %cst_125 = arith.constant 1.280000e+02 : f32
    %348 = vector.broadcast %cst_125 : f32 to vector<32x1xf32>
    %349 = arith.divf %347, %348 : vector<32x1xf32>
    %350 = vector.broadcast %349 : vector<32x1xf32> to vector<32x128xf32>
    %351 = arith.subf %341, %350 : vector<32x128xf32>
    %352 = arith.mulf %351, %351 : vector<32x128xf32>
    %cst_126 = arith.constant dense<0.000000e+00> : vector<32xf32>
    %353 = vector.multi_reduction <add>, %352, %cst_126 [1] : vector<32x128xf32> to vector<32xf32>
    %354 = vector.shape_cast %353 : vector<32xf32> to vector<32x1xf32>
    %cst_127 = arith.constant 1.280000e+02 : f32
    %355 = vector.broadcast %cst_127 : f32 to vector<32x1xf32>
    %356 = arith.divf %354, %355 : vector<32x1xf32>
    %357 = vector.broadcast %349 : vector<32x1xf32> to vector<32x128xf32>
    %358 = arith.subf %341, %357 : vector<32x128xf32>
    %cst_128 = arith.constant 9.99999996E-13 : f32
    %359 = vector.broadcast %cst_128 : f32 to vector<32x1xf32>
    %360 = arith.addf %356, %359 : vector<32x1xf32>
    %361 = math.rsqrt %360 : vector<32x1xf32>
    %362 = vector.broadcast %361 : vector<32x1xf32> to vector<32x128xf32>
    %363 = arith.mulf %358, %362 : vector<32x128xf32>
    %364 = vector.broadcast %343 : vector<1x128xf32> to vector<32x128xf32>
    %365 = arith.mulf %363, %364 : vector<32x128xf32>
    %366 = vector.broadcast %345 : vector<1x128xf32> to vector<32x128xf32>
    %367 = arith.addf %365, %366 : vector<32x128xf32>
    %368 = arith.truncf %367 : vector<32x128xf32> to vector<32x128xbf16>
    %c1_129 = arith.constant 1 : index
    %c0_130 = arith.constant 0 : index
    %c0_131 = arith.constant 0 : index
    %369 = vector.load %arg11[%c1_129, %c0_130, %c0_131] : memref<2x128x512xbf16, #tpu.memory_space<vmem>>, vector<1x128x512xbf16>
    %370 = vector.shape_cast %369 : vector<1x128x512xbf16> to vector<128x512xbf16>
    %cst_132 = arith.constant dense<0.000000e+00> : vector<32x512xf32>
    %371 = tpu.matmul %368, %370, %cst_132 {dimension_numbers = #tpu.dot_dimension_numbers<[1], [0], [0], [1], [0, 0, 1, 1], [], []>} : vector<32x128xbf16>, vector<128x512xbf16>, vector<32x512xf32> -> vector<32x512xf32>
    %c1_133 = arith.constant 1 : index
    %c0_134 = arith.constant 0 : index
    %c0_135 = arith.constant 0 : index
    %372 = vector.load %arg12[%c1_133, %c0_134, %c0_135] : memref<2x1x512xf32, #tpu.memory_space<vmem>>, vector<1x1x512xf32>
    %373 = vector.shape_cast %372 : vector<1x1x512xf32> to vector<1x512xf32>
    %374 = vector.broadcast %373 : vector<1x512xf32> to vector<32x512xf32>
    %375 = arith.addf %371, %374 : vector<32x512xf32>
    %376 = arith.mulf %375, %375 : vector<32x512xf32>
    %377 = arith.mulf %375, %376 : vector<32x512xf32>
    %cst_136 = arith.constant 4.471500e-02 : f32
    %378 = vector.broadcast %cst_136 : f32 to vector<32x512xf32>
    %379 = arith.mulf %378, %377 : vector<32x512xf32>
    %380 = arith.addf %375, %379 : vector<32x512xf32>
    %cst_137 = arith.constant 0.797884583 : f32
    %381 = vector.broadcast %cst_137 : f32 to vector<32x512xf32>
    %382 = arith.mulf %381, %380 : vector<32x512xf32>
    %383 = math.tanh %382 : vector<32x512xf32>
    %cst_138 = arith.constant 1.000000e+00 : f32
    %384 = vector.broadcast %cst_138 : f32 to vector<32x512xf32>
    %385 = arith.addf %384, %383 : vector<32x512xf32>
    %cst_139 = arith.constant 5.000000e-01 : f32
    %386 = vector.broadcast %cst_139 : f32 to vector<32x512xf32>
    %387 = arith.mulf %386, %385 : vector<32x512xf32>
    %388 = arith.mulf %375, %387 : vector<32x512xf32>
    %389 = arith.truncf %388 : vector<32x512xf32> to vector<32x512xbf16>
    %c1_140 = arith.constant 1 : index
    %c0_141 = arith.constant 0 : index
    %c0_142 = arith.constant 0 : index
    %390 = vector.load %arg13[%c1_140, %c0_141, %c0_142] : memref<2x512x128xbf16, #tpu.memory_space<vmem>>, vector<1x512x128xbf16>
    %391 = vector.shape_cast %390 : vector<1x512x128xbf16> to vector<512x128xbf16>
    %cst_143 = arith.constant dense<0.000000e+00> : vector<32x128xf32>
    %392 = tpu.matmul %389, %391, %cst_143 {dimension_numbers = #tpu.dot_dimension_numbers<[1], [0], [0], [1], [0, 0, 1, 1], [], []>} : vector<32x512xbf16>, vector<512x128xbf16>, vector<32x128xf32> -> vector<32x128xf32>
    %c1_144 = arith.constant 1 : index
    %c0_145 = arith.constant 0 : index
    %c0_146 = arith.constant 0 : index
    %393 = vector.load %arg14[%c1_144, %c0_145, %c0_146] : memref<2x1x128xf32, #tpu.memory_space<vmem>>, vector<1x1x128xf32>
    %394 = vector.shape_cast %393 : vector<1x1x128xf32> to vector<1x128xf32>
    %395 = vector.broadcast %394 : vector<1x128xf32> to vector<32x128xf32>
    %396 = arith.addf %392, %395 : vector<32x128xf32>
    %397 = arith.addf %396, %367 : vector<32x128xf32>
    %c1_147 = arith.constant 1 : index
    %c0_148 = arith.constant 0 : index
    %c0_149 = arith.constant 0 : index
    %398 = vector.load %arg15[%c1_147, %c0_148, %c0_149] : memref<2x1x128xf32, #tpu.memory_space<vmem>>, vector<1x1x128xf32>
    %399 = vector.shape_cast %398 : vector<1x1x128xf32> to vector<1x128xf32>
    %c1_150 = arith.constant 1 : index
    %c0_151 = arith.constant 0 : index
    %c0_152 = arith.constant 0 : index
    %400 = vector.load %arg16[%c1_150, %c0_151, %c0_152] : memref<2x1x128xf32, #tpu.memory_space<vmem>>, vector<1x1x128xf32>
    %401 = vector.shape_cast %400 : vector<1x1x128xf32> to vector<1x128xf32>
    %cst_153 = arith.constant dense<0.000000e+00> : vector<32xf32>
    %402 = vector.multi_reduction <add>, %397, %cst_153 [1] : vector<32x128xf32> to vector<32xf32>
    %403 = vector.shape_cast %402 : vector<32xf32> to vector<32x1xf32>
    %cst_154 = arith.constant 1.280000e+02 : f32
    %404 = vector.broadcast %cst_154 : f32 to vector<32x1xf32>
    %405 = arith.divf %403, %404 : vector<32x1xf32>
    %406 = vector.broadcast %405 : vector<32x1xf32> to vector<32x128xf32>
    %407 = arith.subf %397, %406 : vector<32x128xf32>
    %408 = arith.mulf %407, %407 : vector<32x128xf32>
    %cst_155 = arith.constant dense<0.000000e+00> : vector<32xf32>
    %409 = vector.multi_reduction <add>, %408, %cst_155 [1] : vector<32x128xf32> to vector<32xf32>
    %410 = vector.shape_cast %409 : vector<32xf32> to vector<32x1xf32>
    %cst_156 = arith.constant 1.280000e+02 : f32
    %411 = vector.broadcast %cst_156 : f32 to vector<32x1xf32>
    %412 = arith.divf %410, %411 : vector<32x1xf32>
    %413 = vector.broadcast %405 : vector<32x1xf32> to vector<32x128xf32>
    %414 = arith.subf %397, %413 : vector<32x128xf32>
    %cst_157 = arith.constant 9.99999996E-13 : f32
    %415 = vector.broadcast %cst_157 : f32 to vector<32x1xf32>
    %416 = arith.addf %412, %415 : vector<32x1xf32>
    %417 = math.rsqrt %416 : vector<32x1xf32>
    %418 = vector.broadcast %417 : vector<32x1xf32> to vector<32x128xf32>
    %419 = arith.mulf %414, %418 : vector<32x128xf32>
    %420 = vector.broadcast %399 : vector<1x128xf32> to vector<32x128xf32>
    %421 = arith.mulf %419, %420 : vector<32x128xf32>
    %422 = vector.broadcast %401 : vector<1x128xf32> to vector<32x128xf32>
    %423 = arith.addf %421, %422 : vector<32x128xf32>
    %424 = arith.truncf %423 : vector<32x128xf32> to vector<32x128xbf16>
    %c0_158 = arith.constant 0 : index
    %c0_159 = arith.constant 0 : index
    %425 = vector.load %arg17[%c0_158, %c0_159] : memref<128x128xbf16, #tpu.memory_space<vmem>>, vector<128x128xbf16>
    %cst_160 = arith.constant dense<0.000000e+00> : vector<32x128xf32>
    %426 = tpu.matmul %424, %425, %cst_160 {dimension_numbers = #tpu.dot_dimension_numbers<[1], [0], [0], [1], [0, 0, 1, 1], [], []>} : vector<32x128xbf16>, vector<128x128xbf16>, vector<32x128xf32> -> vector<32x128xf32>
    %c0_161 = arith.constant 0 : index
    %c0_162 = arith.constant 0 : index
    %427 = vector.load %arg18[%c0_161, %c0_162] : memref<1x128xf32, #tpu.memory_space<vmem>>, vector<1x128xf32>
    %428 = vector.broadcast %427 : vector<1x128xf32> to vector<32x128xf32>
    %429 = arith.addf %426, %428 : vector<32x128xf32>
    %c0_163 = arith.constant 0 : index
    %c0_164 = arith.constant 0 : index
    %430 = vector.load %arg19[%c0_163, %c0_164] : memref<32x128xf32, #tpu.memory_space<vmem>>, vector<32x128xf32>
    tpu.vector_store %arg19[%c0_163, %c0_164], %429 {strides = array<i32>} : memref<32x128xf32, #tpu.memory_space<vmem>>, vector<32x128xf32>,
    %cst_165 = arith.constant dense<0xFF800000> : vector<32xf32>
    %431 = vector.multi_reduction <maximumf>, %429, %cst_165 [1] : vector<32x128xf32> to vector<32xf32>
    %432 = vector.shape_cast %431 : vector<32xf32> to vector<32x1xf32>
    %433 = vector.broadcast %432 : vector<32x1xf32> to vector<32x128xf32>
    %434 = arith.subf %429, %433 : vector<32x128xf32>
    %435 = math.exp %434 : vector<32x128xf32>
    %cst_166 = arith.constant dense<0.000000e+00> : vector<32xf32>
    %436 = vector.multi_reduction <add>, %435, %cst_166 [1] : vector<32x128xf32> to vector<32xf32>
    %437 = vector.shape_cast %436 : vector<32xf32> to vector<32x1xf32>
    %438 = math.log %437 : vector<32x1xf32>
    %439 = vector.broadcast %438 : vector<32x1xf32> to vector<32x128xf32>
    %440 = arith.subf %434, %439 : vector<32x128xf32>
    %c0_167 = arith.constant 0 : index
    %c0_168 = arith.constant 0 : index
    %441 = vector.load %arg2[%c0_167, %c0_168] : memref<32x128xf32, #tpu.memory_space<vmem>>, vector<32x128xf32>
    %cst_169 = arith.constant 0.000000e+00 : f32
    %442 = vector.broadcast %cst_169 : f32 to vector<32x128xf32>
    %443 = arith.subf %442, %440 : vector<32x128xf32>
    %444 = arith.mulf %443, %441 : vector<32x128xf32>
    %445 = vector.shape_cast %444 : vector<32x128xf32> to vector<1x32x128xf32>
    %cst_170 = arith.constant dense<0.000000e+00> : vector<1xf32>
    %446 = vector.multi_reduction <add>, %445, %cst_170 [1, 2] : vector<1x32x128xf32> to vector<1xf32>
    %447 = vector.shape_cast %446 : vector<1xf32> to vector<1x1x1xf32>
    %448 = vector.extract %447[0, 0, 0] : f32 from vector<1x1x1xf32>
    %449 = vector.shape_cast %441 : vector<32x128xf32> to vector<1x32x128xf32>
    %cst_171 = arith.constant dense<0.000000e+00> : vector<1xf32>
    %450 = vector.multi_reduction <add>, %449, %cst_171 [1, 2] : vector<1x32x128xf32> to vector<1xf32>
    %451 = vector.shape_cast %450 : vector<1xf32> to vector<1x1x1xf32>
    %452 = vector.extract %451[0, 0, 0] : f32 from vector<1x1x1xf32>
    %453 = arith.divf %448, %452 : f32
    %454 = vector.broadcast %453 : f32 to vector<1x1xf32>
    %c0_172 = arith.constant 0 : index
    %c0_173 = arith.constant 0 : index
    %455 = vector.load %arg20[%c0_172, %c0_173] : memref<1x1xf32, #tpu.memory_space<vmem>>, vector<1x1xf32>
    tpu.vector_store %arg20[%c0_172, %c0_173], %454 {strides = array<i32>} : memref<1x1xf32, #tpu.memory_space<vmem>>, vector<1x1xf32>,
    return
  }
}

</mosaic_0001>

<bundles_post_ra>
// kernel: ner_forward.1
= control target key start
LH: loop header
LB: loop body
LE: loop exit
PB: predicated region body
PF: predicated region fallthrough
CT: control target
= control target key end

     0   :  { %s6553_s0 = inlined_call_operand.vmem [shape: f32[32,128], index: 0, kind: input, shape index: {}]   ;;  %s6554_s1 = inlined_call_operand.vmem [shape: f32[2,16], index: 1, kind: input, shape index: {}]   ;;  %s6555_s2 = inlined_call_operand.vmem [shape: f32[32,128], index: 2, kind: input, shape index: {}]   ;;  %s6556_s3 = inlined_call_operand.vmem [shape: f32[1,128], index: 3, kind: input, shape index: {}]   ;;  %s6557_s4 = inlined_call_operand.vmem [shape: f32[1,128], index: 4, kind: input, shape index: {}]   ;;  %s6558_s5 = inlined_call_operand.hbm [shape: bf16[2,128,384], index: 5, kind: input, shape index: {}]   ;;  %s6559_s6 = inlined_call_operand.vmem [shape: f32[2,1,384], index: 6, kind: input, shape index: {}]   ;;  %s6560_s7 = inlined_call_operand.vmem [shape: bf16[2,128,128], index: 7, kind: input, shape index: {}]   ;;  %s6561_s8 = inlined_call_operand.vmem [shape: f32[2,1,128], index: 8, kind: input, shape index: {}]   ;;  %s6562_s9 = inlined_call_operand.vmem [shape: f32[2,1,128], index: 9, kind: input, shape index: {}]   ;;  %s6563_s10 = inlined_call_operand.vmem [shape: f32[2,1,128], index: 10, kind: input, shape index: {}]   ;;  %s6564_s11 = inlined_call_operand.vmem [shape: bf16[2,128,512], index: 11, kind: input, shape index: {}]   ;;  %s6565_s12 = inlined_call_operand.vmem [shape: f32[2,1,512], index: 12, kind: input, shape index: {}]   ;;  %s6566_s13 = inlined_call_operand.hbm [shape: bf16[2,512,128], index: 13, kind: input, shape index: {}]   ;;  %s6567_s14 = inlined_call_operand.vmem [shape: f32[2,1,128], index: 14, kind: input, shape index: {}]   ;;  %s6568_s15 = inlined_call_operand.vmem [shape: f32[2,1,128], index: 15, kind: input, shape index: {}]   ;;  %s6569_s16 = inlined_call_operand.vmem [shape: f32[2,1,128], index: 16, kind: input, shape index: {}]   ;;  %s6570_s17 = inlined_call_operand.vmem [shape: bf16[128,128], index: 17, kind: input, shape index: {}]   ;;  %s6571_s18 = inlined_call_operand.vmem [shape: f32[1,128], index: 18, kind: input, shape index: {}]   ;;  %s6572_s19 = inlined_call_operand.vmem [shape: f32[32,128], index: 19, kind: output, shape index: {0}]   ;;  %s6573_s20 = inlined_call_operand.hbm [shape: f32[1,1], index: 20, kind: output, shape index: {1}]  }
   0x1   :  { %6576 = sst [smem:[#allocation11_spill]] %s6553_s0 }
   0x2   :  { %6577 = sst [smem:[#allocation12_spill]] %s6554_s1 }
   0x3   :  { %6578 = sst [smem:[#allocation13_spill]] %s6555_s2 }
   0x4   :  { %6579 = sst [smem:[#allocation14_spill]] %s6556_s3 }
   0x5   :  { %6580 = sst [smem:[#allocation15_spill]] %s6557_s4 }
   0x6   :  { %26 = vsyncpa [#allocation3], 0 }
   0x7   :  { %27 = vsyncpa [#allocation6], 0 }
   0x8   :  { %28 = vsyncpa [#allocation4], 0  ;;  %s43_s23 = sshll.u32 %s6558_s5, 4  ;;  %s5208_s24 = smov [#allocation2]   ;;  %s44_s23 = int_to_ptr.hbm [resolvable:$true] %s43_s23 }
   0x9   :  { %s45_s2 = sshll.u32 %s5208_s24, 4  ;;  %s70_s26 = sshll.u32 %s6566_s13, 4  ;;  %s46_s2 = int_to_ptr.vmem [resolvable:$true] %s45_s2  ;;  %s71_s26 = int_to_ptr.hbm [resolvable:$true] %s70_s26 }
   0xa   :  { %s5209_s27 = smov 192   ;;  %s5210_s28 = smov 12  }
   0xb   :  { %51 = dma.hbm_to_vmem [thread:$0]  %s44_s23, 6144, %s46_s2, [#allocation3], %s5209_s27, %s5209_s27, %s5210_s28  }
   0xc   :  { %s5211_s4 = smov [#allocation5]   ;;  %s5212_s30 = smov 64  }
   0xd   :  { %s72_s29 = sshll.u32 %s5211_s4, 4  ;;  %s5213_s0 = smov 4   ;;  %s73_s29 = int_to_ptr.vmem [resolvable:$true] %s72_s29 }
   0xe   :  { %78 = dma.hbm_to_vmem [thread:$0]  %s71_s26, 8192, %s73_s29, [#allocation6], %s5212_s30, %s5212_s30, %s5213_s0  }
   0xf   :  { %5202 = dma.done.wait [#allocation3], 6144  }
  0x10   :  { %5203 = vsyncadd [#allocation3], 4294961152 }
  0x11   :  { %5204 = dma.done.wait [#allocation6], 8192  }
  0x12   :  { %5205 = vsyncadd [#allocation6], 4294959104  ;;  %s6581_s1 = sld [smem:[#allocation11_spill]]  ;;  %v5214_v2 = vmov 128.0   ;;  %v3899_v19 = vld [vmem:[#allocation2 + $0xa8] sm:$0xf] }
  0x13   :  { %4942 = vrcp.f32 %v5214_v2  ;;  %v4707_v20 = vld [vmem:[#allocation2 + $0xb0] sm:$0xf0]  ;;  %v4706_v21 = vld [vmem:[#allocation2 + $0xac] sm:$0xf]  ;;  %v3901_v23 = vld [vmem:[#allocation2 + $0xb4] sm:$0xf0] }
  0x14   :  { %v3900_v22 = vor.u32 %v4707_v20, %v3899_v19  ;;  %v3907_v24 = vld [vmem:[#allocation2 + $0xb0] sm:$0xf]  ;;  %v4708_v25 = vld [vmem:[#allocation2 + $0xb8] sm:$0xf0]  ;;  %v3904_v26 = vor.u32 %v4706_v21, %v3901_v23  ;;  %v4703_v30 = vld [vmem:[#allocation2 + $0x94] sm:$0xf] }
  0x15   :  { %v3908_v27 = vor.u32 %v4708_v25, %v3907_v24  ;;  %v3887_v28 = vld [vmem:[#allocation2 + $0x90] sm:$0xf]  ;;  %v4704_v29 = vld [vmem:[#allocation2 + $0x98] sm:$0xf0]  ;;  %v3889_v32 = vld [vmem:[#allocation2 + $0x9c] sm:$0xf0] }
  0x16   :  { %376 = vmatpush.bf16.msra.mxu0 %v3900_v22  ;;  %395 = vmatpush.bf16.msra.mxu1 %v3904_v26  ;;  %v3888_v31 = vor.u32 %v4704_v29, %v3887_v28  ;;  %v3895_v33 = vld [vmem:[#allocation2 + $0x98] sm:$0xf]  ;;  %v4705_v34 = vld [vmem:[#allocation2 + $0xa0] sm:$0xf0]  ;;  %v3892_v35 = vor.u32 %v4703_v30, %v3889_v32  ;;  %v4700_v39 = vld [vmem:[#allocation2 + $0x7c] sm:$0xf] }
  0x17   :  { %414 = vmatpush.bf16.msra.mxu2 %v3908_v27  ;;  %v3896_v36 = vor.u32 %v4705_v34, %v3895_v33  ;;  %v3875_v37 = vld [vmem:[#allocation2 + $0x78] sm:$0xf]  ;;  %v4701_v38 = vld [vmem:[#allocation2 + $0x80] sm:$0xf0]  ;;  %v3877_v41 = vld [vmem:[#allocation2 + $0x84] sm:$0xf0] }
  0x18   :  { %v98_v0 = vld [vmem:[%s6581_s1] sm:$0xff]  ;;  %v99_v1 = vld [vmem:[%s6581_s1 + $0x8] sm:$0xff]  ;;  %v5338_v5 = vld [vmem:[%s6581_s1 + $0x10] sm:$0xff]  ;;  %v3876_v40 = vor.u32 %v4701_v38, %v3875_v37  ;;  %v3880_v44 = vor.u32 %v4700_v39, %v3877_v41  ;;  %s6582_s27 = sld [smem:[#allocation14_spill]]  ;;  %vm436_vm13 = vcmask 523264   ;;  %vm462_vm14 = vcmask 130048  }
  0x19   :  { %104 = vadd.xlane.f32.xlu0 %v98_v0  ;;  %v4943_v3 = vpop.eup %4942  ;;  %108 = vadd.xlane.f32.xlu2 %v5338_v5  ;;  %v5344_v7 = vld [vmem:[%s6581_s1 + $0x18] sm:$0xff]  ;;  %v3883_v42 = vld [vmem:[#allocation2 + $0x80] sm:$0xf]  ;;  %v4702_v43 = vld [vmem:[#allocation2 + $0x88] sm:$0xf0]  ;;  %s6583_s29 = sld [smem:[#allocation15_spill]] }
  0x1a   :  { %v113_v4 = vmul.f32 128.0, %v4943_v3  ;;  %vm117_vm0 = vweird.f32 %v4943_v3  ;;  %377 = vmatpush.bf16.msra.mxu0 %v3888_v31  ;;  %396 = vmatpush.bf16.msra.mxu1 %v3892_v35  ;;  %v3884_v45 = vor.u32 %v4702_v43, %v3883_v42  ;;  %v3863_v46 = vld [vmem:[#allocation2 + $0x60] sm:$0xf]  ;;  %v4698_v47 = vld [vmem:[#allocation2 + $0x68] sm:$0xf0]  ;;  %s6584_s13 = sld [smem:[#allocation12_spill]] }
  0x1b   :  { %415 = vmatpush.bf16.msra.mxu2 %v3896_v36  ;;  %v4697_v48 = vld [vmem:[#allocation2 + $0x64] sm:$0xf]  ;;  %v3864_v49 = vor.u32 %v4698_v47, %v3863_v46  ;;  %v3865_v50 = vld [vmem:[#allocation2 + $0x6c] sm:$0xf0]  ;;  %v3871_v51 = vld [vmem:[#allocation2 + $0x68] sm:$0xf] }
  0x1c   :  { %v114_v6 = vsub.f32 1.0, %v113_v4  ;;  %v4699_v52 = vld [vmem:[#allocation2 + $0x70] sm:$0xf0]  ;;  %v3868_v53 = vor.u32 %v4697_v48, %v3865_v50  ;;  %v3851_v55 = vld [vmem:[#allocation2 + $0x48] sm:$0xf]  ;;  %s3800_s2 = sshll.u32 %s6573_s20, 4  ;;  %s3801_s2 = int_to_ptr.hbm [resolvable:$true] %s3800_s2 }
  0x1d   :  { %v3872_v54 = vor.u32 %v4699_v52, %v3871_v51  ;;  %v4695_v56 = vld [vmem:[#allocation2 + $0x50] sm:$0xf0]  ;;  %v4694_v57 = vld [vmem:[#allocation2 + $0x4c] sm:$0xf]  ;;  %v3853_v59 = vld [vmem:[#allocation2 + $0x54] sm:$0xf0] }
  0x1e   :  { %v115_v8 = vmul.f32 %v4943_v3, %v114_v6  ;;  %378 = vmatpush.bf16.msra.mxu0 %v3876_v40  ;;  %397 = vmatpush.bf16.msra.mxu1 %v3880_v44  ;;  %v3852_v58 = vor.u32 %v4695_v56, %v3851_v55  ;;  %v3859_v60 = vld [vmem:[#allocation2 + $0x50] sm:$0xf]  ;;  %v4696_v61 = vld [vmem:[#allocation2 + $0x58] sm:$0xf0]  ;;  %v3856_v62 = vor.u32 %v4694_v57, %v3853_v59  ;;  %v3841_v6 = vld [vmem:[#allocation2 + $0x3c] sm:$0xf0] }
  0x1f   :  { %416 = vmatpush.bf16.msra.mxu2 %v3884_v45  ;;  %v3860_v63 = vor.u32 %v4696_v61, %v3859_v60  ;;  %v4692_v2 = vld [vmem:[#allocation2 + $0x38] sm:$0xf0]  ;;  %v3829_v19 = vld [vmem:[#allocation2 + $0x24] sm:$0xf0]  ;;  %v3835_v20 = vld [vmem:[#allocation2 + $0x20] sm:$0xf] }
  0x20   :  { %v116_v9 = vadd.f32 %v4943_v3, %v115_v8  ;;  %v3847_v8 = vld [vmem:[#allocation2 + $0x38] sm:$0xf]  ;;  %v4690_v21 = vld [vmem:[#allocation2 + $0x28] sm:$0xf0]  ;;  %v3815_v25 = vld [vmem:[#allocation2] sm:$0xf] }
  0x21   :  { %106 = vadd.xlane.f32.xlu0 %v99_v1  ;;  %110 = vadd.xlane.f32.xlu2 %v5344_v7  ;;  %v3836_v24 = vor.u32 %v4690_v21, %v3835_v20  ;;  %v4686_v26 = vld [vmem:[#allocation2 + $0x8] sm:$0xf0]  ;;  %v4685_v27 = vld [vmem:[#allocation2 + $0x4] sm:$0xf]  ;;  %v3817_v30 = vld [vmem:[#allocation2 + $0xc] sm:$0xf0] }
  0x22   :  { %v5347_v10 = vsel %vm117_vm0, %v4943_v3, %v116_v9  ;;  %379 = vmatpush.bf16.msra.mxu0 %v3864_v49  ;;  %398 = vmatpush.bf16.msra.mxu1 %v3868_v53  ;;  %v4691_v3 = vld [vmem:[#allocation2 + $0x34] sm:$0xf]  ;;  %v4693_v9 = vld [vmem:[#allocation2 + $0x40] sm:$0xf0]  ;;  %v3816_v29 = vor.u32 %v4686_v26, %v3815_v25  ;;  %v3823_v31 = vld [vmem:[#allocation2 + $0x8] sm:$0xf]  ;;  %v3820_v35 = vor.u32 %v4685_v27, %v3817_v30 }
  0x23   :  { %417 = vmatpush.bf16.msra.mxu2 %v3872_v54  ;;  %v4687_v32 = vld [vmem:[#allocation2 + $0x10] sm:$0xf0]  ;;  %v4927_v57 = vld [vmem:[%s6582_s27] ss:$0 sm:$0xff] }
  0x24   :  { %v3824_v37 = vor.u32 %v4687_v32, %v3823_v31 }
  0x26   :  { %380 = vmatpush.bf16.msra.mxu0 %v3852_v58  ;;  %399 = vmatpush.bf16.msra.mxu1 %v3856_v62  ;;  %v4928_v62 = vld [vmem:[%s6583_s29] ss:$0 sm:$0xff]  ;;  %s6591_s29 = sld [smem:[#allocation13_spill]] }
  0x27   :  { %418 = vmatpush.bf16.msra.mxu2 %v3860_v63 }
  0x8c   :  { %v105_v11 = vpop.xlane.xlu0 %104 }
  0x8d   :  { %v119_v12 = vmul.f32 %v5347_v10, %v105_v11  ;;  %v3844_v11 = vor.u32 %v4691_v3, %v3841_v6 }
  0x8f   :  { %v5350_v13 = vsub.f32 %v98_v0, %v119_v12  ;;  %v109_v0 = vpop.xlane.xlu2 %108  ;;  %v3848_v12 = vor.u32 %v4693_v9, %v3847_v8  ;;  %400 = vmatpush.bf16.msra.mxu1 %v3844_v11 }
  0x90   :  { %v121_v22 = vmul.f32 %v5347_v10, %v109_v0 }
  0x91   :  { %v127_v14 = vmul.f32 %v5350_v13, %v5350_v13  ;;  %419 = vmatpush.bf16.msra.mxu2 %v3848_v12 }
  0x92   :  { %v5363_v39 = vsub.f32 %v5338_v5, %v121_v22 }
  0x93   :  { %131 = vadd.xlane.f32.xlu1 %v127_v14  ;;  %v3827_v14 = vld [vmem:[#allocation2 + $0x18] sm:$0xf] }
  0x94   :  { %v107_v15 = vpop.xlane.xlu0 %106  ;;  %v129_v41 = vmul.f32 %v5363_v39, %v5363_v39 }
  0x95   :  { %v120_v16 = vmul.f32 %v5347_v10, %v107_v15  ;;  %v4689_v15 = vld [vmem:[#allocation2 + $0x20] sm:$0xf0]  ;;  %420 = vmatpush.bf16.msra.mxu2 %v3836_v24 }
  0x96   :  { %135 = vadd.xlane.f32.xlu0 %v129_v41 }
  0x97   :  { %v5355_v17 = vsub.f32 %v99_v1, %v120_v16  ;;  %v3839_v1 = vld [vmem:[#allocation2 + $0x30] sm:$0xf]  ;;  %v4688_v16 = vld [vmem:[#allocation2 + $0x1c] sm:$0xf]  ;;  %v111_v34 = vpop.xlane.xlu2 %110 }
  0x98   :  { %v3840_v4 = vor.u32 %v4692_v2, %v3839_v1  ;;  %v3832_v23 = vor.u32 %v4688_v16, %v3829_v19  ;;  %v122_v36 = vmul.f32 %v5347_v10, %v111_v34  ;;  %v240_v34 = vld [vmem:[%s6559_s6] sm:$0x7] }
  0x99   :  { %v128_v18 = vmul.f32 %v5355_v17, %v5355_v17  ;;  %421 = vmatpush.bf16.msra.mxu2 %v3824_v37 }
  0x9a   :  { %381 = vmatpush.bf16.msra.mxu0 %v3840_v4  ;;  %401 = vmatpush.bf16.msra.mxu1 %v3832_v23  ;;  %v5366_v40 = vsub.f32 %v5344_v7, %v122_v36  ;;  %v243_v36 = vperm.slane %v240_v34, 1 }
  0x9b   :  { %133 = vadd.xlane.f32.xlu1 %v128_v18  ;;  %v3828_v18 = vor.u32 %v4689_v15, %v3827_v14 }
  0x9c   :  { %v130_v42 = vmul.f32 %v5366_v40, %v5366_v40 }
  0x9e   :  { %382 = vmatpush.bf16.msra.mxu0 %v3828_v18  ;;  %402 = vmatpush.bf16.msra.mxu1 %v3820_v35 }
  0xa2   :  { %383 = vmatpush.bf16.msra.mxu0 %v3816_v29 }
  0xa3   :  { %137 = vadd.xlane.f32.xlu1 %v130_v42  ;;  %v244_v42 = vperm.slane %v240_v34, 2 }
 0x106   :  { %v132_v28 = vpop.xlane.xlu1 %131 }
 0x107   :  { %v139_v33 = vmul.f32 %v132_v28, %v5347_v10 }
 0x109   :  { %v143_v38 = vadd.f32 1e-12, %v139_v33  ;;  %v136_v3 = vpop.xlane.xlu0 %135 }
 0x10a   :  { %v141_v4 = vmul.f32 %v136_v3, %v5347_v10 }
 0x10b   :  { %4944 = vrsqrt.f32 %v143_v38  ;;  %vm153_vm2 = vweird.f32 %v143_v38 }
 0x10c   :  { %v145_v8 = vadd.f32 1e-12, %v141_v4 }
 0x10e   :  { %v134_v43 = vpop.xlane.xlu1 %133  ;;  %vm173_vm9 = vweird.f32 %v145_v8 }
 0x10f   :  { %v140_v44 = vmul.f32 %v134_v43, %v5347_v10 }
 0x111   :  { %v4945_v5 = vpop.eup %4944  ;;  %v144_v45 = vadd.f32 1e-12, %v140_v44  ;;  %v242_v44 = vperm.slane %v240_v34, 0 }
 0x112   :  { %v148_v46 = vmul.f32 %v4945_v5, %v143_v38  ;;  %vm154_vm1 = vweird.f32 %v4945_v5 }
 0x113   :  { %4946 = vrsqrt.f32 %v144_v45  ;;  %vm155_vm3 = vmor %vm153_vm2, %vm154_vm1  ;;  %vm163_vm5 = vweird.f32 %v144_v45 }
 0x114   :  { %v149_v7 = vmul.f32 %v4945_v5, %v148_v46 }
 0x116   :  { %v150_v47 = vmul.f32 0.5, %v149_v7  ;;  %v138_v2 = vpop.xlane.xlu1 %137 }
 0x118   :  { %v151_v48 = vsub.f32 1.5, %v150_v47 }
 0x119   :  { %v4947_v49 = vpop.eup %4946 }
 0x11a   :  { %v152_v50 = vmul.f32 %v4945_v5, %v151_v48  ;;  %v158_v51 = vmul.f32 %v4947_v49, %v144_v45  ;;  %vm164_vm4 = vweird.f32 %v4947_v49 }
 0x11b   :  { %vm165_vm6 = vmor %vm163_vm5, %vm164_vm4 }
 0x11c   :  { %v159_v52 = vmul.f32 %v4947_v49, %v158_v51  ;;  %v156_v53 = vsel %vm155_vm3, %v4945_v5, %v152_v50 }
 0x11d   :  { %v187_v56 = vmul.f32 %v156_v53, %v5350_v13 }
 0x11e   :  { %v160_v54 = vmul.f32 0.5, %v159_v52 }
 0x11f   :  { %v194_v61 = vmul.f32 %v4927_v57, %v187_v56 }
 0x120   :  { %v161_v55 = vsub.f32 1.5, %v160_v54 }
 0x121   :  { %v5381_v0 = vadd.f32 %v4928_v62, %v194_v61 }
 0x122   :  { %v162_v58 = vmul.f32 %v4947_v49, %v161_v55 }
 0x124   :  { %v166_v59 = vsel %vm165_vm6, %v4947_v49, %v162_v58 }
 0x125   :  { %v188_v60 = vmul.f32 %v166_v59, %v5355_v17  ;;  %v142_v17 = vmul.f32 %v138_v2, %v5347_v10 }
 0x127   :  { %v195_v63 = vmul.f32 %v4927_v57, %v188_v60  ;;  %v146_v6 = vadd.f32 1e-12, %v142_v17  ;;  %v5413_v17 = vld [vmem:[%s6584_s13] sm:$0x3] }
 0x128   :  { %v5416_v4 = vperm.slane %v5413_v17, 0 }
 0x129   :  { %v5383_v1 = vadd.f32 %v4928_v62, %v195_v63  ;;  %4948 = vrsqrt.f32 %v146_v6  ;;  %vm183_vm7 = vweird.f32 %v146_v6 }
 0x12a   :  { %4950 = vrsqrt.f32 %v145_v8 }
 0x12b   :  { %v206_v13 = vpack.c.bf16 %v5383_v1, %v5381_v0 }
 0x12d   :  { %384 = vmatmul.bf16.vlgmr.msra.gmra.mxu0 %v206_v13  ;;  %403 = vmatmul.bf16.vlgmr.msra.gmra.mxu1 %v206_v13 }
 0x12e   :  { %422 = vmatmul.bf16.vlgmr.msra.gmra.mxu2 %v206_v13 }
 0x12f   :  { %v4949_v9 = vpop.eup %4948 }
 0x130   :  { %v4951_v11 = vpop.eup %4950  ;;  %v178_v12 = vmul.f32 %v4949_v9, %v146_v6  ;;  %vm184_vm8 = vweird.f32 %v4949_v9 }
 0x131   :  { %v168_v14 = vmul.f32 %v4951_v11, %v145_v8  ;;  %vm174_vm10 = vweird.f32 %v4951_v11  ;;  %vm185_vm11 = vmor %vm183_vm7, %vm184_vm8 }
 0x132   :  { %v179_v15 = vmul.f32 %v4949_v9, %v178_v12  ;;  %vm175_vm12 = vmor %vm173_vm9, %vm174_vm10 }
 0x133   :  { %v169_v16 = vmul.f32 %v4951_v11, %v168_v14 }
 0x134   :  { %v180_v18 = vmul.f32 0.5, %v179_v15 }
 0x135   :  { %v170_v19 = vmul.f32 0.5, %v169_v16 }
 0x136   :  { %v181_v20 = vsub.f32 1.5, %v180_v18 }
 0x137   :  { %v171_v21 = vsub.f32 1.5, %v170_v19 }
 0x138   :  { %v182_v22 = vmul.f32 %v4949_v9, %v181_v20 }
 0x139   :  { %v172_v23 = vmul.f32 %v4951_v11, %v171_v21 }
 0x13a   :  { %v186_v24 = vsel %vm185_vm11, %v4949_v9, %v182_v22 }
 0x13b   :  { %v190_v25 = vmul.f32 %v186_v24, %v5366_v40  ;;  %v176_v26 = vsel %vm175_vm12, %v4951_v11, %v172_v23 }
 0x13c   :  { %v189_v27 = vmul.f32 %v176_v26, %v5363_v39 }
 0x13d   :  { %v197_v28 = vmul.f32 %v4927_v57, %v190_v25 }
 0x13e   :  { %v196_v29 = vmul.f32 %v4927_v57, %v189_v27 }
 0x13f   :  { %v5391_v30 = vadd.f32 %v4928_v62, %v197_v28 }
 0x140   :  { %v5393_v31 = vadd.f32 %v4928_v62, %v196_v29 }
 0x142   :  { %v207_v32 = vpack.c.bf16 %v5391_v30, %v5393_v31 }
 0x144   :  { %408 = vmatmul.bf16.gmra.mxu1 %v207_v32  ;;  %389 = vmatmul.bf16.gmra.mxu0 %v207_v32 }
 0x145   :  { %427 = vmatmul.bf16.gmra.mxu2 %v207_v32 }
 0x1aa   :  { %v404_v33 = vpop.f32.mrf.mxu1  ;;  %v385_v35 = vpop.f32.mrf.mxu0 }
 0x1ab   :  { %v405_v39 = vadd.f32 %v404_v33, %v243_v36  ;;  %v386_v48 = vadd.f32 %v385_v35, %v242_v44 }
 0x1b1   :  { %v423_v37 = vpop.f32.mrf.mxu2 }
 0x1b2   :  { %v406_v38 = vpop.f32.mrf.mxu1  ;;  %v387_v43 = vpop.f32.mrf.mxu0  ;;  %v424_v7 = vadd.f32 %v423_v37, %v244_v42 }
 0x1b3   :  { %v407_v40 = vadd.f32 %v406_v38, %v243_v36  ;;  %v388_v45 = vadd.f32 %v387_v43, %v242_v44 }
 0x1b5   :  { %v434_v41 = vpack.c.bf16 %v407_v40, %v405_v39  ;;  %v433_v50 = vpack.c.bf16 %v388_v45, %v386_v48 }
 0x1b7   :  { %v441_v5 = vsel %vm436_vm13, %v434_v41, 0 }
 0x1b8   :  { %450 = vmatpush.bf16.xpose.msra.mxu3 %v441_v5 }
 0x1b9   :  { %v425_v46 = vpop.f32.mrf.mxu2 }
 0x1ba   :  { %v426_v47 = vadd.f32 %v425_v46, %v244_v42 }
 0x1bc   :  { %v5401_v49 = vpack.c.bf16 %v426_v47, %v424_v7 }
 0x1bf   :  { %3909 = vmatmul.msk.bf16.vlgmr.msra.gmra.mxu3 %vm436_vm13, %v433_v50 }
 0x1c0   :  { %522 = vmatpush.bf16.msrb.mxu3 %v5401_v49 }
 0x1c1   :  { %v409_v51 = vpop.f32.mrf.mxu1  ;;  %v390_v52 = vpop.f32.mrf.mxu0 }
 0x1c2   :  { %v410_v53 = vadd.f32 %v409_v51, %v243_v36  ;;  %v391_v58 = vadd.f32 %v390_v52, %v242_v44 }
 0x1c8   :  { %v428_v62 = vpop.f32.mrf.mxu2 }
 0x1c9   :  { %v411_v54 = vpop.f32.mrf.mxu1  ;;  %v392_v57 = vpop.f32.mrf.mxu0  ;;  %v429_v63 = vadd.f32 %v428_v62, %v244_v42 }
 0x1ca   :  { %v412_v55 = vadd.f32 %v411_v54, %v243_v36  ;;  %v393_v60 = vadd.f32 %v392_v57, %v242_v44 }
 0x1cc   :  { %v640_v56 = vpack.c.bf16 %v412_v55, %v410_v53  ;;  %v639_v61 = vpack.c.bf16 %v393_v60, %v391_v58 }
 0x1ce   :  { %v646_v59 = vsel %vm436_vm13, %v640_v56, 0 }
 0x1cf   :  { %655 = vmatpush.bf16.xpose.msrb.mxu2 %v646_v59 }
 0x1d0   :  { %v430_v13 = vpop.f32.mrf.mxu2 }
 0x1d1   :  { %v431_v2 = vadd.f32 %v430_v13, %v244_v42  ;;  %v5434_v13 = vperm.slane %v5413_v17, 1 }
 0x1d3   :  { %v5407_v3 = vpack.c.bf16 %v431_v2, %v429_v63 }
 0x1d5   :  { %726 = vmatpush.bf16.msrb.mxu1 %v5407_v3 }
 0x1d6   :  { %3913 = vmatmul.msk.bf16.vlgmr.msrb.gmra.mxu2 %vm436_vm13, %v639_v61 }
 0x242   :  { %v452_v6 = vpop.f32.mrf.mxu3 }
 0x243   :  { %v457_v8 = vmul.f32 0.125, %v452_v6 }
 0x245   :  { %v460_v9 = vadd.f32 %v5416_v4, %v457_v8 }
 0x247   :  { %v463_v11 = vsel %vm462_vm14, %v460_v9, -inf }
 0x248   :  { %464 = vmax.xlane.f32.xlu2 %v463_v11 }
 0x24a   :  { %v454_v12 = vpop.f32.mrf.mxu3 }
 0x24b   :  { %v458_v14 = vmul.f32 0.125, %v454_v12 }
 0x24d   :  { %v461_v15 = vadd.f32 %v5416_v4, %v458_v14 }
 0x24f   :  { %v466_v16 = vsel %vm462_vm14, %v461_v15, -inf }
 0x250   :  { %467 = vmax.xlane.f32.xlu0 %v466_v16 }
 0x259   :  { %v657_v60 = vpop.f32.mrf.mxu2 }
 0x264   :  { %533 = vrot.lane.b32.xlu0 %v434_v41, %s5212_s30 }
 0x26c   :  { %734 = vrot.lane.b32.xlu0 %v639_v61, %s5212_s30  ;;  %v659_v61 = vpop.f32.mrf.mxu2 }
 0x2bb   :  { %v465_v18 = vpop.xlane.xlu2 %464 }
 0x2bc   :  { %v469_v19 = vsub.f32 %v460_v9, %v465_v18 }
 0x2be   :  { %v471_v20 = vmul.f32 1.442695, %v469_v19 }
 0x2c0   :  { %4952 = vpow2.f32 %v471_v20 }
 0x2c3   :  { %v468_v21 = vpop.xlane.xlu0 %467 }
 0x2c4   :  { %v470_v22 = vsub.f32 %v461_v15, %v468_v21 }
 0x2c6   :  { %v4953_v23 = vpop.eup %4952  ;;  %v473_v24 = vmul.f32 1.442695, %v470_v22  ;;  %v662_v22 = vmul.f32 0.125, %v657_v60 }
 0x2c7   :  { %v475_v25 = vsel %vm462_vm14, %v4953_v23, 0.0 }
 0x2c8   :  { %4954 = vpow2.f32 %v473_v24  ;;  %476 = vadd.xlane.f32.xlu1 %v475_v25 }
 0x2ce   :  { %v4955_v26 = vpop.eup %4954 }
 0x2cf   :  { %v478_v27 = vsel %vm462_vm14, %v4955_v26, 0.0 }
 0x2d0   :  { %479 = vadd.xlane.f32.xlu2 %v478_v27  ;;  %v665_v27 = vadd.f32 %v5434_v13, %v662_v22 }
 0x2d6   :  { %v534_v28 = vpop.permute.xlu0 %533 }
 0x2d7   :  { %v539_v29 = vsel %vm436_vm13, %v534_v28, 0 }
 0x2d8   :  { %548 = vmatpush.bf16.xpose.msra.mxu3 %v539_v29  ;;  %v667_v29 = vsel %vm462_vm14, %v665_v27, -inf }
 0x2de   :  { %v735_v53 = vpop.permute.xlu0 %734 }
 0x2e1   :  { %530 = vrot.lane.b32.xlu1 %v433_v50, %s5212_s30 }
 0x2e8   :  { %737 = vrot.lane.b32.xlu2 %v640_v56, %s5212_s30 }
 0x33b   :  { %v477_v32 = vpop.xlane.xlu1 %476 }
 0x33c   :  { %4956 = vrcp.f32 %v477_v32  ;;  %v492_v42 = vand.u32 2147483648, %v477_v32  ;;  %vm486_vm0 = vweird.f32 %v477_v32  ;;  %v490_v44 = vand.u32 2147483647, %v477_v32 }
 0x33e   :  { %v493_v48 = vor.u32 1.1754944e-38, %v492_v42  ;;  %vm491_vm3 = vcmp.eq.f32.partialorder %v490_v44, 8.507059e+37 }
 0x342   :  { %v4957_v33 = vpop.eup %4956 }
 0x343   :  { %v482_v34 = vmul.f32 %v4957_v33, %v477_v32  ;;  %v480_v35 = vpop.xlane.xlu2 %479  ;;  %vm487_vm15 = vweird.f32 %v4957_v33 }
 0x344   :  { %4958 = vrcp.f32 %v480_v35  ;;  %vm488_vm1 = vmor %vm486_vm0, %vm487_vm15  ;;  %v506_v45 = vand.u32 2147483648, %v480_v35  ;;  %v504_v47 = vand.u32 2147483647, %v480_v35  ;;  %vm500_vm4 = vweird.f32 %v480_v35 }
 0x345   :  { %v483_v36 = vsub.f32 1.0, %v482_v34 }
 0x346   :  { %v507_v51 = vor.u32 1.1754944e-38, %v506_v45  ;;  %vm505_vm6 = vcmp.eq.f32.partialorder %v504_v47, 8.507059e+37 }
 0x347   :  { %v484_v37 = vmul.f32 %v4957_v33, %v483_v36 }
 0x349   :  { %v485_v39 = vadd.f32 %v4957_v33, %v484_v37 }
 0x34a   :  { %v4959_v38 = vpop.eup %4958 }
 0x34b   :  { %v496_v40 = vmul.f32 %v4959_v38, %v480_v35  ;;  %v738_v41 = vpop.permute.xlu2 %737  ;;  %v489_v46 = vsel %vm488_vm1, %v4957_v33, %v485_v39  ;;  %vm501_vm2 = vweird.f32 %v4959_v38 }
 0x34c   :  { %v743_v43 = vsel %vm436_vm13, %v738_v41, 0  ;;  %vm502_vm5 = vmor %vm500_vm4, %vm501_vm2  ;;  %v494_v52 = vsel %vm491_vm3, %v493_v48, %v489_v46 }
 0x34d   :  { %v497_v5 = vsub.f32 1.0, %v496_v40  ;;  %752 = vmatpush.bf16.xpose.msra.mxu2 %v743_v43  ;;  %v509_v56 = vmul.f32 %v4953_v23, %v494_v52  ;;  %v663_v23 = vmul.f32 0.125, %v659_v61 }
 0x34f   :  { %v498_v7 = vmul.f32 %v4959_v38, %v497_v5 }
 0x351   :  { %v499_v50 = vadd.f32 %v4959_v38, %v498_v7 }
 0x353   :  { %v503_v54 = vsel %vm502_vm5, %v4959_v38, %v499_v50  ;;  %v531_v59 = vpop.permute.xlu1 %530 }
 0x354   :  { %3915 = vmatmul.msk.bf16.vlgmr.msra.gmra.mxu2 %vm436_vm13, %v735_v53  ;;  %v508_v55 = vsel %vm505_vm6, %v507_v51, %v503_v54 }
 0x355   :  { %v510_v57 = vmul.f32 %v4955_v26, %v508_v55  ;;  %v666_v26 = vadd.f32 %v5434_v13, %v663_v23 }
 0x357   :  { %v511_v58 = vpack.c.bf16 %v510_v57, %v509_v56  ;;  %v670_v28 = vsel %vm462_vm14, %v666_v26, -inf }
 0x359   :  { %3910 = vmatmul.msk.bf16.vlgmr.msrb.gmra.mxu3 %vm462_vm14, %v511_v58 }
 0x369   :  { %3911 = vmatmul.msk.bf16.vlgmr.msra.gmra.mxu3 %vm436_vm13, %v531_v59 }
 0x3d7   :  { %v754_v62 = vpop.f32.mrf.mxu2 }
 0x3d8   :  { %v759_v63 = vmul.f32 0.125, %v754_v62 }
 0x3da   :  { %v761_v2 = vadd.f32 %v759_v63, %v5434_v13 }
 0x3dc   :  { %v5437_v6 = vpop.f32.mrf.mxu3  ;;  %v763_v8 = vsel %vm462_vm14, %v761_v2, -inf }
 0x3dd   :  { %764 = vmax.xlane.f32.xlu0 %v763_v8 }
 0x3df   :  { %v756_v14 = vpop.f32.mrf.mxu2 }
 0x3e0   :  { %v760_v16 = vmul.f32 0.125, %v756_v14 }
 0x3e2   :  { %v762_v20 = vadd.f32 %v760_v16, %v5434_v13 }
 0x3e4   :  { %v5440_v9 = vpop.f32.mrf.mxu3  ;;  %v766_v25 = vsel %vm462_vm14, %v762_v20, -inf }
 0x3ec   :  { %v550_v11 = vpop.f32.mrf.mxu3 }
 0x3ed   :  { %v555_v12 = vmul.f32 0.125, %v550_v11 }
 0x3ef   :  { %v557_v15 = vadd.f32 %v555_v12, %v5416_v4 }
 0x3f1   :  { %v559_v18 = vsel %vm462_vm14, %v557_v15, -inf }
 0x3f2   :  { %560 = vmax.xlane.f32.xlu2 %v559_v18 }
 0x3f4   :  { %v552_v17 = vpop.f32.mrf.mxu3 }
 0x3f5   :  { %v556_v19 = vmul.f32 0.125, %v552_v17 }
 0x3f7   :  { %v558_v21 = vadd.f32 %v556_v19, %v5416_v4 }
 0x3f9   :  { %v562_v24 = vsel %vm462_vm14, %v558_v21, -inf }
 0x3fa   :  { %563 = vmax.xlane.f32.xlu1 %v562_v24  ;;  %767 = vmax.xlane.f32.xlu2 %v766_v25 }
 0x402   :  { %671 = vmax.xlane.f32.xlu1 %v670_v28  ;;  %668 = vmax.xlane.f32.xlu2 %v667_v29 }
 0x450   :  { %v765_v32 = vpop.xlane.xlu0 %764 }
 0x451   :  { %v769_v33 = vsub.f32 %v761_v2, %v765_v32 }
 0x453   :  { %v771_v34 = vmul.f32 1.442695, %v769_v33 }
 0x455   :  { %4960 = vpow2.f32 %v771_v34 }
 0x45b   :  { %v5452_v35 = vpop.eup %4960 }
 0x45c   :  { %v775_v36 = vsel %vm462_vm14, %v5452_v35, 0.0 }
 0x45d   :  { %776 = vadd.xlane.f32.xlu0 %v775_v36 }
 0x465   :  { %v561_v37 = vpop.xlane.xlu2 %560 }
 0x466   :  { %v565_v38 = vsub.f32 %v557_v15, %v561_v37 }
 0x468   :  { %v567_v39 = vmul.f32 1.442695, %v565_v38 }
 0x46a   :  { %4962 = vpow2.f32 %v567_v39 }
 0x46d   :  { %v564_v40 = vpop.xlane.xlu1 %563  ;;  %v768_v41 = vpop.xlane.xlu2 %767 }
 0x46e   :  { %v566_v42 = vsub.f32 %v558_v21, %v564_v40  ;;  %v770_v43 = vsub.f32 %v762_v20, %v768_v41 }
 0x470   :  { %v5456_v44 = vpop.eup %4962  ;;  %v569_v5 = vmul.f32 1.442695, %v566_v42  ;;  %v773_v45 = vmul.f32 1.442695, %v770_v43 }
 0x471   :  { %v571_v46 = vsel %vm462_vm14, %v5456_v44, 0.0 }
 0x472   :  { %4964 = vpow2.f32 %v569_v5  ;;  %572 = vadd.xlane.f32.xlu1 %v571_v46 }
 0x473   :  { %4966 = vpow2.f32 %v773_v45 }
 0x475   :  { %v669_v7 = vpop.xlane.xlu2 %668  ;;  %v672_v47 = vpop.xlane.xlu1 %671 }
 0x476   :  { %v673_v48 = vsub.f32 %v665_v27, %v669_v7  ;;  %v674_v53 = vsub.f32 %v666_v26, %v672_v47 }
 0x478   :  { %v5460_v50 = vpop.eup %4964  ;;  %v675_v51 = vmul.f32 1.442695, %v673_v48  ;;  %v677_v56 = vmul.f32 1.442695, %v674_v53 }
 0x479   :  { %v5462_v52 = vpop.eup %4966  ;;  %v574_v54 = vsel %vm462_vm14, %v5460_v50, 0.0 }
 0x47a   :  { %575 = vadd.xlane.f32.xlu0 %v574_v54  ;;  %v778_v55 = vsel %vm462_vm14, %v5462_v52, 0.0  ;;  %4968 = vpow2.f32 %v675_v51 }
 0x47b   :  { %779 = vadd.xlane.f32.xlu2 %v778_v55  ;;  %4970 = vpow2.f32 %v677_v56 }
 0x480   :  { %v5468_v57 = vpop.eup %4968 }
 0x481   :  { %v679_v58 = vsel %vm462_vm14, %v5468_v57, 0.0  ;;  %v5472_v59 = vpop.eup %4970 }
 0x482   :  { %v682_v60 = vsel %vm462_vm14, %v5472_v59, 0.0 }
 0x483   :  { %680 = vadd.xlane.f32.xlu2 %v679_v58 }
 0x48b   :  { %683 = vadd.xlane.f32.xlu2 %v682_v60  ;;  %609 = vrot.lane.b32.xlu1 %v5401_v49, %s5212_s30 }
 0x48e   :  { %813 = vrot.lane.b32.xlu0 %v5407_v3, %s5212_s30 }
 0x4d0   :  { %v5480_v61 = vpop.xlane.xlu0 %776 }
 0x4d1   :  { %v792_v56 = vand.u32 2147483648, %v5480_v61  ;;  %vm786_vm6 = vweird.f32 %v5480_v61 }
 0x4e5   :  { %v573_v62 = vpop.xlane.xlu1 %572 }
 0x4e6   :  { %4972 = vrcp.f32 %v573_v62  ;;  %v588_v17 = vand.u32 2147483648, %v573_v62  ;;  %vm582_vm8 = vweird.f32 %v573_v62  ;;  %v586_v21 = vand.u32 2147483647, %v573_v62 }
 0x4e7   :  { %4974 = vrcp.f32 %v5480_v61 }
 0x4e8   :  { %v589_v28 = vor.u32 1.1754944e-38, %v588_v17  ;;  %vm587_vm11 = vcmp.eq.f32.partialorder %v586_v21, 8.507059e+37 }
 0x4ec   :  { %v4973_v63 = vpop.eup %4972 }
 0x4ed   :  { %v578_v2 = vmul.f32 %v4973_v63, %v573_v62  ;;  %v576_v8 = vpop.xlane.xlu0 %575  ;;  %v5486_v49 = vpop.eup %4974  ;;  %vm583_vm7 = vweird.f32 %v4973_v63 }
 0x4ee   :  { %4976 = vrcp.f32 %v576_v8  ;;  %v5483_v11 = vpop.xlane.xlu2 %779  ;;  %v782_v23 = vmul.f32 %v5486_v49, %v5480_v61  ;;  %vm584_vm9 = vmor %vm582_vm8, %vm583_vm7  ;;  %v602_v24 = vand.u32 2147483648, %v576_v8  ;;  %v600_v27 = vand.u32 2147483647, %v576_v8 }
 0x4ef   :  { %v579_v12 = vsub.f32 1.0, %v578_v2  ;;  %4978 = vrcp.f32 %v5483_v11  ;;  %vm596_vm12 = vweird.f32 %v576_v8  ;;  %v806_v54 = vand.u32 2147483648, %v5483_v11 }
 0x4f0   :  { %v603_v34 = vor.u32 1.1754944e-38, %v602_v24  ;;  %v783_v37 = vsub.f32 1.0, %v782_v23  ;;  %vm601_vm0 = vcmp.eq.f32.partialorder %v600_v27, 8.507059e+37  ;;  %vm800_vm2 = vweird.f32 %v5483_v11 }
 0x4f1   :  { %v580_v14 = vmul.f32 %v4973_v63, %v579_v12  ;;  %vm787_vm3 = vweird.f32 %v5486_v49  ;;  %v790_v2 = vand.u32 2147483647, %v5480_v61 }
 0x4f2   :  { %v784_v47 = vmul.f32 %v5486_v49, %v783_v37  ;;  %vm5527_vm7 = vmor %vm786_vm6, %vm787_vm3 }
 0x4f3   :  { %v581_v16 = vadd.f32 %v4973_v63, %v580_v14 }
 0x4f4   :  { %v4977_v15 = vpop.eup %4976  ;;  %v785_v55 = vadd.f32 %v5486_v49, %v784_v47 }
 0x4f5   :  { %v5488_v3 = vpop.eup %4978  ;;  %v592_v18 = vmul.f32 %v4977_v15, %v576_v8  ;;  %v585_v25 = vsel %vm584_vm9, %v4973_v63, %v581_v16  ;;  %vm597_vm10 = vweird.f32 %v4977_v15  ;;  %v807_v8 = vor.u32 1.1754944e-38, %v806_v54 }
 0x4f6   :  { %v796_v19 = vmul.f32 %v5488_v3, %v5483_v11  ;;  %v5492_v20 = vpop.xlane.xlu2 %680  ;;  %v590_v33 = vsel %vm587_vm11, %v589_v28, %v585_v25  ;;  %vm598_vm15 = vmor %vm596_vm12, %vm597_vm10  ;;  %vm801_vm1 = vweird.f32 %v5488_v3  ;;  %v793_v16 = vor.u32 1.1754944e-38, %v792_v56 }
 0x4f7   :  { %v593_v22 = vsub.f32 1.0, %v592_v18  ;;  %4980 = vrcp.f32 %v5492_v20  ;;  %v605_v5 = vmul.f32 %v5456_v44, %v590_v33  ;;  %v804_v44 = vand.u32 2147483647, %v5483_v11  ;;  %vm5515_vm4 = vmor %vm800_vm2, %vm801_vm1 }
 0x4f8   :  { %v797_v29 = vsub.f32 1.0, %v796_v19  ;;  %v696_v11 = vand.u32 2147483648, %v5492_v20  ;;  %vm690_vm9 = vweird.f32 %v5492_v20  ;;  %v694_v14 = vand.u32 2147483647, %v5492_v20 }
 0x4f9   :  { %v594_v26 = vmul.f32 %v4977_v15, %v593_v22  ;;  %vm805_vm8 = vcmp.eq.f32.partialorder %v804_v44, 8.507059e+37  ;;  %vm791_vm12 = vcmp.eq.f32.partialorder %v790_v2, 8.507059e+37 }
 0x4fa   :  { %v798_v41 = vmul.f32 %v5488_v3, %v797_v29 }
 0x4fb   :  { %v595_v32 = vadd.f32 %v4977_v15, %v594_v26 }
 0x4fc   :  { %v799_v51 = vadd.f32 %v5488_v3, %v798_v41  ;;  %v4711_v41 = vld [vmem:[%s6560_s7 + $0x10] sm:$0xff] }
 0x4fd   :  { %v5497_v36 = vpop.eup %4980  ;;  %v599_v38 = vsel %vm598_vm15, %v4977_v15, %v595_v32  ;;  %v610_v39 = vpop.permute.xlu1 %609  ;;  %vm695_vm15 = vcmp.eq.f32.partialorder %v694_v14, 8.507059e+37 }
 0x4fe   :  { %v604_v40 = vsel %vm601_vm0, %v603_v34, %v599_v38  ;;  %v686_v42 = vmul.f32 %v5497_v36, %v5492_v20  ;;  %v684_v43 = vpop.xlane.xlu2 %683  ;;  %622 = vmatpush.bf16.msrb.mxu3 %v610_v39  ;;  %v803_v60 = vsel %vm5515_vm4, %v5488_v3, %v799_v51  ;;  %vm691_vm5 = vweird.f32 %v5497_v36 }
 0x4ff   :  { %v606_v45 = vmul.f32 %v5460_v50, %v604_v40  ;;  %4982 = vrcp.f32 %v684_v43  ;;  %v789_v3 = vsel %vm5527_vm7, %v5486_v49, %v785_v55  ;;  %v808_v18 = vsel %vm805_vm8, %v807_v8, %v803_v60  ;;  %vm5536_vm10 = vmor %vm690_vm9, %vm691_vm5  ;;  %v4712_v40 = vld [vmem:[%s6560_s7 + $0x18] sm:$0xff] }
 0x500   :  { %v687_v46 = vsub.f32 1.0, %v686_v42  ;;  %v814_v7 = vpop.permute.xlu0 %813  ;;  %v710_v17 = vand.u32 2147483648, %v684_v43  ;;  %v708_v22 = vand.u32 2147483647, %v684_v43  ;;  %v697_v20 = vor.u32 1.1754944e-38, %v696_v11 }
 0x501   :  { %v607_v48 = vpack.c.bf16 %v606_v45, %v605_v5  ;;  %v794_v23 = vsel %vm791_vm12, %v793_v16, %v789_v3  ;;  %vm704_vm0 = vweird.f32 %v684_v43  ;;  %v810_v49 = vmul.f32 %v5462_v52, %v808_v18  ;;  %v4716_v52 = vld [vmem:[%s6560_s7 + $0x38] sm:$0xff] }
 0x502   :  { %826 = vmatpush.bf16.msra.mxu3 %v814_v7  ;;  %v688_v53 = vmul.f32 %v5497_v36, %v687_v46  ;;  %v711_v25 = vor.u32 1.1754944e-38, %v710_v17  ;;  %vm709_vm2 = vcmp.eq.f32.partialorder %v708_v22, 8.507059e+37  ;;  %v809_v28 = vmul.f32 %v5452_v35, %v794_v23  ;;  %913 = vmatpush.bf16.msrb.mxu0 %v4716_v52  ;;  %v4715_v35 = vld [vmem:[%s6560_s7 + $0x30] sm:$0xff]  ;;  %v4709_v46 = vld [vmem:[%s6560_s7] sm:$0xff] }
 0x503   :  { %3912 = vmatmul.msk.bf16.vlgmr.msrb.gmra.mxu3 %vm462_vm14, %v607_v48  ;;  %v4065_v52 = vld [vmem:[%s6564_s11 + $0xf0] sm:$0xf0] }
 0x504   :  { %v689_v62 = vadd.f32 %v5497_v36, %v688_v53  ;;  %v811_v34 = vpack.c.bf16 %v810_v49, %v809_v28 }
 0x505   :  { %v4983_v50 = vpop.eup %4982 }
 0x506   :  { %v700_v63 = vmul.f32 %v4983_v50, %v684_v43  ;;  %v693_v19 = vsel %vm5536_vm10, %v5497_v36, %v689_v62  ;;  %vm705_vm11 = vweird.f32 %v4983_v50  ;;  %914 = vmatpush.bf16.msrb.mxu0 %v4715_v35  ;;  %v4710_v43 = vld [vmem:[%s6560_s7 + $0x8] sm:$0xff] }
 0x507   :  { %vm706_vm1 = vmor %vm704_vm0, %vm705_vm11  ;;  %v698_v26 = vsel %vm695_vm15, %v697_v20, %v693_v19  ;;  %v4071_v35 = vld [vmem:[%s6564_s11 + $0xe8] sm:$0xf] }
 0x508   :  { %v701_v15 = vsub.f32 1.0, %v700_v63  ;;  %v713_v32 = vmul.f32 %v5468_v57, %v698_v26  ;;  %v4714_v57 = vld [vmem:[%s6560_s7 + $0x28] sm:$0xff] }
 0x50a   :  { %v702_v21 = vmul.f32 %v4983_v50, %v701_v15  ;;  %915 = vmatpush.bf16.msrb.mxu0 %v4714_v57 }
 0x50c   :  { %v703_v24 = vadd.f32 %v4983_v50, %v702_v21 }
 0x50e   :  { %v707_v27 = vsel %vm706_vm1, %v4983_v50, %v703_v24 }
 0x50f   :  { %v712_v29 = vsel %vm709_vm2, %v711_v25, %v707_v27 }
 0x510   :  { %v714_v33 = vmul.f32 %v5472_v59, %v712_v29  ;;  %v4713_v59 = vld [vmem:[%s6560_s7 + $0x20] sm:$0xff] }
 0x511   :  { %916 = vmatpush.bf16.msrb.mxu0 %v4713_v59 }
 0x512   :  { %v715_v36 = vpack.c.bf16 %v714_v33, %v713_v32  ;;  %v4063_v32 = vld [vmem:[%s6564_s11 + $0xe0] sm:$0xf]  ;;  %v4747_v33 = vld [vmem:[%s6564_s11 + $0xec] sm:$0xf0] }
 0x513   :  { %3916 = vmatmul.msk.bf16.vlgmr.msra.gmra.mxu3 %vm462_vm14, %v811_v34  ;;  %v4745_v34 = vld [vmem:[%s6564_s11 + $0xe4] sm:$0xf] }
 0x514   :  { %3914 = vmatmul.msk.bf16.vlgmr.msrb.gmra.mxu1 %vm462_vm14, %v715_v36  ;;  %v4064_v36 = vor.u32 %v4747_v33, %v4063_v32  ;;  %v4068_v57 = vor.u32 %v4745_v34, %v4065_v52  ;;  %v4730_v32 = vld [vmem:[%s6564_s11 + $0x6c] sm:$0xf]  ;;  %v4009_v33 = vld [vmem:[%s6564_s11 + $0x78] sm:$0xf0]  ;;  %v4727_v52 = vld [vmem:[%s6564_s11 + $0x4c] sm:$0xf0] }
 0x515   :  { %917 = vmatpush.bf16.msrb.mxu0 %v4712_v40  ;;  %v4012_v34 = vor.u32 %v4730_v32, %v4009_v33  ;;  %v4930_v33 = vld [vmem:[%s6562_s9] ss:$0 sm:$0xff] }
 0x516   :  { %1236 = vmatpush.bf16.msra.mxu1 %v4064_v36  ;;  %1255 = vmatpush.bf16.msrb.mxu2 %v4068_v57  ;;  %v3983_v36 = vld [vmem:[%s6564_s11 + $0x40] sm:$0xf]  ;;  %v3985_v57 = vld [vmem:[%s6564_s11 + $0x50] sm:$0xf0] }
 0x519   :  { %918 = vmatpush.bf16.msrb.mxu0 %v4711_v41  ;;  %v4047_v41 = vld [vmem:[%s6564_s11 + $0xc0] sm:$0xf] }
 0x51d   :  { %919 = vmatpush.bf16.msrb.mxu0 %v4710_v43  ;;  %v4741_v43 = vld [vmem:[%s6564_s11 + $0xc4] sm:$0xf] }
 0x521   :  { %920 = vmatpush.bf16.msrb.mxu0 %v4709_v46  ;;  %v4055_v46 = vld [vmem:[%s6564_s11 + $0xc8] sm:$0xf] }
 0x586   :  { %v624_v37 = vpop.f32.mrf.mxu3 }
 0x58e   :  { %v626_v38 = vpop.f32.mrf.mxu3 }
 0x58f   :  { %v4907_v39 = vpack.i.bf16 %v626_v38, %v624_v37  ;;  %v4748_v37 = vld [vmem:[%s6564_s11 + $0xf4] sm:$0xf0]  ;;  %v4746_v38 = vld [vmem:[%s6564_s11 + $0xec] sm:$0xf] }
 0x590   :  { %v4072_v59 = vor.u32 %v4748_v37, %v4071_v35  ;;  %v4725_v35 = vld [vmem:[%s6564_s11 + $0x44] sm:$0xf]  ;;  %v3984_v37 = vor.u32 %v4727_v52, %v3983_v36 }
 0x591   :  { %4908 = vrot.lane.b32.xlu2 %v4907_v39, %s5212_s30  ;;  %v728_v44 = vpop.f32.mrf.mxu1  ;;  %v4073_v39 = vld [vmem:[%s6564_s11 + $0xf8] sm:$0xf0] }
 0x592   :  { %v4076_v40 = vor.u32 %v4746_v38, %v4073_v39  ;;  %1274 = vmatpush.bf16.msrb.mxu3 %v4072_v59  ;;  %v3991_v59 = vld [vmem:[%s6564_s11 + $0x48] sm:$0xf]  ;;  %v4728_v38 = vld [vmem:[%s6564_s11 + $0x54] sm:$0xf0]  ;;  %v3988_v39 = vor.u32 %v4725_v35, %v3985_v57 }
 0x594   :  { %1293 = vmatpush.bf16.msra.mxu0 %v4076_v40  ;;  %v3992_v40 = vor.u32 %v4728_v38, %v3991_v59 }
 0x596   :  { %v828_v42 = vpop.f32.mrf.mxu3 }
 0x599   :  { %v730_v58 = vpop.f32.mrf.mxu1 }
 0x59e   :  { %v830_v5 = vpop.f32.mrf.mxu3 }
 0x59f   :  { %v4912_v45 = vpack.i.bf16 %v830_v5, %v828_v42  ;;  %v4743_v42 = vld [vmem:[%s6564_s11 + $0xcc] sm:$0xf0] }
 0x5a0   :  { %v4048_v5 = vor.u32 %v4743_v42, %v4047_v41  ;;  %v4726_v41 = vld [vmem:[%s6564_s11 + $0x4c] sm:$0xf]  ;;  %v3993_v42 = vld [vmem:[%s6564_s11 + $0x58] sm:$0xf0] }
 0x5a1   :  { %4913 = vrot.lane.b32.xlu0 %v4912_v45, %s5212_s30  ;;  %v4049_v45 = vld [vmem:[%s6564_s11 + $0xd0] sm:$0xf0] }
 0x5a2   :  { %1237 = vmatpush.bf16.msra.mxu1 %v4048_v5  ;;  %v3967_v5 = vld [vmem:[%s6564_s11 + $0x20] sm:$0xf] }
 0x5eb   :  { %v4909_v7 = vpop.permute.xlu2 %4908 }
 0x5ec   :  { %v4911_v47 = vunpack.i.h.bf16 %v4909_v7  ;;  %v4910_v48 = vunpack.i.l.bf16 %v4909_v7  ;;  %v4744_v7 = vld [vmem:[%s6564_s11 + $0xd4] sm:$0xf0] }
 0x5ee   :  { %v637_v51 = vsel %vm436_vm13, %v5437_v6, %v4910_v48  ;;  %v638_v53 = vsel %vm436_vm13, %v5440_v9, %v4911_v47  ;;  %v4929_v6 = vld [vmem:[%s6561_s8] ss:$0 sm:$0xff]  ;;  %v4052_v47 = vor.u32 %v4741_v43, %v4049_v45  ;;  %v4056_v48 = vor.u32 %v4744_v7, %v4055_v46  ;;  %v4723_v45 = vld [vmem:[%s6564_s11 + $0x2c] sm:$0xf0]  ;;  %v4721_v46 = vld [vmem:[%s6564_s11 + $0x24] sm:$0xf] }
 0x5ef   :  { %v843_v54 = vpack.c.bf16 %v638_v53, %v637_v51  ;;  %v4742_v51 = vld [vmem:[%s6564_s11 + $0xcc] sm:$0xf]  ;;  %v4057_v53 = vld [vmem:[%s6564_s11 + $0xd8] sm:$0xf0]  ;;  %v3996_v43 = vor.u32 %v4726_v41, %v3993_v42 }
 0x5f0   :  { %1256 = vmatpush.bf16.msrb.mxu2 %v4052_v47  ;;  %1275 = vmatpush.bf16.msrb.mxu3 %v4056_v48  ;;  %v3968_v47 = vor.u32 %v4723_v45, %v3967_v5  ;;  %v3969_v48 = vld [vmem:[%s6564_s11 + $0x30] sm:$0xf0] }
 0x5f1   :  { %921 = vmatmul.bf16.vlgmr.msrb.gmra.mxu0 %v843_v54  ;;  %v4060_v54 = vor.u32 %v4742_v51, %v4057_v53  ;;  %v3975_v51 = vld [vmem:[%s6564_s11 + $0x28] sm:$0xf]  ;;  %v4724_v53 = vld [vmem:[%s6564_s11 + $0x34] sm:$0xf0] }
 0x5f3   :  { %1294 = vmatpush.bf16.msra.mxu0 %v4060_v54 }
 0x613   :  { %v4914_v50 = vpop.permute.xlu0 %4913 }
 0x614   :  { %v4916_v55 = vunpack.i.h.bf16 %v4914_v50  ;;  %v4915_v56 = vunpack.i.l.bf16 %v4914_v50  ;;  %v4739_v50 = vld [vmem:[%s6564_s11 + $0xac] sm:$0xf0] }
 0x616   :  { %v841_v60 = vsel %vm436_vm13, %v728_v44, %v4915_v56  ;;  %v842_v62 = vsel %vm436_vm13, %v730_v58, %v4916_v55  ;;  %v4031_v44 = vld [vmem:[%s6564_s11 + $0xa0] sm:$0xf]  ;;  %v4737_v55 = vld [vmem:[%s6564_s11 + $0xa4] sm:$0xf]  ;;  %v4033_v58 = vld [vmem:[%s6564_s11 + $0xb0] sm:$0xf0] }
 0x617   :  { %v844_v63 = vpack.c.bf16 %v842_v62, %v841_v60  ;;  %v4032_v56 = vor.u32 %v4739_v50, %v4031_v44  ;;  %v4039_v60 = vld [vmem:[%s6564_s11 + $0xa8] sm:$0xf]  ;;  %v4740_v62 = vld [vmem:[%s6564_s11 + $0xb4] sm:$0xf0]  ;;  %v3972_v44 = vor.u32 %v4721_v46, %v3969_v48  ;;  %v3976_v50 = vor.u32 %v4724_v53, %v3975_v51 }
 0x619   :  { %926 = vmatmul.bf16.gmra.mxu0 %v844_v63  ;;  %v4036_v63 = vor.u32 %v4737_v55, %v4033_v58  ;;  %1238 = vmatpush.bf16.msra.mxu1 %v4032_v56  ;;  %v4722_v55 = vld [vmem:[%s6564_s11 + $0x2c] sm:$0xf]  ;;  %v3977_v56 = vld [vmem:[%s6564_s11 + $0x38] sm:$0xf0]  ;;  %v3951_v58 = vld [vmem:[%s6564_s11] sm:$0xf] }
 0x61b   :  { %1257 = vmatpush.bf16.msrb.mxu2 %v4036_v63  ;;  %v4717_v63 = vld [vmem:[%s6564_s11 + $0x4] sm:$0xf] }
 0x66e   :  { %v922_v2 = vpop.f32.mrf.mxu0 }
 0x66f   :  { %v923_v8 = vadd.f32 %v4929_v6, %v922_v2  ;;  %v4738_v2 = vld [vmem:[%s6564_s11 + $0xac] sm:$0xf] }
 0x671   :  { %v932_v9 = vadd.f32 %v923_v8, %v5381_v0  ;;  %v4041_v8 = vld [vmem:[%s6564_s11 + $0xb8] sm:$0xf0] }
 0x673   :  { %938 = vadd.xlane.f32.xlu1 %v932_v9 }
 0x676   :  { %v924_v11 = vpop.f32.mrf.mxu0 }
 0x677   :  { %v925_v12 = vadd.f32 %v4929_v6, %v924_v11  ;;  %v4015_v11 = vld [vmem:[%s6564_s11 + $0x80] sm:$0xf] }
 0x679   :  { %v933_v14 = vadd.f32 %v925_v12, %v5383_v1  ;;  %v4735_v12 = vld [vmem:[%s6564_s11 + $0x8c] sm:$0xf0] }
 0x67b   :  { %940 = vadd.xlane.f32.xlu0 %v933_v14 }
 0x696   :  { %v927_v15 = vpop.f32.mrf.mxu0 }
 0x697   :  { %v928_v3 = vadd.f32 %v4929_v6, %v927_v15  ;;  %v4016_v15 = vor.u32 %v4735_v12, %v4015_v11  ;;  %v3959_v11 = vld [vmem:[%s6564_s11 + $0x8] sm:$0xf]  ;;  %v4720_v12 = vld [vmem:[%s6564_s11 + $0x14] sm:$0xf0] }
 0x699   :  { %v934_v16 = vadd.f32 %v928_v3, %v5393_v31  ;;  %v4017_v3 = vld [vmem:[%s6564_s11 + $0x90] sm:$0xf0]  ;;  %1239 = vmatpush.bf16.msra.mxu1 %v4016_v15  ;;  %v4718_v15 = vld [vmem:[%s6564_s11 + $0xc] sm:$0xf] }
 0x69b   :  { %942 = vadd.xlane.f32.xlu2 %v934_v16 }
 0x69e   :  { %v929_v18 = vpop.f32.mrf.mxu0 }
 0x69f   :  { %v930_v61 = vadd.f32 %v4929_v6, %v929_v18  ;;  %v4040_v6 = vor.u32 %v4740_v62, %v4039_v60  ;;  %v4736_v18 = vld [vmem:[%s6564_s11 + $0x94] sm:$0xf0]  ;;  %v3980_v60 = vor.u32 %v4722_v55, %v3977_v56  ;;  %v4719_v62 = vld [vmem:[%s6564_s11 + $0xc] sm:$0xf0] }
 0x6a1   :  { %v935_v17 = vadd.f32 %v930_v61, %v5391_v30  ;;  %1276 = vmatpush.bf16.msrb.mxu3 %v4040_v6  ;;  %v3953_v6 = vld [vmem:[%s6564_s11 + $0x10] sm:$0xf0] }
 0x6a3   :  { %944 = vadd.xlane.f32.xlu1 %v935_v17 }
 0x6e6   :  { %v939_v19 = vpop.xlane.xlu1 %938 }
 0x6e7   :  { %v946_v21 = vmul.f32 %v939_v19, %v5347_v10  ;;  %v4734_v19 = vld [vmem:[%s6564_s11 + $0x8c] sm:$0xf] }
 0x6e9   :  { %v5589_v0 = vsub.f32 %v932_v9, %v946_v21  ;;  %v4044_v9 = vor.u32 %v4738_v2, %v4041_v8  ;;  %v4025_v21 = vld [vmem:[%s6564_s11 + $0x98] sm:$0xf0]  ;;  %v3952_v8 = vor.u32 %v4719_v62, %v3951_v58 }
 0x6eb   :  { %v954_v22 = vmul.f32 %v5589_v0, %v5589_v0  ;;  %1295 = vmatpush.bf16.msra.mxu0 %v4044_v9  ;;  %v3956_v9 = vor.u32 %v4717_v63, %v3953_v6 }
 0x6ed   :  { %958 = vadd.xlane.f32.xlu0 %v954_v22  ;;  %v4028_v22 = vor.u32 %v4734_v19, %v4025_v21 }
 0x6ee   :  { %v941_v1 = vpop.xlane.xlu0 %940 }
 0x6ef   :  { %v947_v20 = vmul.f32 %v941_v1, %v5347_v10  ;;  %v3999_v1 = vld [vmem:[%s6564_s11 + $0x60] sm:$0xf]  ;;  %1296 = vmatpush.bf16.msra.mxu0 %v4028_v22 }
 0x6f1   :  { %v5594_v23 = vsub.f32 %v933_v14, %v947_v20  ;;  %v4733_v14 = vld [vmem:[%s6564_s11 + $0x84] sm:$0xf]  ;;  %v4731_v20 = vld [vmem:[%s6564_s11 + $0x6c] sm:$0xf0] }
 0x6f2   :  { %v4020_v61 = vor.u32 %v4733_v14, %v4017_v3  ;;  %v3960_v14 = vor.u32 %v4720_v12, %v3959_v11  ;;  %v3961_v3 = vld [vmem:[%s6564_s11 + $0x18] sm:$0xf0]  ;;  %v4755_v12 = vld [vmem:[#allocation5 + $0x30] sm:$0xff] }
 0x6f3   :  { %v955_v31 = vmul.f32 %v5594_v23, %v5594_v23  ;;  %1297 = vmatpush.bf16.msra.mxu0 %v4012_v34  ;;  %v4780_v11 = vld [vmem:[#allocation5 + $0xf8] sm:$0xff] }
 0x6f4   :  { %1258 = vmatpush.bf16.msrb.mxu2 %v4020_v61 }
 0x6f5   :  { %960 = vadd.xlane.f32.xlu1 %v955_v31  ;;  %v4729_v31 = vld [vmem:[%s6564_s11 + $0x64] sm:$0xf] }
 0x6f7   :  { %1298 = vmatpush.bf16.msra.mxu0 %v3996_v43 }
 0x6fb   :  { %1299 = vmatpush.bf16.msra.mxu0 %v3980_v60 }
 0x70e   :  { %v943_v30 = vpop.xlane.xlu2 %942 }
 0x70f   :  { %v948_v24 = vmul.f32 %v943_v30, %v5347_v10  ;;  %v4000_v30 = vor.u32 %v4731_v20, %v3999_v1 }
 0x711   :  { %v5599_v49 = vsub.f32 %v934_v16, %v948_v24  ;;  %v4023_v16 = vld [vmem:[%s6564_s11 + $0x88] sm:$0xf]  ;;  %v4001_v24 = vld [vmem:[%s6564_s11 + $0x70] sm:$0xf0]  ;;  %1240 = vmatpush.bf16.msra.mxu1 %v4000_v30 }
 0x713   :  { %v956_v25 = vmul.f32 %v5599_v49, %v5599_v49 }
 0x715   :  { %962 = vadd.xlane.f32.xlu0 %v956_v25  ;;  %v4007_v25 = vld [vmem:[%s6564_s11 + $0x68] sm:$0xf]  ;;  %1241 = vmatpush.bf16.msra.mxu1 %v3984_v37  ;;  %v4931_v37 = vld [vmem:[%s6563_s10] ss:$0 sm:$0xff] }
 0x716   :  { %v945_v26 = vpop.xlane.xlu1 %944 }
 0x717   :  { %v949_v27 = vmul.f32 %v945_v26, %v5347_v10  ;;  %v4732_v26 = vld [vmem:[%s6564_s11 + $0x74] sm:$0xf0] }
 0x719   :  { %v5604_v28 = vsub.f32 %v935_v17, %v949_v27  ;;  %v4024_v17 = vor.u32 %v4736_v18, %v4023_v16  ;;  %v4004_v27 = vor.u32 %v4729_v31, %v4001_v24  ;;  %1242 = vmatpush.bf16.msra.mxu1 %v3968_v47  ;;  %v3964_v16 = vor.u32 %v4718_v15, %v3961_v3  ;;  %v4772_v15 = vld [vmem:[#allocation5 + $0xb8] sm:$0xff]  ;;  %v4754_v3 = vld [vmem:[#allocation5 + $0x28] sm:$0xff] }
 0x71b   :  { %v957_v29 = vmul.f32 %v5604_v28, %v5604_v28  ;;  %1277 = vmatpush.bf16.msrb.mxu3 %v4024_v17  ;;  %1259 = vmatpush.bf16.msrb.mxu2 %v4004_v27 }
 0x71c   :  { %1300 = vmatpush.bf16.msra.mxu0 %v3964_v16  ;;  %v4778_v16 = vld [vmem:[#allocation5 + $0xe8] sm:$0xff] }
 0x71d   :  { %964 = vadd.xlane.f32.xlu1 %v957_v29  ;;  %v4008_v29 = vor.u32 %v4732_v26, %v4007_v25  ;;  %1243 = vmatpush.bf16.msra.mxu1 %v3952_v8 }
 0x71f   :  { %1278 = vmatpush.bf16.msrb.mxu3 %v4008_v29  ;;  %1260 = vmatpush.bf16.msrb.mxu2 %v3988_v39 }
 0x720   :  { %1781 = vmatpush.bf16.msrb.mxu0 %v4780_v11 }
 0x723   :  { %1279 = vmatpush.bf16.msrb.mxu3 %v3992_v40  ;;  %1261 = vmatpush.bf16.msrb.mxu2 %v3972_v44 }
 0x727   :  { %1280 = vmatpush.bf16.msrb.mxu3 %v3976_v50  ;;  %1262 = vmatpush.bf16.msrb.mxu2 %v3956_v9 }
 0x72b   :  { %1281 = vmatpush.bf16.msrb.mxu3 %v3960_v14  ;;  %v4779_v14 = vld [vmem:[#allocation5 + $0xf0] sm:$0xff] }
 0x72c   :  { %1782 = vmatpush.bf16.msrb.mxu0 %v4779_v14 }
 0x72f   :  { %1762 = vmatpush.bf16.msra.mxu3 %v4772_v15 }
 0x730   :  { %1783 = vmatpush.bf16.msrb.mxu0 %v4778_v16 }
 0x760   :  { %v959_v7 = vpop.xlane.xlu0 %958 }
 0x761   :  { %v966_v54 = vmul.f32 %v959_v7, %v5347_v10 }
 0x763   :  { %v970_v2 = vadd.f32 1e-12, %v966_v54 }
 0x765   :  { %4984 = vrsqrt.f32 %v970_v2  ;;  %vm980_vm4 = vweird.f32 %v970_v2 }
 0x768   :  { %v961_v18 = vpop.xlane.xlu1 %960 }
 0x769   :  { %v967_v61 = vmul.f32 %v961_v18, %v5347_v10  ;;  %v4763_v18 = vld [vmem:[#allocation5 + $0x70] sm:$0xff] }
 0x76b   :  { %v4985_v17 = vpop.eup %4984  ;;  %v971_v19 = vadd.f32 1e-12, %v967_v61  ;;  %v4771_v61 = vld [vmem:[#allocation5 + $0xb0] sm:$0xff] }
 0x76c   :  { %v975_v21 = vmul.f32 %v4985_v17, %v970_v2  ;;  %vm981_vm3 = vweird.f32 %v4985_v17  ;;  %1763 = vmatpush.bf16.msra.mxu3 %v4771_v61 }
 0x76d   :  { %4986 = vrsqrt.f32 %v971_v19  ;;  %vm982_vm5 = vmor %vm980_vm4, %vm981_vm3  ;;  %vm990_vm7 = vweird.f32 %v971_v19 }
 0x76e   :  { %v976_v22 = vmul.f32 %v4985_v17, %v975_v21  ;;  %v4762_v21 = vld [vmem:[#allocation5 + $0x68] sm:$0xff] }
 0x770   :  { %v977_v1 = vmul.f32 0.5, %v976_v22  ;;  %v4770_v22 = vld [vmem:[#allocation5 + $0xa8] sm:$0xff] }
 0x771   :  { %1764 = vmatpush.bf16.msra.mxu3 %v4770_v22 }
 0x772   :  { %v978_v20 = vsub.f32 1.5, %v977_v1  ;;  %v4752_v1 = vld [vmem:[#allocation5 + $0x18] sm:$0xff] }
 0x773   :  { %v4987_v31 = vpop.eup %4986 }
 0x774   :  { %v979_v30 = vmul.f32 %v4985_v17, %v978_v20  ;;  %v985_v24 = vmul.f32 %v4987_v31, %v971_v19  ;;  %vm991_vm6 = vweird.f32 %v4987_v31  ;;  %v4777_v19 = vld [vmem:[#allocation5 + $0xe0] sm:$0xff]  ;;  %v4776_v20 = vld [vmem:[#allocation5 + $0xd8] sm:$0xff] }
 0x775   :  { %vm992_vm8 = vmor %vm990_vm7, %vm991_vm6  ;;  %1784 = vmatpush.bf16.msrb.mxu0 %v4777_v19 }
 0x776   :  { %v986_v25 = vmul.f32 %v4987_v31, %v985_v24  ;;  %v983_v26 = vsel %vm982_vm5, %v4985_v17, %v979_v30  ;;  %v4753_v17 = vld [vmem:[#allocation5 + $0x20] sm:$0xff]  ;;  %v4751_v24 = vld [vmem:[#allocation5 + $0x10] sm:$0xff] }
 0x777   :  { %v1014_v32 = vmul.f32 %v983_v26, %v5589_v0  ;;  %v4769_v30 = vld [vmem:[#allocation5 + $0xa0] sm:$0xff] }
 0x778   :  { %v987_v27 = vmul.f32 0.5, %v986_v25  ;;  %1765 = vmatpush.bf16.msra.mxu3 %v4769_v30  ;;  %v4775_v25 = vld [vmem:[#allocation5 + $0xd0] sm:$0xff]  ;;  %v1066_v26 = vld [vmem:[%s6565_s12] sm:$0xf] }
 0x779   :  { %v1021_v35 = vmul.f32 %v4930_v33, %v1014_v32  ;;  %1785 = vmatpush.bf16.msrb.mxu0 %v4776_v20  ;;  %v5829_v32 = vperm.slane %v1066_v26, 0 }
 0x77a   :  { %v988_v29 = vsub.f32 1.5, %v987_v27  ;;  %v4760_v27 = vld [vmem:[#allocation5 + $0x58] sm:$0xff] }
 0x77b   :  { %v5810_v59 = vadd.f32 %v4931_v37, %v1021_v35  ;;  %v4767_v35 = vld [vmem:[#allocation5 + $0x90] sm:$0xff] }
 0x77c   :  { %v989_v34 = vmul.f32 %v4987_v31, %v988_v29  ;;  %v4768_v29 = vld [vmem:[#allocation5 + $0x98] sm:$0xff] }
 0x77d   :  { %1786 = vmatpush.bf16.msrb.mxu0 %v4775_v25  ;;  %1766 = vmatpush.bf16.msra.mxu3 %v4768_v29 }
 0x77e   :  { %v993_v36 = vsel %vm992_vm8, %v4987_v31, %v989_v34  ;;  %v4761_v31 = vld [vmem:[#allocation5 + $0x60] sm:$0xff]  ;;  %v4774_v34 = vld [vmem:[#allocation5 + $0xc8] sm:$0xff] }
 0x77f   :  { %v1015_v52 = vmul.f32 %v993_v36, %v5594_v23  ;;  %v5831_v36 = vperm.slane %v1066_v26, 3 }
 0x781   :  { %v1022_v57 = vmul.f32 %v4930_v33, %v1015_v52  ;;  %1787 = vmatpush.bf16.msrb.mxu0 %v4774_v34  ;;  %v4759_v52 = vld [vmem:[#allocation5 + $0x50] sm:$0xff]  ;;  %1767 = vmatpush.bf16.msra.mxu3 %v4767_v35 }
 0x783   :  { %v5812_v38 = vadd.f32 %v4931_v37, %v1022_v57 }
 0x785   :  { %v1032_v0 = vpack.c.bf16 %v5812_v38, %v5810_v59 }
 0x787   :  { %1244 = vmatmul.bf16.vlgmr.msra.gmra.mxu1 %v1032_v0  ;;  %1263 = vmatmul.bf16.vlgmr.msrb.gmra.mxu2 %v1032_v0 }
 0x788   :  { %1282 = vmatmul.bf16.vlgmr.msrb.gmra.mxu3 %v1032_v0  ;;  %1301 = vmatmul.bf16.vlgmr.msra.gmra.mxu0 %v1032_v0  ;;  %v963_v39 = vpop.xlane.xlu0 %962 }
 0x789   :  { %v968_v23 = vmul.f32 %v963_v39, %v5347_v10  ;;  %v4749_v39 = vld [vmem:[#allocation5] sm:$0xff] }
 0x78b   :  { %v972_v40 = vadd.f32 1e-12, %v968_v23  ;;  %v4773_v23 = vld [vmem:[#allocation5 + $0xc0] sm:$0xff] }
 0x78c   :  { %1788 = vmatpush.bf16.msrb.mxu0 %v4773_v23 }
 0x78d   :  { %4988 = vrsqrt.f32 %v972_v40  ;;  %vm1000_vm10 = vweird.f32 %v972_v40 }
 0x790   :  { %v965_v41 = vpop.xlane.xlu1 %964 }
 0x791   :  { %v969_v42 = vmul.f32 %v965_v41, %v5347_v10 }
 0x793   :  { %v4989_v43 = vpop.eup %4988  ;;  %v973_v5 = vadd.f32 1e-12, %v969_v42  ;;  %v5841_v42 = vperm.slane %v1066_v26, 1 }
 0x794   :  { %v995_v45 = vmul.f32 %v4989_v43, %v972_v40  ;;  %vm1001_vm9 = vweird.f32 %v4989_v43 }
 0x795   :  { %4990 = vrsqrt.f32 %v973_v5  ;;  %vm1002_vm11 = vmor %vm1000_vm10, %vm1001_vm9  ;;  %vm1010_vm15 = vweird.f32 %v973_v5 }
 0x796   :  { %v996_v46 = vmul.f32 %v4989_v43, %v995_v45 }
 0x798   :  { %v997_v7 = vmul.f32 0.5, %v996_v46  ;;  %v5845_v46 = vperm.slane %v1066_v26, 2 }
 0x79a   :  { %v998_v47 = vsub.f32 1.5, %v997_v7 }
 0x79b   :  { %v4991_v48 = vpop.eup %4990 }
 0x79c   :  { %v999_v51 = vmul.f32 %v4989_v43, %v998_v47  ;;  %v1005_v53 = vmul.f32 %v4991_v48, %v973_v5  ;;  %vm1011_vm12 = vweird.f32 %v4991_v48  ;;  %v4766_v5 = vld [vmem:[#allocation5 + $0x88] sm:$0xff] }
 0x79d   :  { %vm1012_vm0 = vmor %vm1010_vm15, %vm1011_vm12  ;;  %1768 = vmatpush.bf16.msra.mxu3 %v4766_v5 }
 0x79e   :  { %v1006_v54 = vmul.f32 %v4991_v48, %v1005_v53  ;;  %v1003_v44 = vsel %vm1002_vm11, %v4989_v43, %v999_v51  ;;  %v4758_v43 = vld [vmem:[#allocation5 + $0x48] sm:$0xff] }
 0x79f   :  { %v1016_v56 = vmul.f32 %v1003_v44, %v5599_v49  ;;  %v4756_v49 = vld [vmem:[#allocation5 + $0x38] sm:$0xff]  ;;  %v4757_v44 = vld [vmem:[#allocation5 + $0x40] sm:$0xff] }
 0x7a0   :  { %v1007_v50 = vmul.f32 0.5, %v1006_v54  ;;  %1724 = vmatpush.bf16.msrb.mxu1 %v4756_v49 }
 0x7a1   :  { %v1023_v63 = vmul.f32 %v4930_v33, %v1016_v56 }
 0x7a2   :  { %v1008_v55 = vsub.f32 1.5, %v1007_v50  ;;  %v4765_v50 = vld [vmem:[#allocation5 + $0x80] sm:$0xff] }
 0x7a3   :  { %v5820_v2 = vadd.f32 %v4931_v37, %v1023_v63  ;;  %1769 = vmatpush.bf16.msra.mxu3 %v4765_v50 }
 0x7a4   :  { %v1009_v58 = vmul.f32 %v4991_v48, %v1008_v55  ;;  %1725 = vmatpush.bf16.msrb.mxu1 %v4755_v12 }
 0x7a6   :  { %v1013_v60 = vsel %vm1012_vm0, %v4991_v48, %v1009_v58 }
 0x7a7   :  { %v1017_v62 = vmul.f32 %v1013_v60, %v5604_v28  ;;  %v4764_v28 = vld [vmem:[#allocation5 + $0x78] sm:$0xff] }
 0x7a8   :  { %1743 = vmatpush.bf16.msra.mxu2 %v4764_v28  ;;  %1726 = vmatpush.bf16.msrb.mxu1 %v4754_v3 }
 0x7a9   :  { %v1024_v6 = vmul.f32 %v4930_v33, %v1017_v62  ;;  %v4750_v33 = vld [vmem:[#allocation5 + $0x8] sm:$0xff] }
 0x7ab   :  { %v5822_v8 = vadd.f32 %v4931_v37, %v1024_v6 }
 0x7ac   :  { %1744 = vmatpush.bf16.msra.mxu2 %v4763_v18  ;;  %1727 = vmatpush.bf16.msrb.mxu1 %v4753_v17 }
 0x7ad   :  { %v1033_v9 = vpack.c.bf16 %v5822_v8, %v5820_v2 }
 0x7af   :  { %1249 = vmatmul.bf16.gmra.mxu1 %v1033_v9  ;;  %1268 = vmatmul.bf16.gmra.mxu2 %v1033_v9 }
 0x7b0   :  { %1287 = vmatmul.bf16.gmra.mxu3 %v1033_v9  ;;  %1306 = vmatmul.bf16.gmra.mxu0 %v1033_v9 }
 0x7b1   :  { %1745 = vmatpush.bf16.msra.mxu2 %v4762_v21  ;;  %1728 = vmatpush.bf16.msrb.mxu1 %v4752_v1 }
 0x7b5   :  { %1746 = vmatpush.bf16.msra.mxu2 %v4761_v31  ;;  %1729 = vmatpush.bf16.msrb.mxu1 %v4751_v24 }
 0x7b9   :  { %1747 = vmatpush.bf16.msra.mxu2 %v4760_v27  ;;  %1730 = vmatpush.bf16.msrb.mxu1 %v4750_v33 }
 0x7bd   :  { %1748 = vmatpush.bf16.msra.mxu2 %v4759_v52  ;;  %1731 = vmatpush.bf16.msrb.mxu1 %v4749_v39 }
 0x7c1   :  { %1749 = vmatpush.bf16.msra.mxu2 %v4758_v43 }
 0x7c5   :  { %1750 = vmatpush.bf16.msra.mxu2 %v4757_v44 }
 0x804   :  { %v1245_v37 = vpop.f32.mrf.mxu1 }
 0x805   :  { %v5834_v57 = vadd.f32 %v1245_v37, %v5829_v32  ;;  %v1302_v0 = vpop.f32.mrf.mxu0 }
 0x806   :  { %v5837_v40 = vadd.f32 %v1302_v0, %v5831_v36 }
 0x807   :  { %v1312_v41 = vmul.f32 %v5834_v57, %v5834_v57 }
 0x808   :  { %v1315_v45 = vmul.f32 %v5837_v40, %v5837_v40 }
 0x809   :  { %v1328_v7 = vmul.f32 %v1312_v41, %v5834_v57 }
 0x80a   :  { %v1331_v47 = vmul.f32 %v1315_v45, %v5837_v40  ;;  %v1264_v48 = vpop.f32.mrf.mxu2 }
 0x80b   :  { %v1344_v51 = vmul.f32 0.044715, %v1328_v7  ;;  %v5850_v53 = vadd.f32 %v1264_v48, %v5841_v42  ;;  %v1283_v54 = vpop.f32.mrf.mxu3 }
 0x80c   :  { %v1347_v55 = vmul.f32 0.044715, %v1331_v47  ;;  %v5853_v56 = vadd.f32 %v1283_v54, %v5845_v46  ;;  %v1247_v58 = vpop.f32.mrf.mxu1 }
 0x80d   :  { %v1360_v60 = vadd.f32 %v1344_v51, %v5834_v57  ;;  %v1313_v62 = vmul.f32 %v5850_v53, %v5850_v53  ;;  %v5859_v63 = vadd.f32 %v1247_v58, %v5829_v32  ;;  %v1304_v6 = vpop.f32.mrf.mxu0 }
 0x80e   :  { %v1363_v9 = vadd.f32 %v1347_v55, %v5837_v40  ;;  %v1314_v49 = vmul.f32 %v5853_v56, %v5853_v56  ;;  %v5865_v11 = vadd.f32 %v1304_v6, %v5831_v36 }
 0x80f   :  { %v1376_v12 = vmul.f32 0.7978846, %v1360_v60  ;;  %v1329_v14 = vmul.f32 %v1313_v62, %v5850_v53  ;;  %v1316_v28 = vmul.f32 %v5859_v63, %v5859_v63 }
 0x810   :  { %v1379_v15 = vmul.f32 0.7978846, %v1363_v9  ;;  %v1330_v3 = vmul.f32 %v1314_v49, %v5853_v56  ;;  %v1319_v16 = vmul.f32 %v5865_v11, %v5865_v11 }
 0x811   :  { %v1345_v18 = vmul.f32 0.044715, %v1329_v14  ;;  %v1332_v61 = vmul.f32 %v1316_v28, %v5859_v63  ;;  %4992 = vtanh.f32 %v1376_v12 }
 0x812   :  { %v1346_v17 = vmul.f32 0.044715, %v1330_v3  ;;  %v1335_v19 = vmul.f32 %v1319_v16, %v5865_v11  ;;  %v1266_v21 = vpop.f32.mrf.mxu2  ;;  %4994 = vtanh.f32 %v1379_v15 }
 0x813   :  { %v1361_v22 = vadd.f32 %v1345_v18, %v5850_v53  ;;  %v1348_v1 = vmul.f32 0.044715, %v1332_v61  ;;  %v1267_v20 = vadd.f32 %v1266_v21, %v5841_v42  ;;  %v1285_v31 = vpop.f32.mrf.mxu3 }
 0x814   :  { %v1362_v30 = vadd.f32 %v1346_v17, %v5853_v56  ;;  %v1351_v24 = vmul.f32 0.044715, %v1335_v19  ;;  %v1286_v25 = vadd.f32 %v1285_v31, %v5845_v46 }
 0x815   :  { %v1377_v26 = vmul.f32 0.7978846, %v1361_v22  ;;  %v1364_v27 = vadd.f32 %v1348_v1, %v5859_v63  ;;  %v1317_v29 = vmul.f32 %v1267_v20, %v1267_v20 }
 0x816   :  { %v1378_v33 = vmul.f32 0.7978846, %v1362_v30  ;;  %v1367_v34 = vadd.f32 %v1351_v24, %v5865_v11  ;;  %v1318_v52 = vmul.f32 %v1286_v25, %v1286_v25 }
 0x817   :  { %4996 = vtanh.f32 %v1377_v26  ;;  %v1380_v35 = vmul.f32 0.7978846, %v1364_v27  ;;  %v1333_v37 = vmul.f32 %v1317_v29, %v1267_v20  ;;  %v4993_v23 = vpop.eup %4992 }
 0x818   :  { %4998 = vtanh.f32 %v1378_v33  ;;  %v1383_v0 = vmul.f32 0.7978846, %v1367_v34  ;;  %v1334_v39 = vmul.f32 %v1318_v52, %v1286_v25  ;;  %v4995_v43 = vpop.eup %4994  ;;  %v1408_v7 = vadd.f32 1.0, %v4993_v23 }
 0x819   :  { %5000 = vtanh.f32 %v1380_v35  ;;  %v1349_v41 = vmul.f32 0.044715, %v1333_v37  ;;  %v1411_v51 = vadd.f32 1.0, %v4995_v43 }
 0x81a   :  { %5002 = vtanh.f32 %v1383_v0  ;;  %v1350_v5 = vmul.f32 0.044715, %v1334_v39  ;;  %v1424_v60 = vmul.f32 0.5, %v1408_v7 }
 0x81b   :  { %v1365_v45 = vadd.f32 %v1349_v41, %v1267_v20  ;;  %v1427_v6 = vmul.f32 0.5, %v1411_v51 }
 0x81c   :  { %v1366_v47 = vadd.f32 %v1350_v5, %v1286_v25  ;;  %v1440_v15 = vmul.f32 %v1424_v60, %v5834_v57 }
 0x81d   :  { %v4997_v48 = vpop.eup %4996  ;;  %v1381_v54 = vmul.f32 0.7978846, %v1365_v45  ;;  %v1443_v18 = vmul.f32 %v1427_v6, %v5837_v40 }
 0x81e   :  { %v4999_v44 = vpop.eup %4998  ;;  %v1382_v50 = vmul.f32 0.7978846, %v1366_v47  ;;  %v1409_v49 = vadd.f32 1.0, %v4997_v48 }
 0x81f   :  { %v5001_v55 = vpop.eup %5000  ;;  %5004 = vtanh.f32 %v1381_v54  ;;  %v1410_v14 = vadd.f32 1.0, %v4999_v44 }
 0x820   :  { %v5003_v58 = vpop.eup %5002  ;;  %5006 = vtanh.f32 %v1382_v50  ;;  %v1412_v62 = vadd.f32 1.0, %v5001_v55  ;;  %v1425_v19 = vmul.f32 0.5, %v1409_v49 }
 0x821   :  { %v1415_v9 = vadd.f32 1.0, %v5003_v58  ;;  %v1426_v1 = vmul.f32 0.5, %v1410_v14 }
 0x822   :  { %v1428_v12 = vmul.f32 0.5, %v1412_v62  ;;  %v1441_v57 = vmul.f32 %v1425_v19, %v5850_v53 }
 0x823   :  { %v1431_v28 = vmul.f32 0.5, %v1415_v9 }
 0x824   :  { %v1444_v3 = vmul.f32 %v1428_v12, %v5859_v63  ;;  %v1442_v63 = vmul.f32 %v1426_v1, %v5853_v56 }
 0x825   :  { %v5005_v16 = vpop.eup %5004  ;;  %v1447_v61 = vmul.f32 %v1431_v28, %v5865_v11 }
 0x826   :  { %v5007_v17 = vpop.eup %5006  ;;  %v1413_v21 = vadd.f32 1.0, %v5005_v16  ;;  %v1456_v22 = vpack.c.bf16 %v1444_v3, %v1440_v15 }
 0x827   :  { %v1414_v31 = vadd.f32 1.0, %v5007_v17  ;;  %v1459_v30 = vpack.c.bf16 %v1447_v61, %v1443_v18 }
 0x828   :  { %v1429_v24 = vmul.f32 0.5, %v1413_v21  ;;  %1732 = vmatmul.bf16.vlgmr.msrb.gmra.mxu1 %v1456_v22 }
 0x829   :  { %v1430_v26 = vmul.f32 0.5, %v1414_v31  ;;  %1789 = vmatmul.bf16.vlgmr.msrb.gmra.mxu0 %v1459_v30 }
 0x82a   :  { %v1445_v27 = vmul.f32 %v1429_v24, %v1267_v20 }
 0x82b   :  { %v1446_v29 = vmul.f32 %v1430_v26, %v1286_v25 }
 0x82c   :  { %v1250_v40 = vpop.f32.mrf.mxu1  ;;  %v1457_v33 = vpack.c.bf16 %v1445_v27, %v1441_v57 }
 0x82d   :  { %v5888_v11 = vadd.f32 %v1250_v40, %v5829_v32  ;;  %v1307_v34 = vpop.f32.mrf.mxu0  ;;  %v1458_v52 = vpack.c.bf16 %v1446_v29, %v1442_v63 }
 0x82e   :  { %v5891_v35 = vadd.f32 %v1307_v34, %v5831_v36  ;;  %1751 = vmatmul.bf16.vlgmr.msra.gmra.mxu2 %v1457_v33 }
 0x82f   :  { %v1320_v37 = vmul.f32 %v5888_v11, %v5888_v11  ;;  %1770 = vmatmul.bf16.vlgmr.msra.gmra.mxu3 %v1458_v52 }
 0x830   :  { %v1323_v53 = vmul.f32 %v5891_v35, %v5891_v35 }
 0x831   :  { %v1336_v56 = vmul.f32 %v1320_v37, %v5888_v11 }
 0x832   :  { %v1339_v20 = vmul.f32 %v1323_v53, %v5891_v35  ;;  %v1269_v25 = vpop.f32.mrf.mxu2 }
 0x833   :  { %v1352_v0 = vmul.f32 0.044715, %v1336_v56  ;;  %v5900_v39 = vadd.f32 %v1269_v25, %v5841_v42  ;;  %v1288_v23 = vpop.f32.mrf.mxu3 }
 0x834   :  { %v1355_v41 = vmul.f32 0.044715, %v1339_v20  ;;  %v5903_v43 = vadd.f32 %v1288_v23, %v5845_v46  ;;  %v1252_v5 = vpop.f32.mrf.mxu1 }
 0x835   :  { %v1368_v45 = vadd.f32 %v1352_v0, %v5888_v11  ;;  %v1321_v7 = vmul.f32 %v5900_v39, %v5900_v39  ;;  %v5909_v47 = vadd.f32 %v1252_v5, %v5829_v32  ;;  %v1309_v48 = vpop.f32.mrf.mxu0 }
 0x836   :  { %v1371_v51 = vadd.f32 %v1355_v41, %v5891_v35  ;;  %v1322_v54 = vmul.f32 %v5903_v43, %v5903_v43  ;;  %v5915_v44 = vadd.f32 %v1309_v48, %v5831_v36 }
 0x837   :  { %v1337_v50 = vmul.f32 %v1321_v7, %v5900_v39  ;;  %v1324_v55 = vmul.f32 %v5909_v47, %v5909_v47  ;;  %v1384_v58 = vmul.f32 0.7978846, %v1368_v45 }
 0x838   :  { %v1338_v60 = vmul.f32 %v1322_v54, %v5903_v43  ;;  %v1327_v32 = vmul.f32 %v5915_v44, %v5915_v44  ;;  %v1387_v62 = vmul.f32 0.7978846, %v1371_v51 }
 0x839   :  { %v1353_v6 = vmul.f32 0.044715, %v1337_v50  ;;  %v1340_v9 = vmul.f32 %v1324_v55, %v5909_v47  ;;  %5008 = vtanh.f32 %v1384_v58 }
 0x83a   :  { %v1354_v49 = vmul.f32 0.044715, %v1338_v60  ;;  %v1343_v12 = vmul.f32 %v1327_v32, %v5915_v44  ;;  %v1271_v36 = vpop.f32.mrf.mxu2  ;;  %5010 = vtanh.f32 %v1387_v62 }
 0x83b   :  { %v1369_v14 = vadd.f32 %v1353_v6, %v5900_v39  ;;  %v1356_v28 = vmul.f32 0.044715, %v1340_v9  ;;  %v1272_v15 = vadd.f32 %v1271_v36, %v5841_v42  ;;  %v1290_v3 = vpop.f32.mrf.mxu3 }
 0x83c   :  { %v1370_v16 = vadd.f32 %v1354_v49, %v5903_v43  ;;  %v1359_v18 = vmul.f32 0.044715, %v1343_v12  ;;  %v1291_v61 = vadd.f32 %v1290_v3, %v5845_v46 }
 0x83d   :  { %v1372_v17 = vadd.f32 %v1356_v28, %v5909_v47  ;;  %v1325_v19 = vmul.f32 %v1272_v15, %v1272_v15  ;;  %v1385_v21 = vmul.f32 0.7978846, %v1369_v14 }
 0x83e   :  { %v1375_v22 = vadd.f32 %v1359_v18, %v5915_v44  ;;  %v1326_v1 = vmul.f32 %v1291_v61, %v1291_v61  ;;  %v1386_v31 = vmul.f32 0.7978846, %v1370_v16 }
 0x83f   :  { %v1341_v30 = vmul.f32 %v1325_v19, %v1272_v15  ;;  %v1388_v24 = vmul.f32 0.7978846, %v1372_v17  ;;  %5012 = vtanh.f32 %v1385_v21  ;;  %v5009_v57 = vpop.eup %5008  ;;  %v4932_v17 = vld [vmem:[%s6567_s14] ss:$0 sm:$0xff] }
 0x840   :  { %v1342_v42 = vmul.f32 %v1326_v1, %v1291_v61  ;;  %v1391_v26 = vmul.f32 0.7978846, %v1375_v22  ;;  %5014 = vtanh.f32 %v1386_v31  ;;  %v5011_v63 = vpop.eup %5010  ;;  %v1416_v33 = vadd.f32 1.0, %v5009_v57 }
 0x841   :  { %v1357_v27 = vmul.f32 0.044715, %v1341_v30  ;;  %5016 = vtanh.f32 %v1388_v24  ;;  %v1419_v52 = vadd.f32 1.0, %v5011_v63 }
 0x842   :  { %v1358_v46 = vmul.f32 0.044715, %v1342_v42  ;;  %5018 = vtanh.f32 %v1391_v26  ;;  %v1432_v23 = vmul.f32 0.5, %v1416_v33 }
 0x843   :  { %v1373_v29 = vadd.f32 %v1357_v27, %v1272_v15  ;;  %v1435_v5 = vmul.f32 0.5, %v1419_v52 }
 0x844   :  { %v1374_v40 = vadd.f32 %v1358_v46, %v1291_v61  ;;  %v1448_v54 = vmul.f32 %v1432_v23, %v5888_v11 }
 0x845   :  { %v5013_v34 = vpop.eup %5012  ;;  %v1389_v37 = vmul.f32 0.7978846, %v1373_v29  ;;  %v1451_v58 = vmul.f32 %v1435_v5, %v5891_v35 }
 0x846   :  { %v5015_v53 = vpop.eup %5014  ;;  %v1390_v56 = vmul.f32 0.7978846, %v1374_v40  ;;  %v1417_v7 = vadd.f32 1.0, %v5013_v34 }
 0x847   :  { %v5017_v20 = vpop.eup %5016  ;;  %5020 = vtanh.f32 %v1389_v37  ;;  %v1418_v51 = vadd.f32 1.0, %v5015_v53 }
 0x848   :  { %v5019_v25 = vpop.eup %5018  ;;  %v1420_v0 = vadd.f32 1.0, %v5017_v20  ;;  %5022 = vtanh.f32 %v1390_v56  ;;  %v1433_v9 = vmul.f32 0.5, %v1417_v7 }
 0x849   :  { %v1423_v41 = vadd.f32 1.0, %v5019_v25  ;;  %v1434_v36 = vmul.f32 0.5, %v1418_v51 }
 0x84a   :  { %v1436_v45 = vmul.f32 0.5, %v1420_v0  ;;  %v1449_v11 = vmul.f32 %v1433_v9, %v5900_v39 }
 0x84b   :  { %v1439_v48 = vmul.f32 0.5, %v1423_v41 }
 0x84c   :  { %v1452_v50 = vmul.f32 %v1436_v45, %v5909_v47  ;;  %v1450_v47 = vmul.f32 %v1434_v36, %v5903_v43 }
 0x84d   :  { %v5021_v55 = vpop.eup %5020  ;;  %v1455_v60 = vmul.f32 %v1439_v48, %v5915_v44 }
 0x84e   :  { %v5023_v32 = vpop.eup %5022  ;;  %v1460_v62 = vpack.c.bf16 %v1452_v50, %v1448_v54  ;;  %v1421_v6 = vadd.f32 1.0, %v5021_v55 }
 0x84f   :  { %v1463_v49 = vpack.c.bf16 %v1455_v60, %v1451_v58  ;;  %v1422_v12 = vadd.f32 1.0, %v5023_v32 }
 0x850   :  { %1737 = vmatmul.bf16.gmra.mxu1 %v1460_v62  ;;  %v1437_v14 = vmul.f32 0.5, %v1421_v6 }
 0x851   :  { %1794 = vmatmul.bf16.gmra.mxu0 %v1463_v49  ;;  %v1438_v28 = vmul.f32 0.5, %v1422_v12 }
 0x852   :  { %v1453_v3 = vmul.f32 %v1437_v14, %v1272_v15  ;;  %v4292_v14 = vld [vmem:[#allocation2 + $0x168] sm:$0xf] }
 0x853   :  { %v1454_v16 = vmul.f32 %v1438_v28, %v1291_v61  ;;  %v4803_v28 = vld [vmem:[#allocation2 + $0x170] sm:$0xf0] }
 0x854   :  { %v1461_v35 = vpack.c.bf16 %v1453_v3, %v1449_v11  ;;  %v4802_v11 = vld [vmem:[#allocation2 + $0x16c] sm:$0xf]  ;;  %v4293_v3 = vor.u32 %v4803_v28, %v4292_v14 }
 0x855   :  { %v1462_v18 = vpack.c.bf16 %v1454_v16, %v1450_v47  ;;  %v4294_v47 = vld [vmem:[#allocation2 + $0x174] sm:$0xf0]  ;;  %v4300_v16 = vld [vmem:[#allocation2 + $0x170] sm:$0xf] }
 0x856   :  { %1756 = vmatmul.bf16.gmra.mxu2 %v1461_v35  ;;  %v4804_v35 = vld [vmem:[#allocation2 + $0x178] sm:$0xf0]  ;;  %2072 = vmatpush.bf16.msra.mxu0 %v4293_v3 }
 0x857   :  { %1775 = vmatmul.bf16.gmra.mxu3 %v1462_v18  ;;  %v4297_v18 = vor.u32 %v4802_v11, %v4294_v47  ;;  %4885 = vmatpush.bf16.msra.mxu1 %v4293_v3  ;;  %v4222_v11 = vld [vmem:[#allocation2 + $0xe4] sm:$0xf0]  ;;  %v4228_v3 = vld [vmem:[#allocation2 + $0xe0] sm:$0xf]  ;;  %v4786_v47 = vld [vmem:[#allocation2 + $0xe8] sm:$0xf0] }
 0x859   :  { %2091 = vmatpush.bf16.msrb.mxu2 %v4297_v18  ;;  %v4229_v18 = vor.u32 %v4786_v47, %v4228_v3 }
 0x8a5   :  { %v1733_v44 = vpop.f32.mrf.mxu1 }
 0x8a6   :  { %v1734_v19 = vadd.f32 %v4932_v17, %v1733_v44  ;;  %v1790_v31 = vpop.f32.mrf.mxu0  ;;  %v4301_v44 = vor.u32 %v4804_v35, %v4300_v16 }
 0x8a8   :  { %2110 = vmatpush.bf16.msrb.mxu3 %v4301_v44  ;;  %v4208_v44 = vld [vmem:[#allocation2 + $0xc0] sm:$0xf] }
 0x8ad   :  { %v1735_v39 = vpop.f32.mrf.mxu1 }
 0x8ae   :  { %v1736_v24 = vadd.f32 %v4932_v17, %v1735_v39  ;;  %v1792_v27 = vpop.f32.mrf.mxu0 }
 0x8b1   :  { %v1752_v21 = vpop.f32.mrf.mxu2 }
 0x8b2   :  { %v1753_v22 = vadd.f32 %v1752_v21, %v1734_v19  ;;  %v1771_v1 = vpop.f32.mrf.mxu3  ;;  %v4800_v19 = vld [vmem:[#allocation2 + $0x158] sm:$0xf0]  ;;  %v4799_v21 = vld [vmem:[#allocation2 + $0x154] sm:$0xf] }
 0x8b4   :  { %v1772_v30 = vadd.f32 %v1771_v1, %v1753_v22  ;;  %v4282_v1 = vld [vmem:[#allocation2 + $0x15c] sm:$0xf0] }
 0x8b5   :  { %v4285_v39 = vor.u32 %v4799_v21, %v4282_v1  ;;  %v4216_v1 = vld [vmem:[#allocation2 + $0xc8] sm:$0xf] }
 0x8b6   :  { %v1791_v15 = vadd.f32 %v1790_v31, %v1772_v30  ;;  %v4288_v31 = vld [vmem:[#allocation2 + $0x158] sm:$0xf]  ;;  %v4801_v30 = vld [vmem:[#allocation2 + $0x160] sm:$0xf0] }
 0x8b7   :  { %2092 = vmatpush.bf16.msrb.mxu2 %v4285_v39 }
 0x8b8   :  { %v1800_v43 = vadd.f32 %v1791_v15, %v5810_v59  ;;  %v4289_v15 = vor.u32 %v4801_v30, %v4288_v31  ;;  %v4783_v31 = vld [vmem:[#allocation2 + $0xd0] sm:$0xf0] }
 0x8b9   :  { %v1754_v61 = vpop.f32.mrf.mxu2 }
 0x8ba   :  { %v1755_v42 = vadd.f32 %v1754_v61, %v1736_v24  ;;  %1806 = vadd.xlane.f32.xlu2 %v1800_v43  ;;  %v1773_v26 = vpop.f32.mrf.mxu3  ;;  %2111 = vmatpush.bf16.msrb.mxu3 %v4289_v15  ;;  %v4268_v24 = vld [vmem:[#allocation2 + $0x138] sm:$0xf]  ;;  %v4796_v61 = vld [vmem:[#allocation2 + $0x13c] sm:$0xf]  ;;  %v4217_v15 = vor.u32 %v4783_v31, %v4216_v1 }
 0x8bc   :  { %v1774_v57 = vadd.f32 %v1773_v26, %v1755_v42  ;;  %v4270_v26 = vld [vmem:[#allocation2 + $0x144] sm:$0xf0] }
 0x8be   :  { %v1793_v63 = vadd.f32 %v1792_v27, %v1774_v57  ;;  %v4276_v57 = vld [vmem:[#allocation2 + $0x140] sm:$0xf]  ;;  %v4798_v27 = vld [vmem:[#allocation2 + $0x148] sm:$0xf0] }
 0x8c0   :  { %v1801_v46 = vadd.f32 %v1793_v63, %v5812_v38  ;;  %v4273_v63 = vor.u32 %v4796_v61, %v4270_v26 }
 0x8c2   :  { %1808 = vadd.xlane.f32.xlu0 %v1801_v46  ;;  %2093 = vmatpush.bf16.msrb.mxu2 %v4273_v63 }
 0x8cd   :  { %v1738_v29 = vpop.f32.mrf.mxu1 }
 0x8ce   :  { %v1739_v40 = vadd.f32 %v4932_v17, %v1738_v29  ;;  %v1795_v37 = vpop.f32.mrf.mxu0  ;;  %v4256_v29 = vld [vmem:[#allocation2 + $0x120] sm:$0xf] }
 0x8d5   :  { %v1740_v56 = vpop.f32.mrf.mxu1 }
 0x8d6   :  { %v1741_v59 = vadd.f32 %v4932_v17, %v1740_v56  ;;  %v1797_v45 = vpop.f32.mrf.mxu0  ;;  %v4280_v17 = vld [vmem:[#allocation2 + $0x150] sm:$0xf] }
 0x8d7   :  { %v4281_v22 = vor.u32 %v4800_v19, %v4280_v17  ;;  %v4782_v17 = vld [vmem:[#allocation2 + $0xc8] sm:$0xf0]  ;;  %v4781_v19 = vld [vmem:[#allocation2 + $0xc4] sm:$0xf] }
 0x8d8   :  { %v4209_v21 = vor.u32 %v4782_v17, %v4208_v44 }
 0x8d9   :  { %v1757_v33 = vpop.f32.mrf.mxu2  ;;  %2073 = vmatpush.bf16.msra.mxu0 %v4281_v22  ;;  %4886 = vmatpush.bf16.msra.mxu1 %v4281_v22  ;;  %v4210_v22 = vld [vmem:[#allocation2 + $0xcc] sm:$0xf0] }
 0x8da   :  { %v1758_v34 = vadd.f32 %v1757_v33, %v1739_v40  ;;  %v1776_v52 = vpop.f32.mrf.mxu3  ;;  %v4794_v40 = vld [vmem:[#allocation2 + $0x128] sm:$0xf0]  ;;  %v4793_v33 = vld [vmem:[#allocation2 + $0x124] sm:$0xf]  ;;  %v4213_v39 = vor.u32 %v4781_v19, %v4210_v22 }
 0x8dc   :  { %v1777_v53 = vadd.f32 %v1776_v52, %v1758_v34  ;;  %v4257_v34 = vor.u32 %v4794_v40, %v4256_v29  ;;  %v4258_v52 = vld [vmem:[#allocation2 + $0x12c] sm:$0xf0] }
 0x8dd   :  { %v4261_v56 = vor.u32 %v4793_v33, %v4258_v52 }
 0x8de   :  { %v1796_v20 = vadd.f32 %v1795_v37, %v1777_v53  ;;  %v4264_v37 = vld [vmem:[#allocation2 + $0x128] sm:$0xf]  ;;  %v4795_v53 = vld [vmem:[#allocation2 + $0x130] sm:$0xf0] }
 0x8df   :  { %2094 = vmatpush.bf16.msrb.mxu2 %v4261_v56  ;;  %v4933_v56 = vld [vmem:[%s6568_s15] ss:$0 sm:$0xff] }
 0x8e0   :  { %v1802_v25 = vadd.f32 %v1796_v20, %v5820_v2  ;;  %v4265_v20 = vor.u32 %v4795_v53, %v4264_v37 }
 0x8e1   :  { %v1759_v0 = vpop.f32.mrf.mxu2 }
 0x8e2   :  { %v1760_v23 = vadd.f32 %v1759_v0, %v1741_v59  ;;  %1810 = vadd.xlane.f32.xlu1 %v1802_v25  ;;  %v1778_v41 = vpop.f32.mrf.mxu3  ;;  %v4244_v59 = vld [vmem:[#allocation2 + $0x108] sm:$0xf]  ;;  %v4790_v0 = vld [vmem:[#allocation2 + $0x10c] sm:$0xf] }
 0x8e4   :  { %v1779_v5 = vadd.f32 %v1778_v41, %v1760_v23  ;;  %v4246_v41 = vld [vmem:[#allocation2 + $0x114] sm:$0xf0] }
 0x8e6   :  { %v1798_v38 = vadd.f32 %v1797_v45, %v1779_v5  ;;  %v4252_v5 = vld [vmem:[#allocation2 + $0x110] sm:$0xf]  ;;  %v4792_v45 = vld [vmem:[#allocation2 + $0x118] sm:$0xf0] }
 0x8e8   :  { %v1803_v7 = vadd.f32 %v1798_v38, %v5822_v8  ;;  %v4249_v38 = vor.u32 %v4790_v0, %v4246_v41 }
 0x8ea   :  { %1812 = vadd.xlane.f32.xlu2 %v1803_v7  ;;  %2095 = vmatpush.bf16.msrb.mxu2 %v4249_v38 }
 0x92d   :  { %v1807_v48 = vpop.xlane.xlu2 %1806 }
 0x92e   :  { %v1814_v51 = vmul.f32 %v1807_v48, %v5347_v10  ;;  %v4232_v48 = vld [vmem:[#allocation2 + $0xf0] sm:$0xf] }
 0x930   :  { %v5945_v54 = vsub.f32 %v1800_v43, %v1814_v51  ;;  %v4797_v43 = vld [vmem:[#allocation2 + $0x140] sm:$0xf0]  ;;  %v4788_v51 = vld [vmem:[#allocation2 + $0xf8] sm:$0xf0] }
 0x931   :  { %v4269_v42 = vor.u32 %v4797_v43, %v4268_v24 }
 0x932   :  { %v1822_v50 = vmul.f32 %v5945_v54, %v5945_v54 }
 0x933   :  { %2074 = vmatpush.bf16.msra.mxu0 %v4269_v42  ;;  %4887 = vmatpush.bf16.msra.mxu1 %v4269_v42 }
 0x934   :  { %1826 = vadd.xlane.f32.xlu0 %v1822_v50  ;;  %v4787_v50 = vld [vmem:[#allocation2 + $0xf4] sm:$0xf] }
 0x935   :  { %v1809_v2 = vpop.xlane.xlu0 %1808 }
 0x936   :  { %v1815_v55 = vmul.f32 %v1809_v2, %v5347_v10  ;;  %v4233_v2 = vor.u32 %v4788_v51, %v4232_v48 }
 0x937   :  { %2075 = vmatpush.bf16.msra.mxu0 %v4257_v34  ;;  %4888 = vmatpush.bf16.msra.mxu1 %v4257_v34 }
 0x938   :  { %v5950_v58 = vsub.f32 %v1801_v46, %v1815_v55  ;;  %v4277_v46 = vor.u32 %v4798_v27, %v4276_v57  ;;  %v4234_v55 = vld [vmem:[#allocation2 + $0xfc] sm:$0xf0] }
 0x93a   :  { %v1823_v60 = vmul.f32 %v5950_v58, %v5950_v58  ;;  %2112 = vmatpush.bf16.msrb.mxu3 %v4277_v46 }
 0x93c   :  { %1828 = vadd.xlane.f32.xlu1 %v1823_v60  ;;  %v4240_v60 = vld [vmem:[#allocation2 + $0xf8] sm:$0xf] }
 0x93e   :  { %2113 = vmatpush.bf16.msrb.mxu3 %v4265_v20 }
 0x955   :  { %v1811_v8 = vpop.xlane.xlu1 %1810 }
 0x956   :  { %v1816_v32 = vmul.f32 %v1811_v8, %v5347_v10  ;;  %v4789_v8 = vld [vmem:[#allocation2 + $0x100] sm:$0xf0] }
 0x958   :  { %v5955_v62 = vsub.f32 %v1802_v25, %v1816_v32  ;;  %v4791_v25 = vld [vmem:[#allocation2 + $0x110] sm:$0xf0]  ;;  %v4237_v32 = vor.u32 %v4787_v50, %v4234_v55 }
 0x959   :  { %v4245_v23 = vor.u32 %v4791_v25, %v4244_v59 }
 0x95a   :  { %v1824_v6 = vmul.f32 %v5955_v62, %v5955_v62  ;;  %2096 = vmatpush.bf16.msrb.mxu2 %v4237_v32 }
 0x95b   :  { %2076 = vmatpush.bf16.msra.mxu0 %v4245_v23  ;;  %4889 = vmatpush.bf16.msra.mxu1 %v4245_v23  ;;  %v4934_v23 = vld [vmem:[%s6569_s16] ss:$0 sm:$0xff] }
 0x95c   :  { %1830 = vadd.xlane.f32.xlu2 %v1824_v6  ;;  %v4241_v6 = vor.u32 %v4789_v8, %v4240_v60 }
 0x95d   :  { %v1813_v9 = vpop.xlane.xlu2 %1812 }
 0x95e   :  { %v1817_v49 = vmul.f32 %v1813_v9, %v5347_v10  ;;  %v4220_v9 = vld [vmem:[#allocation2 + $0xd8] sm:$0xf] }
 0x95f   :  { %2077 = vmatpush.bf16.msra.mxu0 %v4233_v2  ;;  %4890 = vmatpush.bf16.msra.mxu1 %v4233_v2 }
 0x960   :  { %v5960_v12 = vsub.f32 %v1803_v7, %v1817_v49  ;;  %v4253_v7 = vor.u32 %v4792_v45, %v4252_v5  ;;  %v4785_v49 = vld [vmem:[#allocation2 + $0xe0] sm:$0xf0] }
 0x961   :  { %v4221_v28 = vor.u32 %v4785_v49, %v4220_v9 }
 0x962   :  { %v1825_v36 = vmul.f32 %v5960_v12, %v5960_v12  ;;  %2114 = vmatpush.bf16.msrb.mxu3 %v4253_v7 }
 0x963   :  { %2078 = vmatpush.bf16.msra.mxu0 %v4221_v28  ;;  %4891 = vmatpush.bf16.msra.mxu1 %v4221_v28 }
 0x964   :  { %1832 = vadd.xlane.f32.xlu0 %v1825_v36  ;;  %v4784_v36 = vld [vmem:[#allocation2 + $0xdc] sm:$0xf] }
 0x965   :  { %v4225_v35 = vor.u32 %v4784_v36, %v4222_v11 }
 0x966   :  { %2115 = vmatpush.bf16.msrb.mxu3 %v4241_v6 }
 0x967   :  { %2097 = vmatpush.bf16.msrb.mxu2 %v4225_v35  ;;  %2079 = vmatpush.bf16.msra.mxu0 %v4209_v21 }
 0x968   :  { %4892 = vmatpush.bf16.msra.mxu1 %v4209_v21 }
 0x96a   :  { %2116 = vmatpush.bf16.msrb.mxu3 %v4229_v18 }
 0x96b   :  { %2098 = vmatpush.bf16.msrb.mxu2 %v4213_v39 }
 0x96e   :  { %2117 = vmatpush.bf16.msrb.mxu3 %v4217_v15 }
 0x9a7   :  { %v1827_v14 = vpop.xlane.xlu0 %1826 }
 0x9a8   :  { %v1834_v16 = vmul.f32 %v1827_v14, %v5347_v10 }
 0x9aa   :  { %v1838_v30 = vadd.f32 1e-12, %v1834_v16 }
 0x9ac   :  { %5024 = vrsqrt.f32 %v1838_v30  ;;  %vm1848_vm2 = vweird.f32 %v1838_v30 }
 0x9af   :  { %v1829_v24 = vpop.xlane.xlu1 %1828 }
 0x9b0   :  { %v1835_v43 = vmul.f32 %v1829_v24, %v5347_v10 }
 0x9b2   :  { %v5025_v61 = vpop.eup %5024  ;;  %v1839_v42 = vadd.f32 1e-12, %v1835_v43 }
 0x9b3   :  { %v1843_v26 = vmul.f32 %v5025_v61, %v1838_v30  ;;  %vm1849_vm1 = vweird.f32 %v5025_v61 }
 0x9b4   :  { %5026 = vrsqrt.f32 %v1839_v42  ;;  %vm1850_vm3 = vmor %vm1848_vm2, %vm1849_vm1  ;;  %vm1858_vm5 = vweird.f32 %v1839_v42 }
 0x9b5   :  { %v1844_v57 = vmul.f32 %v5025_v61, %v1843_v26 }
 0x9b7   :  { %v1845_v27 = vmul.f32 0.5, %v1844_v57 }
 0x9b9   :  { %v1846_v63 = vsub.f32 1.5, %v1845_v27 }
 0x9ba   :  { %v5027_v46 = vpop.eup %5026 }
 0x9bb   :  { %v1847_v29 = vmul.f32 %v5025_v61, %v1846_v63  ;;  %v1853_v40 = vmul.f32 %v5027_v46, %v1839_v42  ;;  %vm1859_vm4 = vweird.f32 %v5027_v46 }
 0x9bc   :  { %vm1860_vm6 = vmor %vm1858_vm5, %vm1859_vm4 }
 0x9bd   :  { %v1854_v33 = vmul.f32 %v5027_v46, %v1853_v40  ;;  %v1851_v34 = vsel %vm1850_vm3, %v5025_v61, %v1847_v29 }
 0x9be   :  { %v1882_v53 = vmul.f32 %v1851_v34, %v5945_v54 }
 0x9bf   :  { %v1855_v52 = vmul.f32 0.5, %v1854_v33 }
 0x9c0   :  { %v1889_v0 = vmul.f32 %v4933_v56, %v1882_v53 }
 0x9c1   :  { %v1856_v37 = vsub.f32 1.5, %v1855_v52 }
 0x9c2   :  { %v5974_v5 = vadd.f32 %v4934_v23, %v1889_v0 }
 0x9c3   :  { %v1857_v20 = vmul.f32 %v5027_v46, %v1856_v37 }
 0x9c5   :  { %v1861_v59 = vsel %vm1860_vm6, %v5027_v46, %v1857_v20 }
 0x9c6   :  { %v1883_v25 = vmul.f32 %v1861_v59, %v5950_v58 }
 0x9c8   :  { %v1890_v41 = vmul.f32 %v4933_v56, %v1883_v25 }
 0x9ca   :  { %v5976_v45 = vadd.f32 %v4934_v23, %v1890_v41 }
 0x9cc   :  { %v1900_v54 = vpack.c.bf16 %v5976_v45, %v5974_v5 }
 0x9ce   :  { %2080 = vmatmul.bf16.vlgmr.msra.gmra.mxu0 %v1900_v54  ;;  %2099 = vmatmul.bf16.vlgmr.msrb.gmra.mxu2 %v1900_v54 }
 0x9cf   :  { %2118 = vmatmul.bf16.vlgmr.msrb.gmra.mxu3 %v1900_v54  ;;  %v1831_v38 = vpop.xlane.xlu2 %1830 }
 0x9d0   :  { %v1836_v7 = vmul.f32 %v1831_v38, %v5347_v10 }
 0x9d2   :  { %v1840_v58 = vadd.f32 1e-12, %v1836_v7 }
 0x9d4   :  { %5028 = vrsqrt.f32 %v1840_v58  ;;  %vm1868_vm8 = vweird.f32 %v1840_v58 }
 0x9d7   :  { %v1833_v48 = vpop.xlane.xlu0 %1832 }
 0x9d8   :  { %v1837_v51 = vmul.f32 %v1833_v48, %v5347_v10 }
 0x9da   :  { %v5029_v50 = vpop.eup %5028  ;;  %v1841_v2 = vadd.f32 1e-12, %v1837_v51 }
 0x9db   :  { %v1863_v55 = vmul.f32 %v5029_v50, %v1840_v58  ;;  %vm1869_vm7 = vweird.f32 %v5029_v50 }
 0x9dc   :  { %5030 = vrsqrt.f32 %v1841_v2  ;;  %vm1870_vm9 = vmor %vm1868_vm8, %vm1869_vm7  ;;  %vm1878_vm11 = vweird.f32 %v1841_v2 }
 0x9dd   :  { %v1864_v60 = vmul.f32 %v5029_v50, %v1863_v55 }
 0x9df   :  { %v1865_v8 = vmul.f32 0.5, %v1864_v60 }
 0x9e1   :  { %v1866_v32 = vsub.f32 1.5, %v1865_v8 }
 0x9e2   :  { %v5031_v6 = vpop.eup %5030 }
 0x9e3   :  { %v1867_v9 = vmul.f32 %v5029_v50, %v1866_v32  ;;  %v1873_v49 = vmul.f32 %v5031_v6, %v1841_v2  ;;  %vm1879_vm10 = vweird.f32 %v5031_v6 }
 0x9e4   :  { %vm1880_vm12 = vmor %vm1878_vm11, %vm1879_vm10 }
 0x9e5   :  { %v1874_v36 = vmul.f32 %v5031_v6, %v1873_v49  ;;  %v1871_v14 = vsel %vm1870_vm9, %v5029_v50, %v1867_v9 }
 0x9e6   :  { %v1884_v3 = vmul.f32 %v1871_v14, %v5955_v62  ;;  %v4205_v62 = vld [vmem:[%s6559_s6 + $0x3] sm:$0x7]  ;;  %s5215_s6 = smov [#allocation7]  }
 0x9e7   :  { %v1875_v28 = vmul.f32 0.5, %v1874_v36  ;;  %v1938_v1 = vperm.slane %v4205_v62, 0  ;;  %v1939_v24 = vperm.slane %v4205_v62, 1  ;;  %v1940_v61 = vperm.slane %v4205_v62, 2  ;;  %s3798_s22 = sshll.u32 %s5215_s6, 4  ;;  %s3799_s22 = int_to_ptr.vmem [resolvable:$true] %s3798_s22 }
 0x9e8   :  { %v1891_v18 = vmul.f32 %v4933_v56, %v1884_v3 }
 0x9e9   :  { %v1876_v11 = vsub.f32 1.5, %v1875_v28 }
 0x9ea   :  { %v5984_v17 = vadd.f32 %v4934_v23, %v1891_v18 }
 0x9eb   :  { %v1877_v47 = vmul.f32 %v5031_v6, %v1876_v11 }
 0x9ed   :  { %v1881_v16 = vsel %vm1880_vm12, %v5031_v6, %v1877_v47 }
 0x9ee   :  { %v1885_v35 = vmul.f32 %v1881_v16, %v5960_v12 }
 0x9f0   :  { %v1892_v44 = vmul.f32 %v4933_v56, %v1885_v35 }
 0x9f2   :  { %v5986_v19 = vadd.f32 %v4934_v23, %v1892_v44 }
 0x9f4   :  { %v1901_v21 = vpack.c.bf16 %v5986_v19, %v5984_v17 }
 0x9f6   :  { %2085 = vmatmul.bf16.vlgmr.msra.gmra.mxu1 %v1901_v21  ;;  %2104 = vmatmul.bf16.gmra.mxu2 %v1901_v21 }
 0x9f7   :  { %2123 = vmatmul.bf16.gmra.mxu3 %v1901_v21 }
 0xa4b   :  { %v2081_v22 = vpop.f32.mrf.mxu0 }
 0xa4c   :  { %v2082_v39 = vadd.f32 %v2081_v22, %v1938_v1 }
 0xa51   :  { %v2100_v31 = vpop.f32.mrf.mxu2 }
 0xa52   :  { %v2119_v12 = vpop.f32.mrf.mxu3  ;;  %v2101_v26 = vadd.f32 %v2100_v31, %v1939_v24 }
 0xa53   :  { %v2083_v30 = vpop.f32.mrf.mxu0  ;;  %v2120_v63 = vadd.f32 %v2119_v12, %v1940_v61 }
 0xa54   :  { %v2084_v15 = vadd.f32 %v2083_v30, %v1938_v1 }
 0xa56   :  { %v2129_v43 = vpack.c.bf16 %v2084_v15, %v2082_v39 }
 0xa58   :  { %2223 = vrot.lane.b32.xlu2 %v2129_v43, %s5212_s30 }
 0xa59   :  { %v2102_v42 = vpop.f32.mrf.mxu2 }
 0xa5a   :  { %v2103_v57 = vadd.f32 %v2102_v42, %v1939_v24  ;;  %v2121_v27 = vpop.f32.mrf.mxu3 }
 0xa5b   :  { %v2122_v46 = vadd.f32 %v2121_v27, %v1940_v61 }
 0xa5c   :  { %v2130_v29 = vpack.c.bf16 %v2103_v57, %v2101_v26 }
 0xa5d   :  { %v5994_v40 = vpack.c.bf16 %v2122_v46, %v2120_v63 }
 0xa5e   :  { %2226 = vrot.lane.b32.xlu1 %v2130_v29, %s5212_s30  ;;  %v2136_v33 = vsel %vm436_vm13, %v2130_v29, 0 }
 0xa5f   :  { %2215 = vmatpush.bf16.msrb.mxu1 %v5994_v40  ;;  %2145 = vmatpush.bf16.xpose.msrb.mxu0 %v2136_v33 }
 0xa66   :  { %4302 = vmatmul.msk.bf16.vlgmr.msrb.gmra.mxu0 %vm436_vm13, %v2129_v43 }
 0xa73   :  { %v2086_v34 = vpop.f32.mrf.mxu1 }
 0xa74   :  { %v2087_v56 = vadd.f32 %v2086_v34, %v1938_v1 }
 0xa79   :  { %v2105_v52 = vpop.f32.mrf.mxu2 }
 0xa7a   :  { %v2124_v37 = vpop.f32.mrf.mxu3  ;;  %v2106_v0 = vadd.f32 %v2105_v52, %v1939_v24 }
 0xa7b   :  { %v2088_v53 = vpop.f32.mrf.mxu1  ;;  %v2125_v54 = vadd.f32 %v2124_v37, %v1940_v61 }
 0xa7c   :  { %v2089_v20 = vadd.f32 %v2088_v53, %v1938_v1 }
 0xa7e   :  { %v2332_v59 = vpack.c.bf16 %v2089_v20, %v2087_v56 }
 0xa80   :  { %2426 = vrot.lane.b32.xlu1 %v2332_v59, %s5212_s30 }
 0xa81   :  { %v2107_v25 = vpop.f32.mrf.mxu2 }
 0xa82   :  { %v2108_v23 = vadd.f32 %v2107_v25, %v1939_v24  ;;  %v2126_v41 = vpop.f32.mrf.mxu3 }
 0xa83   :  { %v2127_v38 = vadd.f32 %v2126_v41, %v1940_v61 }
 0xa84   :  { %v2333_v7 = vpack.c.bf16 %v2108_v23, %v2106_v0 }
 0xa85   :  { %v6001_v58 = vpack.c.bf16 %v2127_v38, %v2125_v54 }
 0xa86   :  { %2429 = vrot.lane.b32.xlu0 %v2333_v7, %s5212_s30  ;;  %v2339_v48 = vsel %vm436_vm13, %v2333_v7, 0 }
 0xa87   :  { %2418 = vmatpush.bf16.msra.mxu1 %v6001_v58  ;;  %2348 = vmatpush.bf16.xpose.msra.mxu0 %v2339_v48 }
 0xa8e   :  { %4306 = vmatmul.msk.bf16.vlgmr.msra.gmra.mxu0 %vm436_vm13, %v2332_v59 }
 0xab2   :  { %v2224_v2 = vpop.permute.xlu2 %2223 }
 0xad0   :  { %v2227_v51 = vpop.permute.xlu1 %2226 }
 0xad1   :  { %v2232_v50 = vsel %vm436_vm13, %v2227_v51, 0 }
 0xad2   :  { %2241 = vmatpush.bf16.xpose.msra.mxu2 %v2232_v50 }
 0xad9   :  { %4304 = vmatmul.msk.bf16.vlgmr.msra.gmra.mxu2 %vm436_vm13, %v2224_v2 }
 0xae3   :  { %v2147_v28 = vpop.f32.mrf.mxu0 }
 0xae4   :  { %v2152_v3 = vmul.f32 0.125, %v2147_v28 }
 0xae6   :  { %v2154_v16 = vadd.f32 %v2152_v3, %v5416_v4 }
 0xae8   :  { %v2156_v35 = vsel %vm462_vm14, %v2154_v16, -inf }
 0xaeb   :  { %v2149_v18 = vpop.f32.mrf.mxu0 }
 0xaec   :  { %v2153_v1 = vmul.f32 0.125, %v2149_v18 }
 0xaee   :  { %v2155_v39 = vadd.f32 %v2153_v1, %v5416_v4 }
 0xaf0   :  { %v2159_v26 = vsel %vm462_vm14, %v2155_v39, -inf }
 0xaf2   :  { %v2427_v8 = vpop.permute.xlu1 %2426 }
 0xaf8   :  { %v2430_v55 = vpop.permute.xlu0 %2429 }
 0xaf9   :  { %v2435_v60 = vsel %vm436_vm13, %v2430_v55, 0 }
 0xafa   :  { %2444 = vmatpush.bf16.xpose.msrb.mxu2 %v2435_v60 }
 0xb01   :  { %4308 = vmatmul.msk.bf16.vlgmr.msrb.gmra.mxu2 %vm436_vm13, %v2427_v8 }
 0xb0b   :  { %v2350_v44 = vpop.f32.mrf.mxu0 }
 0xb0c   :  { %v2355_v43 = vmul.f32 0.125, %v2350_v44 }
 0xb0e   :  { %v2357_v27 = vadd.f32 %v2355_v43, %v5434_v13 }
 0xb10   :  { %v2359_v46 = vsel %vm462_vm14, %v2357_v27, -inf }
 0xb13   :  { %v2352_v15 = vpop.f32.mrf.mxu0 }
 0xb14   :  { %v2356_v61 = vmul.f32 0.125, %v2352_v15 }
 0xb16   :  { %v2358_v57 = vadd.f32 %v2356_v61, %v5434_v13 }
 0xb18   :  { %v2362_v63 = vsel %vm462_vm14, %v2358_v57, -inf }
 0xb5c   :  { %v2243_v32 = vpop.f32.mrf.mxu2 }
 0xb5d   :  { %v2248_v6 = vmul.f32 0.125, %v2243_v32 }
 0xb5f   :  { %v2250_v9 = vadd.f32 %v2248_v6, %v5416_v4 }
 0xb61   :  { %v2252_v49 = vsel %vm462_vm14, %v2250_v9, -inf }
 0xb62   :  { %2253 = vmax.xlane.f32.xlu0 %v2252_v49 }
 0xb64   :  { %v2245_v36 = vpop.f32.mrf.mxu2 }
 0xb65   :  { %v2249_v14 = vmul.f32 0.125, %v2245_v36 }
 0xb67   :  { %v2251_v11 = vadd.f32 %v2249_v14, %v5416_v4 }
 0xb69   :  { %v2255_v47 = vsel %vm462_vm14, %v2251_v11, -inf }
 0xb6a   :  { %2256 = vmax.xlane.f32.xlu2 %v2255_v47 }
 0xb72   :  { %2157 = vmax.xlane.f32.xlu2 %v2156_v35 }
 0xb84   :  { %v2446_v21 = vpop.f32.mrf.mxu2 }
 0xb85   :  { %v2451_v22 = vmul.f32 0.125, %v2446_v21 }
 0xb87   :  { %v2453_v62 = vadd.f32 %v2451_v22, %v5434_v13 }
 0xb89   :  { %v2455_v31 = vsel %vm462_vm14, %v2453_v62, -inf }
 0xb8a   :  { %2456 = vmax.xlane.f32.xlu1 %v2455_v31 }
 0xb8c   :  { %v2448_v12 = vpop.f32.mrf.mxu2 }
 0xb8d   :  { %v2452_v30 = vmul.f32 0.125, %v2448_v12 }
 0xb8f   :  { %v2454_v24 = vadd.f32 %v2452_v30, %v5434_v13 }
 0xb91   :  { %v2458_v42 = vsel %vm462_vm14, %v2454_v24, -inf }
 0xb92   :  { %2459 = vmax.xlane.f32.xlu0 %v2458_v42  ;;  %2160 = vmax.xlane.f32.xlu1 %v2159_v26 }
 0xb9a   :  { %2363 = vmax.xlane.f32.xlu0 %v2362_v63  ;;  %2360 = vmax.xlane.f32.xlu1 %v2359_v46 }
 0xbd5   :  { %v2254_v4 = vpop.xlane.xlu0 %2253 }
 0xbd6   :  { %v2258_v29 = vsub.f32 %v2250_v9, %v2254_v4 }
 0xbd8   :  { %v2260_v33 = vmul.f32 1.442695, %v2258_v29 }
 0xbda   :  { %5032 = vpow2.f32 %v2260_v33 }
 0xbdd   :  { %v2257_v34 = vpop.xlane.xlu2 %2256 }
 0xbde   :  { %v2259_v52 = vsub.f32 %v2251_v11, %v2257_v34 }
 0xbe0   :  { %v6027_v37 = vpop.eup %5032  ;;  %v2262_v53 = vmul.f32 1.442695, %v2259_v52 }
 0xbe1   :  { %v2264_v56 = vsel %vm462_vm14, %v6027_v37, 0.0 }
 0xbe2   :  { %5034 = vpow2.f32 %v2262_v53  ;;  %2265 = vadd.xlane.f32.xlu0 %v2264_v56 }
 0xbe5   :  { %v2158_v23 = vpop.xlane.xlu2 %2157 }
 0xbe6   :  { %v2162_v48 = vsub.f32 %v2154_v16, %v2158_v23 }
 0xbe8   :  { %v6031_v13 = vpop.eup %5034  ;;  %v2164_v2 = vmul.f32 1.442695, %v2162_v48 }
 0xbe9   :  { %v2267_v20 = vsel %vm462_vm14, %v6031_v13, 0.0 }
 0xbea   :  { %2268 = vadd.xlane.f32.xlu2 %v2267_v20 }
 0xbf6   :  { %2302 = vrot.lane.b32.xlu0 %v5994_v40, %s5212_s30 }
 0xbfd   :  { %v2457_v59 = vpop.xlane.xlu1 %2456 }
 0xbfe   :  { %v2461_v25 = vsub.f32 %v2453_v62, %v2457_v59 }
 0xc00   :  { %v2463_v0 = vmul.f32 1.442695, %v2461_v25 }
 0xc02   :  { %5036 = vpow2.f32 %v2463_v0 }
 0xc05   :  { %v2460_v41 = vpop.xlane.xlu0 %2459  ;;  %v2161_v54 = vpop.xlane.xlu1 %2160 }
 0xc06   :  { %v2462_v38 = vsub.f32 %v2454_v24, %v2460_v41  ;;  %v2163_v8 = vsub.f32 %v2155_v39, %v2161_v54 }
 0xc08   :  { %v6037_v7 = vpop.eup %5036  ;;  %v2465_v51 = vmul.f32 1.442695, %v2462_v38  ;;  %v2166_v9 = vmul.f32 1.442695, %v2163_v8 }
 0xc09   :  { %v2467_v50 = vsel %vm462_vm14, %v6037_v7, 0.0 }
 0xc0a   :  { %5038 = vpow2.f32 %v2465_v51  ;;  %2468 = vadd.xlane.f32.xlu2 %v2467_v50 }
 0xc0b   :  { %5040 = vpow2.f32 %v2164_v2 }
 0xc0d   :  { %v2361_v55 = vpop.xlane.xlu1 %2360  ;;  %v2364_v49 = vpop.xlane.xlu0 %2363 }
 0xc0e   :  { %v2365_v40 = vsub.f32 %v2357_v27, %v2361_v55  ;;  %v2366_v14 = vsub.f32 %v2358_v57, %v2364_v49 }
 0xc10   :  { %v6041_v60 = vpop.eup %5038  ;;  %v2367_v6 = vmul.f32 1.442695, %v2365_v40  ;;  %v2369_v3 = vmul.f32 1.442695, %v2366_v14 }
 0xc11   :  { %v2470_v32 = vsel %vm462_vm14, %v6041_v60, 0.0  ;;  %v6045_v36 = vpop.eup %5040 }
 0xc12   :  { %2471 = vadd.xlane.f32.xlu1 %v2470_v32  ;;  %5042 = vpow2.f32 %v2367_v6  ;;  %v2168_v28 = vsel %vm462_vm14, %v6045_v36, 0.0 }
 0xc13   :  { %5044 = vpow2.f32 %v2166_v9 }
 0xc14   :  { %5046 = vpow2.f32 %v2369_v3 }
 0xc18   :  { %v6049_v11 = vpop.eup %5042 }
 0xc19   :  { %v6051_v47 = vpop.eup %5044  ;;  %v2371_v16 = vsel %vm462_vm14, %v6049_v11, 0.0 }
 0xc1a   :  { %2169 = vadd.xlane.f32.xlu1 %v2168_v28  ;;  %v2171_v35 = vsel %vm462_vm14, %v6051_v47, 0.0  ;;  %v6059_v18 = vpop.eup %5046 }
 0xc1b   :  { %v2374_v44 = vsel %vm462_vm14, %v6059_v18, 0.0 }
 0xc20   :  { %2372 = vadd.xlane.f32.xlu0 %v2371_v16 }
 0xc22   :  { %2505 = vrot.lane.b32.xlu2 %v6001_v58, %s5212_s30  ;;  %2172 = vadd.xlane.f32.xlu1 %v2171_v35 }
 0xc2a   :  { %2375 = vadd.xlane.f32.xlu1 %v2374_v44 }
 0xc55   :  { %v2266_v21 = vpop.xlane.xlu0 %2265 }
 0xc56   :  { %5048 = vrcp.f32 %v2266_v21  ;;  %v2281_v58 = vand.u32 2147483648, %v2266_v21  ;;  %vm2275_vm0 = vweird.f32 %v2266_v21  ;;  %v2279_v24 = vand.u32 2147483647, %v2266_v21 }
 0xc58   :  { %v2282_v63 = vor.u32 1.1754944e-38, %v2281_v58  ;;  %vm2280_vm3 = vcmp.eq.f32.partialorder %v2279_v24, 8.507059e+37 }
 0xc5c   :  { %v5049_v22 = vpop.eup %5048 }
 0xc5d   :  { %v2271_v62 = vmul.f32 %v5049_v22, %v2266_v21  ;;  %v2269_v1 = vpop.xlane.xlu2 %2268  ;;  %vm2276_vm15 = vweird.f32 %v5049_v22 }
 0xc5e   :  { %5050 = vrcp.f32 %v2269_v1  ;;  %vm2277_vm1 = vmor %vm2275_vm0, %vm2276_vm15  ;;  %v2295_v61 = vand.u32 2147483648, %v2269_v1  ;;  %v2293_v27 = vand.u32 2147483647, %v2269_v1  ;;  %vm2289_vm4 = vweird.f32 %v2269_v1 }
 0xc5f   :  { %v2272_v31 = vsub.f32 1.0, %v2271_v62 }
 0xc60   :  { %v2296_v29 = vor.u32 1.1754944e-38, %v2295_v61  ;;  %vm2294_vm6 = vcmp.eq.f32.partialorder %v2293_v27, 8.507059e+37 }
 0xc61   :  { %v2273_v12 = vmul.f32 %v5049_v22, %v2272_v31 }
 0xc63   :  { %v2274_v39 = vadd.f32 %v5049_v22, %v2273_v12 }
 0xc64   :  { %v5051_v30 = vpop.eup %5050 }
 0xc65   :  { %v2285_v15 = vmul.f32 %v5051_v30, %v2269_v1  ;;  %v2278_v26 = vsel %vm2277_vm1, %v5049_v22, %v2274_v39  ;;  %vm2290_vm2 = vweird.f32 %v5051_v30 }
 0xc66   :  { %v2283_v4 = vsel %vm2280_vm3, %v2282_v63, %v2278_v26  ;;  %vm2291_vm5 = vmor %vm2289_vm4, %vm2290_vm2 }
 0xc67   :  { %v2286_v43 = vsub.f32 1.0, %v2285_v15  ;;  %v2298_v52 = vmul.f32 %v6027_v37, %v2283_v4 }
 0xc68   :  { %v2303_v42 = vpop.permute.xlu0 %2302 }
 0xc69   :  { %v2287_v57 = vmul.f32 %v5051_v30, %v2286_v43  ;;  %2315 = vmatpush.bf16.msra.mxu3 %v2303_v42 }
 0xc6b   :  { %v2288_v46 = vadd.f32 %v5051_v30, %v2287_v57 }
 0xc6d   :  { %v2292_v33 = vsel %vm2291_vm5, %v5051_v30, %v2288_v46 }
 0xc6e   :  { %v2297_v34 = vsel %vm2294_vm6, %v2296_v29, %v2292_v33 }
 0xc6f   :  { %v2299_v53 = vmul.f32 %v6031_v13, %v2297_v34 }
 0xc71   :  { %v2300_v56 = vpack.c.bf16 %v2299_v53, %v2298_v52 }
 0xc73   :  { %4305 = vmatmul.msk.bf16.vlgmr.msra.gmra.mxu3 %vm462_vm14, %v2300_v56 }
 0xc7d   :  { %v2469_v20 = vpop.xlane.xlu2 %2468 }
 0xc7e   :  { %5052 = vrcp.f32 %v2469_v20  ;;  %v2484_v50 = vand.u32 2147483648, %v2469_v20  ;;  %vm2478_vm8 = vweird.f32 %v2469_v20  ;;  %v2482_v13 = vand.u32 2147483647, %v2469_v20 }
 0xc80   :  { %v2485_v6 = vor.u32 1.1754944e-38, %v2484_v50  ;;  %vm2483_vm11 = vcmp.eq.f32.partialorder %v2482_v13, 8.507059e+37 }
 0xc84   :  { %v5053_v59 = vpop.eup %5052 }
 0xc85   :  { %v2474_v25 = vmul.f32 %v5053_v59, %v2469_v20  ;;  %v2506_v0 = vpop.permute.xlu2 %2505  ;;  %v2472_v23 = vpop.xlane.xlu1 %2471  ;;  %vm2479_vm7 = vweird.f32 %v5053_v59 }
 0xc86   :  { %5054 = vrcp.f32 %v2472_v23  ;;  %2518 = vmatpush.bf16.msrb.mxu3 %v2506_v0  ;;  %vm2480_vm9 = vmor %vm2478_vm8, %vm2479_vm7  ;;  %v2498_v55 = vand.u32 2147483648, %v2472_v23  ;;  %v2496_v32 = vand.u32 2147483647, %v2472_v23  ;;  %vm2492_vm12 = vweird.f32 %v2472_v23 }
 0xc87   :  { %v2475_v41 = vsub.f32 1.0, %v2474_v25 }
 0xc88   :  { %v2499_v28 = vor.u32 1.1754944e-38, %v2498_v55  ;;  %vm2497_vm0 = vcmp.eq.f32.partialorder %v2496_v32, 8.507059e+37 }
 0xc89   :  { %v2476_v54 = vmul.f32 %v5053_v59, %v2475_v41 }
 0xc8b   :  { %v2477_v48 = vadd.f32 %v5053_v59, %v2476_v54 }
 0xc8c   :  { %v5055_v38 = vpop.eup %5054 }
 0xc8d   :  { %v2488_v51 = vmul.f32 %v5055_v38, %v2472_v23  ;;  %v2170_v37 = vpop.xlane.xlu1 %2169  ;;  %v2481_v40 = vsel %vm2480_vm9, %v5053_v59, %v2477_v48  ;;  %vm2493_vm10 = vweird.f32 %v5055_v38 }
 0xc8e   :  { %5056 = vrcp.f32 %v2170_v37  ;;  %v2486_v14 = vsel %vm2483_vm11, %v2485_v6, %v2481_v40  ;;  %vm2494_vm15 = vmor %vm2492_vm12, %vm2493_vm10  ;;  %v2185_v43 = vand.u32 2147483648, %v2170_v37  ;;  %vm2179_vm2 = vweird.f32 %v2170_v37 }
 0xc8f   :  { %v2489_v2 = vsub.f32 1.0, %v2488_v51  ;;  %v2501_v22 = vmul.f32 %v6037_v7, %v2486_v14  ;;  %v2183_v61 = vand.u32 2147483647, %v2170_v37 }
 0xc90   :  { %v2186_v63 = vor.u32 1.1754944e-38, %v2185_v43 }
 0xc91   :  { %v2490_v8 = vmul.f32 %v5055_v38, %v2489_v2  ;;  %vm2184_vm5 = vcmp.eq.f32.partialorder %v2183_v61, 8.507059e+37 }
 0xc93   :  { %v2491_v9 = vadd.f32 %v5055_v38, %v2490_v8  ;;  %v6066_v35 = vpop.xlane.xlu0 %2372 }
 0xc94   :  { %v5057_v49 = vpop.eup %5056 }
 0xc95   :  { %v2495_v3 = vsel %vm2494_vm15, %v5055_v38, %v2491_v9  ;;  %v2175_v16 = vmul.f32 %v5057_v49, %v2170_v37  ;;  %v2173_v44 = vpop.xlane.xlu1 %2172  ;;  %vm2180_vm1 = vweird.f32 %v5057_v49  ;;  %v2388_v37 = vand.u32 2147483648, %v6066_v35 }
 0xc96   :  { %v2500_v21 = vsel %vm2497_vm0, %v2499_v28, %v2495_v3  ;;  %5058 = vrcp.f32 %v2173_v44  ;;  %vm2181_vm3 = vmor %vm2179_vm2, %vm2180_vm1  ;;  %v2199_v42 = vand.u32 2147483648, %v2173_v44  ;;  %vm2193_vm6 = vweird.f32 %v2173_v44  ;;  %v4812_v3 = vld [vmem:[%s6560_s7 + $0x78] sm:$0xff] }
 0xc97   :  { %v2502_v62 = vmul.f32 %v6041_v60, %v2500_v21  ;;  %v2176_v1 = vsub.f32 1.0, %v2175_v16  ;;  %5060 = vrcp.f32 %v6066_v35  ;;  %v2197_v60 = vand.u32 2147483647, %v2173_v44  ;;  %2607 = vmatpush.bf16.msrb.mxu0 %v4812_v3  ;;  %v4808_v21 = vld [vmem:[%s6560_s7 + $0x58] sm:$0xff] }
 0xc98   :  { %v2200_v33 = vor.u32 1.1754944e-38, %v2199_v42  ;;  %vm2382_vm15 = vweird.f32 %v6066_v35  ;;  %v2389_v2 = vor.u32 1.1754944e-38, %v2388_v37 }
 0xc99   :  { %v2503_v31 = vpack.c.bf16 %v2502_v62, %v2501_v22  ;;  %v2177_v12 = vmul.f32 %v5057_v49, %v2176_v1  ;;  %vm2198_vm8 = vcmp.eq.f32.partialorder %v2197_v60, 8.507059e+37  ;;  %v4807_v22 = vld [vmem:[%s6560_s7 + $0x50] sm:$0xff]  ;;  %v4806_v62 = vld [vmem:[%s6560_s7 + $0x48] sm:$0xff]  ;;  %v4805_v1 = vld [vmem:[%s6560_s7 + $0x40] sm:$0xff] }
 0xc9b   :  { %4309 = vmatmul.msk.bf16.vlgmr.msrb.gmra.mxu3 %vm462_vm14, %v2503_v31  ;;  %v2178_v39 = vadd.f32 %v5057_v49, %v2177_v12 }
 0xc9c   :  { %v5059_v30 = vpop.eup %5058 }
 0xc9d   :  { %v2189_v15 = vmul.f32 %v5059_v30, %v2173_v44  ;;  %v2376_v58 = vpop.xlane.xlu1 %2375  ;;  %v5061_v24 = vpop.eup %5060  ;;  %v2182_v26 = vsel %vm2181_vm3, %v5057_v49, %v2178_v39  ;;  %vm2194_vm4 = vweird.f32 %v5059_v30  ;;  %v4809_v44 = vld [vmem:[%s6560_s7 + $0x60] sm:$0xff] }
 0xc9e   :  { %5062 = vrcp.f32 %v2376_v58  ;;  %v2378_v57 = vmul.f32 %v5061_v24, %v6066_v35  ;;  %v2187_v29 = vsel %vm2184_vm5, %v2186_v63, %v2182_v26  ;;  %vm2195_vm7 = vmor %vm2193_vm6, %vm2194_vm4  ;;  %v2402_v38 = vand.u32 2147483648, %v2376_v58 }
 0xc9f   :  { %v2190_v7 = vsub.f32 1.0, %v2189_v15  ;;  %v2202_v20 = vmul.f32 %v6045_v36, %v2187_v29  ;;  %vm2383_vm10 = vweird.f32 %v5061_v24  ;;  %vm2396_vm11 = vweird.f32 %v2376_v58 }
 0xca0   :  { %v2379_v34 = vsub.f32 1.0, %v2378_v57  ;;  %v2400_v51 = vand.u32 2147483647, %v2376_v58  ;;  %v2386_v36 = vand.u32 2147483647, %v6066_v35  ;;  %vm2384_vm0 = vmor %vm2382_vm15, %vm2383_vm10  ;;  %v2403_v50 = vor.u32 1.1754944e-38, %v2402_v38 }
 0xca1   :  { %v2191_v27 = vmul.f32 %v5059_v30, %v2190_v7 }
 0xca2   :  { %v2380_v0 = vmul.f32 %v5061_v24, %v2379_v34  ;;  %vm2401_vm1 = vcmp.eq.f32.partialorder %v2400_v51, 8.507059e+37  ;;  %vm2387_vm2 = vcmp.eq.f32.partialorder %v2386_v36, 8.507059e+37 }
 0xca3   :  { %v2192_v46 = vadd.f32 %v5059_v30, %v2191_v27 }
 0xca4   :  { %v5063_v4 = vpop.eup %5062  ;;  %v2381_v48 = vadd.f32 %v5061_v24, %v2380_v0 }
 0xca5   :  { %v2196_v52 = vsel %vm2195_vm7, %v5059_v30, %v2192_v46  ;;  %v2392_v53 = vmul.f32 %v5063_v4, %v2376_v58  ;;  %vm2397_vm9 = vweird.f32 %v5063_v4  ;;  %v4935_v46 = vld [vmem:[%s6561_s8 + $0x1] ss:$0 sm:$0xff] }
 0xca6   :  { %v2201_v56 = vsel %vm2198_vm8, %v2200_v33, %v2196_v52  ;;  %vm2398_vm12 = vmor %vm2396_vm11, %vm2397_vm9  ;;  %v2385_v13 = vsel %vm2384_vm0, %v5061_v24, %v2381_v48 }
 0xca7   :  { %v2203_v59 = vmul.f32 %v6051_v47, %v2201_v56  ;;  %v2393_v25 = vsub.f32 1.0, %v2392_v53  ;;  %v2390_v40 = vsel %vm2387_vm2, %v2389_v2, %v2385_v13 }
 0xca8   :  { %v2405_v32 = vmul.f32 %v6049_v11, %v2390_v40  ;;  %v4810_v11 = vld [vmem:[%s6560_s7 + $0x68] sm:$0xff]  ;;  %v4508_v40 = vld [vmem:[%s6564_s11 + $0x1e0] sm:$0xf] }
 0xca9   :  { %v2394_v23 = vmul.f32 %v5063_v4, %v2393_v25  ;;  %v2204_v41 = vpack.c.bf16 %v2203_v59, %v2202_v20 }
 0xcab   :  { %v2395_v54 = vadd.f32 %v5063_v4, %v2394_v23  ;;  %4303 = vmatmul.msk.bf16.vlgmr.msrb.gmra.mxu1 %vm462_vm14, %v2204_v41 }
 0xcad   :  { %v2399_v47 = vsel %vm2398_vm12, %v5063_v4, %v2395_v54 }
 0xcae   :  { %v2404_v55 = vsel %vm2401_vm1, %v2403_v50, %v2399_v47 }
 0xcaf   :  { %v2406_v8 = vmul.f32 %v6059_v18, %v2404_v55  ;;  %v4811_v18 = vld [vmem:[%s6560_s7 + $0x70] sm:$0xff] }
 0xcb0   :  { %2608 = vmatpush.bf16.msrb.mxu0 %v4811_v18  ;;  %v4842_v18 = vld [vmem:[%s6564_s11 + $0x1ec] sm:$0xf] }
 0xcb1   :  { %v2407_v6 = vpack.c.bf16 %v2406_v8, %v2405_v32  ;;  %v4843_v8 = vld [vmem:[%s6564_s11 + $0x1ec] sm:$0xf0]  ;;  %v4841_v32 = vld [vmem:[%s6564_s11 + $0x1e4] sm:$0xf] }
 0xcb4   :  { %2609 = vmatpush.bf16.msrb.mxu0 %v4810_v11 }
 0xcb8   :  { %2610 = vmatpush.bf16.msrb.mxu0 %v4809_v44  ;;  %v4839_v44 = vld [vmem:[%s6564_s11 + $0x1cc] sm:$0xf0] }
 0xcbb   :  { %4307 = vmatmul.msk.bf16.vlgmr.msra.gmra.mxu1 %vm462_vm14, %v2407_v6  ;;  %v4509_v6 = vor.u32 %v4843_v8, %v4508_v40  ;;  %v4428_v8 = vld [vmem:[%s6564_s11 + $0x140] sm:$0xf] }
 0xcbc   :  { %2611 = vmatpush.bf16.msrb.mxu0 %v4808_v21  ;;  %v4837_v21 = vld [vmem:[%s6564_s11 + $0x1c4] sm:$0xf] }
 0xcbd   :  { %2934 = vmatpush.bf16.msrb.mxu1 %v4509_v6  ;;  %v4821_v6 = vld [vmem:[%s6564_s11 + $0x144] sm:$0xf] }
 0xcc0   :  { %2612 = vmatpush.bf16.msrb.mxu0 %v4807_v22 }
 0xcc4   :  { %2613 = vmatpush.bf16.msrb.mxu0 %v4806_v62  ;;  %v4494_v62 = vld [vmem:[%s6564_s11 + $0x1d0] sm:$0xf0] }
 0xcc8   :  { %2614 = vmatpush.bf16.msrb.mxu0 %v4805_v1  ;;  %v4500_v1 = vld [vmem:[%s6564_s11 + $0x1c8] sm:$0xf] }
 0xcf6   :  { %v2317_v9 = vpop.f32.mrf.mxu3 }
 0xcfe   :  { %v2319_v49 = vpop.f32.mrf.mxu3 }
 0xcff   :  { %v4917_v14 = vpack.i.bf16 %v2319_v49, %v2317_v9  ;;  %v4510_v9 = vld [vmem:[%s6564_s11 + $0x1f0] sm:$0xf0]  ;;  %v4516_v49 = vld [vmem:[%s6564_s11 + $0x1e8] sm:$0xf] }
 0xd01   :  { %4918 = vrot.lane.b32.xlu2 %v4917_v14, %s5212_s30  ;;  %v4844_v14 = vld [vmem:[%s6564_s11 + $0x1f4] sm:$0xf0] }
 0xd02   :  { %v4517_v3 = vor.u32 %v4844_v14, %v4516_v49  ;;  %v4430_v49 = vld [vmem:[%s6564_s11 + $0x150] sm:$0xf0]  ;;  %v4436_v14 = vld [vmem:[%s6564_s11 + $0x148] sm:$0xf] }
 0xd04   :  { %2972 = vmatpush.bf16.msra.mxu3 %v4517_v3  ;;  %v4433_v3 = vor.u32 %v4821_v6, %v4430_v49 }
 0xd1e   :  { %v2520_v28 = vpop.f32.mrf.mxu3 }
 0xd26   :  { %v2522_v16 = vpop.f32.mrf.mxu3 }
 0xd27   :  { %v4922_v35 = vpack.i.bf16 %v2522_v16, %v2520_v28  ;;  %v4513_v28 = vor.u32 %v4841_v32, %v4510_v9  ;;  %v4518_v16 = vld [vmem:[%s6564_s11 + $0x1f8] sm:$0xf0]  ;;  %v4823_v32 = vld [vmem:[%s6564_s11 + $0x14c] sm:$0xf0] }
 0xd28   :  { %v2217_v31 = vpop.f32.mrf.mxu1  ;;  %v4521_v11 = vor.u32 %v4842_v18, %v4518_v16  ;;  %v4429_v9 = vor.u32 %v4823_v32, %v4428_v8  ;;  %v4822_v16 = vld [vmem:[%s6564_s11 + $0x14c] sm:$0xf]  ;;  %v4937_v32 = vld [vmem:[%s6563_s10 + $0x1] ss:$0 sm:$0xff] }
 0xd29   :  { %4923 = vrot.lane.b32.xlu1 %v4922_v35, %s5212_s30  ;;  %2953 = vmatpush.bf16.msra.mxu2 %v4513_v28  ;;  %v4492_v35 = vld [vmem:[%s6564_s11 + $0x1c0] sm:$0xf]  ;;  %v4824_v28 = vld [vmem:[%s6564_s11 + $0x154] sm:$0xf0] }
 0xd2a   :  { %2991 = vmatpush.bf16.msra.mxu0 %v4521_v11  ;;  %v4493_v22 = vor.u32 %v4839_v44, %v4492_v35  ;;  %v4437_v18 = vor.u32 %v4824_v28, %v4436_v14  ;;  %v4438_v11 = vld [vmem:[%s6564_s11 + $0x158] sm:$0xf0]  ;;  %v4412_v44 = vld [vmem:[%s6564_s11 + $0x120] sm:$0xf] }
 0xd2b   :  { %v4441_v35 = vor.u32 %v4822_v16, %v4438_v11 }
 0xd2c   :  { %2935 = vmatpush.bf16.msrb.mxu1 %v4493_v22  ;;  %v4817_v22 = vld [vmem:[%s6564_s11 + $0x124] sm:$0xf] }
 0xd30   :  { %v2219_v15 = vpop.f32.mrf.mxu1 }
 0xd38   :  { %v2420_v61 = vpop.f32.mrf.mxu1 }
 0xd40   :  { %v2422_v26 = vpop.f32.mrf.mxu1 }
 0xd5b   :  { %v4919_v12 = vpop.permute.xlu2 %4918 }
 0xd5c   :  { %v4921_v30 = vunpack.i.h.bf16 %v4919_v12  ;;  %v4920_v39 = vunpack.i.l.bf16 %v4919_v12  ;;  %v4497_v12 = vor.u32 %v4837_v21, %v4494_v62  ;;  %v4819_v21 = vld [vmem:[%s6564_s11 + $0x12c] sm:$0xf0] }
 0xd5e   :  { %v2330_v58 = vsel %vm436_vm13, %v2217_v31, %v4920_v39  ;;  %v2331_v24 = vsel %vm436_vm13, %v2219_v15, %v4921_v30  ;;  %v4840_v31 = vld [vmem:[%s6564_s11 + $0x1d4] sm:$0xf0]  ;;  %v4838_v39 = vld [vmem:[%s6564_s11 + $0x1cc] sm:$0xf]  ;;  %v4502_v15 = vld [vmem:[%s6564_s11 + $0x1d8] sm:$0xf0]  ;;  %2954 = vmatpush.bf16.msra.mxu2 %v4497_v12 }
 0xd5f   :  { %v2535_v43 = vpack.c.bf16 %v2331_v24, %v2330_v58  ;;  %v4501_v30 = vor.u32 %v4840_v31, %v4500_v1  ;;  %v4505_v58 = vor.u32 %v4838_v39, %v4502_v15  ;;  %v4476_v24 = vld [vmem:[%s6564_s11 + $0x1a0] sm:$0xf]  ;;  %v4413_v1 = vor.u32 %v4819_v21, %v4412_v44  ;;  %v4414_v31 = vld [vmem:[%s6564_s11 + $0x130] sm:$0xf0]  ;;  %v4420_v12 = vld [vmem:[%s6564_s11 + $0x128] sm:$0xf] }
 0xd60   :  { %v4417_v15 = vor.u32 %v4817_v22, %v4414_v31 }
 0xd61   :  { %2615 = vmatmul.bf16.vlgmr.msrb.gmra.mxu0 %v2535_v43  ;;  %2973 = vmatpush.bf16.msra.mxu3 %v4501_v30  ;;  %v4835_v43 = vld [vmem:[%s6564_s11 + $0x1ac] sm:$0xf0]  ;;  %v4820_v30 = vld [vmem:[%s6564_s11 + $0x134] sm:$0xf0] }
 0xd62   :  { %2992 = vmatpush.bf16.msra.mxu0 %v4505_v58  ;;  %v4421_v58 = vor.u32 %v4820_v30, %v4420_v12 }
 0xd9b   :  { %v4924_v7 = vpop.permute.xlu1 %4923 }
 0xd9c   :  { %v4926_v60 = vunpack.i.h.bf16 %v4924_v7  ;;  %v4925_v42 = vunpack.i.l.bf16 %v4924_v7  ;;  %v4477_v7 = vor.u32 %v4835_v43, %v4476_v24  ;;  %v4818_v24 = vld [vmem:[%s6564_s11 + $0x12c] sm:$0xf]  ;;  %v4422_v43 = vld [vmem:[%s6564_s11 + $0x138] sm:$0xf0] }
 0xd9e   :  { %v2533_v57 = vsel %vm436_vm13, %v2420_v61, %v4925_v42  ;;  %v2534_v27 = vsel %vm436_vm13, %v2422_v26, %v4926_v60  ;;  %v4833_v61 = vld [vmem:[%s6564_s11 + $0x1a4] sm:$0xf]  ;;  %v4478_v60 = vld [vmem:[%s6564_s11 + $0x1b0] sm:$0xf0]  ;;  %v4484_v42 = vld [vmem:[%s6564_s11 + $0x1a8] sm:$0xf]  ;;  %2936 = vmatpush.bf16.msrb.mxu1 %v4477_v7  ;;  %v4425_v7 = vor.u32 %v4818_v24, %v4422_v43 }
 0xd9f   :  { %v2536_v63 = vpack.c.bf16 %v2534_v27, %v2533_v57  ;;  %v4836_v26 = vld [vmem:[%s6564_s11 + $0x1b4] sm:$0xf0]  ;;  %v4481_v57 = vor.u32 %v4833_v61, %v4478_v60  ;;  %v4396_v61 = vld [vmem:[%s6564_s11 + $0x100] sm:$0xf]  ;;  %v4815_v60 = vld [vmem:[%s6564_s11 + $0x10c] sm:$0xf0] }
 0xda0   :  { %v4485_v27 = vor.u32 %v4836_v26, %v4484_v42  ;;  %v4813_v42 = vld [vmem:[%s6564_s11 + $0x104] sm:$0xf]  ;;  %v4398_v26 = vld [vmem:[%s6564_s11 + $0x110] sm:$0xf0] }
 0xda1   :  { %2620 = vmatmul.bf16.gmra.mxu0 %v2536_v63  ;;  %v4834_v63 = vld [vmem:[%s6564_s11 + $0x1ac] sm:$0xf]  ;;  %2955 = vmatpush.bf16.msra.mxu2 %v4481_v57 }
 0xda2   :  { %2974 = vmatpush.bf16.msra.mxu3 %v4485_v27  ;;  %v4397_v27 = vor.u32 %v4815_v60, %v4396_v61 }
 0xdde   :  { %v2616_v4 = vpop.f32.mrf.mxu0 }
 0xddf   :  { %v2617_v29 = vadd.f32 %v4935_v46, %v2616_v4 }
 0xde1   :  { %v2626_v33 = vadd.f32 %v2617_v29, %v5974_v5  ;;  %v4460_v29 = vld [vmem:[%s6564_s11 + $0x180] sm:$0xf] }
 0xde3   :  { %2634 = vadd.xlane.f32.xlu2 %v2626_v33 }
 0xde6   :  { %v2618_v34 = vpop.f32.mrf.mxu0 }
 0xde7   :  { %v2619_v52 = vadd.f32 %v4935_v46, %v2618_v34  ;;  %v4829_v34 = vld [vmem:[%s6564_s11 + $0x184] sm:$0xf] }
 0xde9   :  { %v2627_v53 = vadd.f32 %v2619_v52, %v5976_v45 }
 0xdeb   :  { %2636 = vadd.xlane.f32.xlu1 %v2627_v53 }
 0xe1e   :  { %v2621_v56 = vpop.f32.mrf.mxu0 }
 0xe1f   :  { %v2622_v20 = vadd.f32 %v4935_v46, %v2621_v56  ;;  %v4468_v56 = vld [vmem:[%s6564_s11 + $0x188] sm:$0xf] }
 0xe21   :  { %v2628_v59 = vadd.f32 %v2622_v20, %v5984_v17  ;;  %v4832_v20 = vld [vmem:[%s6564_s11 + $0x194] sm:$0xf0] }
 0xe23   :  { %2638 = vadd.xlane.f32.xlu0 %v2628_v59 }
 0xe26   :  { %v2623_v25 = vpop.f32.mrf.mxu0 }
 0xe27   :  { %v2624_v0 = vadd.f32 %v4935_v46, %v2623_v25  ;;  %v4486_v46 = vld [vmem:[%s6564_s11 + $0x1b8] sm:$0xf0]  ;;  %v4469_v25 = vor.u32 %v4832_v20, %v4468_v56 }
 0xe28   :  { %v4489_v4 = vor.u32 %v4834_v63, %v4486_v46  ;;  %v4401_v63 = vor.u32 %v4813_v42, %v4398_v26  ;;  %v4404_v46 = vld [vmem:[%s6564_s11 + $0x108] sm:$0xf] }
 0xe29   :  { %v2629_v23 = vadd.f32 %v2624_v0, %v5986_v19  ;;  %v4830_v0 = vld [vmem:[%s6564_s11 + $0x18c] sm:$0xf]  ;;  %2975 = vmatpush.bf16.msra.mxu3 %v4469_v25 }
 0xe2a   :  { %2993 = vmatpush.bf16.msra.mxu0 %v4489_v4  ;;  %v4816_v4 = vld [vmem:[%s6564_s11 + $0x114] sm:$0xf0] }
 0xe2b   :  { %2640 = vadd.xlane.f32.xlu0 %v2629_v23 }
 0xe56   :  { %v2635_v41 = vpop.xlane.xlu2 %2634 }
 0xe57   :  { %v2642_v54 = vmul.f32 %v2635_v41, %v5347_v10 }
 0xe59   :  { %v6120_v5 = vsub.f32 %v2626_v33, %v2642_v54  ;;  %v4831_v33 = vld [vmem:[%s6564_s11 + $0x18c] sm:$0xf0]  ;;  %v4444_v54 = vld [vmem:[%s6564_s11 + $0x160] sm:$0xf] }
 0xe5a   :  { %v4461_v52 = vor.u32 %v4831_v33, %v4460_v29  ;;  %v4405_v29 = vor.u32 %v4816_v4, %v4404_v46  ;;  %v4814_v33 = vld [vmem:[%s6564_s11 + $0x10c] sm:$0xf]  ;;  %v4875_v46 = vld [vmem:[#allocation5 + $0x1f0] sm:$0xff]  ;;  %v4860_v4 = vld [vmem:[#allocation5 + $0x178] sm:$0xff] }
 0xe5b   :  { %v2650_v38 = vmul.f32 %v6120_v5, %v6120_v5 }
 0xe5c   :  { %2937 = vmatpush.bf16.msrb.mxu1 %v4461_v52 }
 0xe5d   :  { %2654 = vadd.xlane.f32.xlu2 %v2650_v38  ;;  %v4827_v38 = vld [vmem:[%s6564_s11 + $0x16c] sm:$0xf0] }
 0xe5e   :  { %v2637_v45 = vpop.xlane.xlu1 %2636 }
 0xe5f   :  { %v2643_v48 = vmul.f32 %v2637_v45, %v5347_v10  ;;  %v4825_v45 = vld [vmem:[%s6564_s11 + $0x164] sm:$0xf] }
 0xe61   :  { %v6125_v51 = vsub.f32 %v2627_v53, %v2643_v48  ;;  %v4462_v53 = vld [vmem:[%s6564_s11 + $0x190] sm:$0xf0]  ;;  %v4445_v48 = vor.u32 %v4827_v38, %v4444_v54 }
 0xe63   :  { %v2651_v17 = vmul.f32 %v6125_v51, %v6125_v51  ;;  %2938 = vmatpush.bf16.msrb.mxu1 %v4445_v48 }
 0xe65   :  { %2656 = vadd.xlane.f32.xlu0 %v2651_v17  ;;  %v4446_v17 = vld [vmem:[%s6564_s11 + $0x170] sm:$0xf0] }
 0xe67   :  { %2939 = vmatpush.bf16.msrb.mxu1 %v4429_v9 }
 0xe6b   :  { %2940 = vmatpush.bf16.msrb.mxu1 %v4413_v1 }
 0xe6f   :  { %2941 = vmatpush.bf16.msrb.mxu1 %v4397_v27  ;;  %v4876_v27 = vld [vmem:[#allocation5 + $0x1f8] sm:$0xff] }
 0xe96   :  { %v2639_v19 = vpop.xlane.xlu0 %2638 }
 0xe97   :  { %v2644_v37 = vmul.f32 %v2639_v19, %v5347_v10  ;;  %v4452_v19 = vld [vmem:[%s6564_s11 + $0x168] sm:$0xf] }
 0xe99   :  { %v6130_v36 = vsub.f32 %v2628_v59, %v2644_v37  ;;  %v4465_v59 = vor.u32 %v4829_v34, %v4462_v53  ;;  %v4828_v37 = vld [vmem:[%s6564_s11 + $0x174] sm:$0xf0]  ;;  %v4406_v34 = vld [vmem:[%s6564_s11 + $0x118] sm:$0xf0] }
 0xe9a   :  { %v4409_v52 = vor.u32 %v4814_v33, %v4406_v34  ;;  %v4874_v33 = vld [vmem:[#allocation5 + $0x1e8] sm:$0xff]  ;;  %v4859_v34 = vld [vmem:[#allocation5 + $0x170] sm:$0xff] }
 0xe9b   :  { %v2652_v47 = vmul.f32 %v6130_v36, %v6130_v36  ;;  %2956 = vmatpush.bf16.msra.mxu2 %v4465_v59 }
 0xe9d   :  { %2658 = vadd.xlane.f32.xlu2 %v2652_v47  ;;  %v4449_v47 = vor.u32 %v4825_v45, %v4446_v17 }
 0xe9e   :  { %v2641_v50 = vpop.xlane.xlu0 %2640 }
 0xe9f   :  { %v2645_v13 = vmul.f32 %v2641_v50, %v5347_v10  ;;  %v4453_v50 = vor.u32 %v4828_v37, %v4452_v19  ;;  %2957 = vmatpush.bf16.msra.mxu2 %v4449_v47 }
 0xea1   :  { %v6135_v2 = vsub.f32 %v2629_v23, %v2645_v13  ;;  %v4470_v23 = vld [vmem:[%s6564_s11 + $0x198] sm:$0xf0]  ;;  %v4826_v13 = vld [vmem:[%s6564_s11 + $0x16c] sm:$0xf]  ;;  %2976 = vmatpush.bf16.msra.mxu3 %v4453_v50  ;;  %v4936_v50 = vld [vmem:[%s6562_s9 + $0x1] ss:$0 sm:$0xff] }
 0xea2   :  { %v4473_v41 = vor.u32 %v4830_v0, %v4470_v23 }
 0xea3   :  { %v2653_v55 = vmul.f32 %v6135_v2, %v6135_v2  ;;  %2958 = vmatpush.bf16.msra.mxu2 %v4433_v3 }
 0xea4   :  { %2994 = vmatpush.bf16.msra.mxu0 %v4473_v41 }
 0xea5   :  { %2660 = vadd.xlane.f32.xlu0 %v2653_v55  ;;  %v4454_v55 = vld [vmem:[%s6564_s11 + $0x178] sm:$0xf0]  ;;  %2977 = vmatpush.bf16.msra.mxu3 %v4437_v18 }
 0xea6   :  { %v4457_v40 = vor.u32 %v4826_v13, %v4454_v55 }
 0xea7   :  { %2959 = vmatpush.bf16.msra.mxu2 %v4417_v15 }
 0xea8   :  { %2995 = vmatpush.bf16.msra.mxu0 %v4457_v40 }
 0xea9   :  { %2978 = vmatpush.bf16.msra.mxu3 %v4421_v58 }
 0xeab   :  { %2960 = vmatpush.bf16.msra.mxu2 %v4401_v63  ;;  %v4851_v63 = vld [vmem:[#allocation5 + $0x130] sm:$0xff] }
 0xeac   :  { %2996 = vmatpush.bf16.msra.mxu0 %v4441_v35 }
 0xead   :  { %2979 = vmatpush.bf16.msra.mxu3 %v4405_v29  ;;  %v4850_v29 = vld [vmem:[#allocation5 + $0x128] sm:$0xff] }
 0xeaf   :  { %3443 = vmatpush.bf16.msrb.mxu2 %v4860_v4 }
 0xeb0   :  { %2997 = vmatpush.bf16.msra.mxu0 %v4425_v7 }
 0xeb3   :  { %3444 = vmatpush.bf16.msrb.mxu2 %v4859_v34 }
 0xeb4   :  { %2998 = vmatpush.bf16.msra.mxu0 %v4409_v52  ;;  %v4867_v52 = vld [vmem:[#allocation5 + $0x1b0] sm:$0xff] }
 0xeb8   :  { %3481 = vmatpush.bf16.msrb.mxu0 %v4876_v27 }
 0xebc   :  { %3482 = vmatpush.bf16.msrb.mxu0 %v4875_v46 }
 0xec0   :  { %3483 = vmatpush.bf16.msrb.mxu0 %v4874_v33 }
 0xed0   :  { %v2655_v62 = vpop.xlane.xlu2 %2654 }
 0xed1   :  { %v2662_v39 = vmul.f32 %v2655_v62, %v5347_v10 }
 0xed3   :  { %v2666_v57 = vadd.f32 1e-12, %v2662_v39 }
 0xed5   :  { %5064 = vrsqrt.f32 %v2666_v57  ;;  %vm2676_vm14 = vweird.f32 %v2666_v57 }
 0xed8   :  { %v2657_v53 = vpop.xlane.xlu0 %2656 }
 0xed9   :  { %v2663_v56 = vmul.f32 %v2657_v53, %v5347_v10  ;;  %v4849_v53 = vld [vmem:[#allocation5 + $0x120] sm:$0xff] }
 0xedb   :  { %v5065_v20 = vpop.eup %5064  ;;  %v2667_v59 = vadd.f32 1e-12, %v2663_v56  ;;  %v4873_v56 = vld [vmem:[#allocation5 + $0x1e0] sm:$0xff] }
 0xedc   :  { %v2671_v25 = vmul.f32 %v5065_v20, %v2666_v57  ;;  %vm2677_vm13 = vweird.f32 %v5065_v20  ;;  %3484 = vmatpush.bf16.msrb.mxu0 %v4873_v56 }
 0xedd   :  { %5066 = vrsqrt.f32 %v2667_v59  ;;  %vm2678_vm3 = vmor %vm2676_vm14, %vm2677_vm13  ;;  %vm2686_vm5 = vweird.f32 %v2667_v59 }
 0xede   :  { %v2672_v0 = vmul.f32 %v5065_v20, %v2671_v25  ;;  %v4848_v25 = vld [vmem:[#allocation5 + $0x118] sm:$0xff] }
 0xee0   :  { %v2673_v23 = vmul.f32 0.5, %v2672_v0  ;;  %v4872_v0 = vld [vmem:[#allocation5 + $0x1d8] sm:$0xff] }
 0xee1   :  { %3485 = vmatpush.bf16.msrb.mxu0 %v4872_v0 }
 0xee2   :  { %v2674_v41 = vsub.f32 1.5, %v2673_v23  ;;  %v4857_v23 = vld [vmem:[#allocation5 + $0x160] sm:$0xff] }
 0xee3   :  { %v5067_v54 = vpop.eup %5066 }
 0xee4   :  { %v2675_v38 = vmul.f32 %v5065_v20, %v2674_v41  ;;  %v2681_v45 = vmul.f32 %v5067_v54, %v2667_v59  ;;  %vm2687_vm4 = vweird.f32 %v5067_v54  ;;  %v4866_v59 = vld [vmem:[#allocation5 + $0x1a8] sm:$0xff]  ;;  %v4865_v41 = vld [vmem:[#allocation5 + $0x1a0] sm:$0xff] }
 0xee5   :  { %vm2688_vm6 = vmor %vm2686_vm5, %vm2687_vm4 }
 0xee6   :  { %v2682_v48 = vmul.f32 %v5067_v54, %v2681_v45  ;;  %v2679_v17 = vsel %vm2678_vm3, %v5065_v20, %v2675_v38  ;;  %v4858_v20 = vld [vmem:[#allocation5 + $0x168] sm:$0xff]  ;;  %v4871_v38 = vld [vmem:[#allocation5 + $0x1d0] sm:$0xff]  ;;  %v4393_v45 = vld [vmem:[%s6565_s12 + $0x4] sm:$0xf] }
 0xee7   :  { %v2710_v47 = vmul.f32 %v2679_v17, %v6120_v5  ;;  %3445 = vmatpush.bf16.msrb.mxu2 %v4858_v20  ;;  %3486 = vmatpush.bf16.msrb.mxu0 %v4871_v38  ;;  %v4864_v17 = vld [vmem:[#allocation5 + $0x198] sm:$0xff] }
 0xee8   :  { %v2683_v19 = vmul.f32 0.5, %v2682_v48  ;;  %v4856_v48 = vld [vmem:[#allocation5 + $0x158] sm:$0xff] }
 0xee9   :  { %v2717_v8 = vmul.f32 %v4936_v50, %v2710_v47  ;;  %v4870_v47 = vld [vmem:[#allocation5 + $0x1c8] sm:$0xff] }
 0xeea   :  { %v2684_v37 = vsub.f32 1.5, %v2683_v19  ;;  %v6360_v19 = vperm.slane %v4393_v45, 0 }
 0xeeb   :  { %v6341_v9 = vadd.f32 %v4937_v32, %v2717_v8  ;;  %3446 = vmatpush.bf16.msrb.mxu2 %v4857_v23  ;;  %3487 = vmatpush.bf16.msrb.mxu0 %v4870_v47 }
 0xeec   :  { %v2685_v13 = vmul.f32 %v5067_v54, %v2684_v37  ;;  %v4846_v37 = vld [vmem:[#allocation5 + $0x108] sm:$0xff] }
 0xeee   :  { %v2689_v55 = vsel %vm2688_vm6, %v5067_v54, %v2685_v13  ;;  %v4847_v54 = vld [vmem:[#allocation5 + $0x110] sm:$0xff] }
 0xeef   :  { %v2711_v40 = vmul.f32 %v2689_v55, %v6125_v51  ;;  %3447 = vmatpush.bf16.msrb.mxu2 %v4856_v48  ;;  %v4855_v13 = vld [vmem:[#allocation5 + $0x150] sm:$0xff] }
 0xef0   :  { %v4863_v55 = vld [vmem:[#allocation5 + $0x190] sm:$0xff] }
 0xef1   :  { %v2718_v6 = vmul.f32 %v4936_v50, %v2711_v40 }
 0xef3   :  { %v6343_v49 = vadd.f32 %v4937_v32, %v2718_v6  ;;  %3448 = vmatpush.bf16.msrb.mxu2 %v4855_v13  ;;  %v4845_v6 = vld [vmem:[#allocation5 + $0x100] sm:$0xff] }
 0xef5   :  { %v2728_v5 = vpack.c.bf16 %v6343_v49, %v6341_v9 }
 0xef7   :  { %2942 = vmatmul.bf16.vlgmr.msrb.gmra.mxu1 %v2728_v5  ;;  %2961 = vmatmul.bf16.vlgmr.msra.gmra.mxu2 %v2728_v5 }
 0xef8   :  { %2980 = vmatmul.bf16.vlgmr.msra.gmra.mxu3 %v2728_v5  ;;  %2999 = vmatmul.bf16.vlgmr.msra.gmra.mxu0 %v2728_v5  ;;  %v4869_v5 = vld [vmem:[#allocation5 + $0x1c0] sm:$0xff] }
 0xef9   :  { %3488 = vmatpush.bf16.msrb.mxu0 %v4869_v5 }
 0xf10   :  { %v2659_v14 = vpop.xlane.xlu2 %2658 }
 0xf11   :  { %v2664_v51 = vmul.f32 %v2659_v14, %v5347_v10 }
 0xf13   :  { %v2668_v28 = vadd.f32 1e-12, %v2664_v51 }
 0xf15   :  { %5068 = vrsqrt.f32 %v2668_v28  ;;  %vm2696_vm8 = vweird.f32 %v2668_v28 }
 0xf18   :  { %v2661_v3 = vpop.xlane.xlu0 %2660 }
 0xf19   :  { %v2665_v18 = vmul.f32 %v2661_v3, %v5347_v10  ;;  %v4854_v3 = vld [vmem:[#allocation5 + $0x148] sm:$0xff] }
 0xf1a   :  { %3449 = vmatpush.bf16.msrb.mxu2 %v4854_v3 }
 0xf1b   :  { %v5069_v16 = vpop.eup %5068  ;;  %v2669_v11 = vadd.f32 1e-12, %v2665_v18  ;;  %v4862_v18 = vld [vmem:[#allocation5 + $0x188] sm:$0xff] }
 0xf1c   :  { %v2691_v35 = vmul.f32 %v5069_v16, %v2668_v28  ;;  %vm2697_vm7 = vweird.f32 %v5069_v16  ;;  %v6372_v28 = vperm.slane %v4393_v45, 1 }
 0xf1d   :  { %5070 = vrsqrt.f32 %v2669_v11  ;;  %vm2698_vm9 = vmor %vm2696_vm8, %vm2697_vm7  ;;  %vm2706_vm11 = vweird.f32 %v2669_v11 }
 0xf1e   :  { %v2692_v44 = vmul.f32 %v5069_v16, %v2691_v35 }
 0xf20   :  { %v2693_v21 = vmul.f32 0.5, %v2692_v44 }
 0xf22   :  { %v2694_v22 = vsub.f32 1.5, %v2693_v21 }
 0xf23   :  { %v5071_v62 = vpop.eup %5070 }
 0xf24   :  { %v2695_v1 = vmul.f32 %v5069_v16, %v2694_v22  ;;  %v2701_v31 = vmul.f32 %v5071_v62, %v2669_v11  ;;  %vm2707_vm10 = vweird.f32 %v5071_v62  ;;  %v6376_v11 = vperm.slane %v4393_v45, 2 }
 0xf25   :  { %vm2708_vm12 = vmor %vm2706_vm11, %vm2707_vm10 }
 0xf26   :  { %v2699_v12 = vsel %vm2698_vm9, %v5069_v16, %v2695_v1  ;;  %v2702_v30 = vmul.f32 %v5071_v62, %v2701_v31  ;;  %v4853_v31 = vld [vmem:[#allocation5 + $0x140] sm:$0xff] }
 0xf27   :  { %v2712_v39 = vmul.f32 %v2699_v12, %v6130_v36  ;;  %v4852_v36 = vld [vmem:[#allocation5 + $0x138] sm:$0xff]  ;;  %v4861_v12 = vld [vmem:[#allocation5 + $0x180] sm:$0xff]  ;;  %3450 = vmatpush.bf16.msrb.mxu2 %v4853_v31 }
 0xf28   :  { %v2703_v15 = vmul.f32 0.5, %v2702_v30  ;;  %3424 = vmatpush.bf16.msra.mxu1 %v4852_v36 }
 0xf29   :  { %v2719_v58 = vmul.f32 %v4936_v50, %v2712_v39 }
 0xf2a   :  { %v2704_v24 = vsub.f32 1.5, %v2703_v15 }
 0xf2b   :  { %v6350_v43 = vadd.f32 %v4937_v32, %v2719_v58 }
 0xf2c   :  { %v2705_v61 = vmul.f32 %v5071_v62, %v2704_v24  ;;  %3425 = vmatpush.bf16.msra.mxu1 %v4851_v63 }
 0xf2e   :  { %v2709_v7 = vsel %vm2708_vm12, %v5071_v62, %v2705_v61 }
 0xf2f   :  { %v2713_v60 = vmul.f32 %v2709_v7, %v6135_v2  ;;  %v4868_v2 = vld [vmem:[#allocation5 + $0x1b8] sm:$0xff] }
 0xf30   :  { %3462 = vmatpush.bf16.msrb.mxu3 %v4868_v2  ;;  %3426 = vmatpush.bf16.msra.mxu1 %v4850_v29 }
 0xf31   :  { %v2720_v42 = vmul.f32 %v4936_v50, %v2713_v60  ;;  %v6362_v50 = vperm.slane %v4393_v45, 3 }
 0xf33   :  { %v6353_v26 = vadd.f32 %v4937_v32, %v2720_v42 }
 0xf34   :  { %3463 = vmatpush.bf16.msrb.mxu3 %v4867_v52  ;;  %3427 = vmatpush.bf16.msra.mxu1 %v4849_v53 }
 0xf35   :  { %v2729_v57 = vpack.c.bf16 %v6353_v26, %v6350_v43 }
 0xf37   :  { %2947 = vmatmul.bf16.gmra.mxu1 %v2729_v57  ;;  %2966 = vmatmul.bf16.gmra.mxu2 %v2729_v57 }
 0xf38   :  { %2985 = vmatmul.bf16.gmra.mxu3 %v2729_v57  ;;  %3004 = vmatmul.bf16.gmra.mxu0 %v2729_v57 }
 0xf39   :  { %3464 = vmatpush.bf16.msrb.mxu3 %v4866_v59  ;;  %3428 = vmatpush.bf16.msra.mxu1 %v4848_v25 }
 0xf3d   :  { %3465 = vmatpush.bf16.msrb.mxu3 %v4865_v41  ;;  %3429 = vmatpush.bf16.msra.mxu1 %v4847_v54 }
 0xf41   :  { %3466 = vmatpush.bf16.msrb.mxu3 %v4864_v17  ;;  %3430 = vmatpush.bf16.msra.mxu1 %v4846_v37 }
 0xf45   :  { %3467 = vmatpush.bf16.msrb.mxu3 %v4863_v55  ;;  %3431 = vmatpush.bf16.msra.mxu1 %v4845_v6 }
 0xf49   :  { %3468 = vmatpush.bf16.msrb.mxu3 %v4862_v18 }
 0xf4d   :  { %3469 = vmatpush.bf16.msrb.mxu3 %v4861_v12 }
 0xf74   :  { %v2943_v40 = vpop.f32.mrf.mxu1 }
 0xf75   :  { %v6365_v8 = vadd.f32 %v2943_v40, %v6360_v19  ;;  %v3000_v32 = vpop.f32.mrf.mxu0 }
 0xf76   :  { %v6368_v14 = vadd.f32 %v3000_v32, %v6362_v50 }
 0xf77   :  { %v3010_v51 = vmul.f32 %v6365_v8, %v6365_v8 }
 0xf78   :  { %v3013_v16 = vmul.f32 %v6368_v14, %v6368_v14 }
 0xf79   :  { %v3026_v35 = vmul.f32 %v3010_v51, %v6365_v8 }
 0xf7a   :  { %v3029_v44 = vmul.f32 %v3013_v16, %v6368_v14  ;;  %v2962_v21 = vpop.f32.mrf.mxu2 }
 0xf7b   :  { %v3042_v22 = vmul.f32 0.044715, %v3026_v35  ;;  %v6381_v62 = vadd.f32 %v2962_v21, %v6372_v28  ;;  %v2981_v1 = vpop.f32.mrf.mxu3 }
 0xf7c   :  { %v3045_v30 = vmul.f32 0.044715, %v3029_v44  ;;  %v6384_v39 = vadd.f32 %v2981_v1, %v6376_v11  ;;  %v2945_v15 = vpop.f32.mrf.mxu1 }
 0xf7d   :  { %v3058_v58 = vadd.f32 %v3042_v22, %v6365_v8  ;;  %v3011_v24 = vmul.f32 %v6381_v62, %v6381_v62  ;;  %v6390_v61 = vadd.f32 %v2945_v15, %v6360_v19  ;;  %v3002_v7 = vpop.f32.mrf.mxu0 }
 0xf7e   :  { %v3061_v60 = vadd.f32 %v3045_v30, %v6368_v14  ;;  %v3012_v42 = vmul.f32 %v6384_v39, %v6384_v39  ;;  %v6396_v57 = vadd.f32 %v3002_v7, %v6362_v50 }
 0xf7f   :  { %v3074_v36 = vmul.f32 0.7978846, %v3058_v58  ;;  %v3027_v27 = vmul.f32 %v3011_v24, %v6381_v62  ;;  %v3014_v63 = vmul.f32 %v6390_v61, %v6390_v61 }
 0xf80   :  { %v3077_v46 = vmul.f32 0.7978846, %v3061_v60  ;;  %v3028_v4 = vmul.f32 %v3012_v42, %v6384_v39  ;;  %v3017_v2 = vmul.f32 %v6396_v57, %v6396_v57 }
 0xf81   :  { %v3043_v29 = vmul.f32 0.044715, %v3027_v27  ;;  %v3030_v33 = vmul.f32 %v3014_v63, %v6390_v61  ;;  %5072 = vtanh.f32 %v3074_v36 }
 0xf82   :  { %v3044_v34 = vmul.f32 0.044715, %v3028_v4  ;;  %v3033_v52 = vmul.f32 %v3017_v2, %v6396_v57  ;;  %v2964_v53 = vpop.f32.mrf.mxu2  ;;  %5074 = vtanh.f32 %v3077_v46 }
 0xf83   :  { %v3059_v56 = vadd.f32 %v3043_v29, %v6381_v62  ;;  %v3046_v20 = vmul.f32 0.044715, %v3030_v33  ;;  %v2965_v59 = vadd.f32 %v2964_v53, %v6372_v28  ;;  %v2983_v25 = vpop.f32.mrf.mxu3 }
 0xf84   :  { %v3060_v0 = vadd.f32 %v3044_v34, %v6384_v39  ;;  %v3049_v23 = vmul.f32 0.044715, %v3033_v52  ;;  %v2984_v41 = vadd.f32 %v2983_v25, %v6376_v11 }
 0xf85   :  { %v3075_v54 = vmul.f32 0.7978846, %v3059_v56  ;;  %v3062_v38 = vadd.f32 %v3046_v20, %v6390_v61  ;;  %v3015_v45 = vmul.f32 %v2965_v59, %v2965_v59 }
 0xf86   :  { %v3076_v48 = vmul.f32 0.7978846, %v3060_v0  ;;  %v3065_v17 = vadd.f32 %v3049_v23, %v6396_v57  ;;  %v3016_v37 = vmul.f32 %v2984_v41, %v2984_v41 }
 0xf87   :  { %5076 = vtanh.f32 %v3075_v54  ;;  %v3078_v47 = vmul.f32 0.7978846, %v3062_v38  ;;  %v3031_v13 = vmul.f32 %v3015_v45, %v2965_v59  ;;  %v5073_v32 = vpop.eup %5072 }
 0xf88   :  { %5078 = vtanh.f32 %v3076_v48  ;;  %v3081_v55 = vmul.f32 0.7978846, %v3065_v17  ;;  %v3032_v40 = vmul.f32 %v3016_v37, %v2984_v41  ;;  %v5075_v5 = vpop.eup %5074  ;;  %v3106_v18 = vadd.f32 1.0, %v5073_v32 }
 0xf89   :  { %5080 = vtanh.f32 %v3078_v47  ;;  %v3047_v6 = vmul.f32 0.044715, %v3031_v13  ;;  %v3109_v44 = vadd.f32 1.0, %v5075_v5 }
 0xf8a   :  { %5082 = vtanh.f32 %v3081_v55  ;;  %v3048_v51 = vmul.f32 0.044715, %v3032_v40  ;;  %v3122_v30 = vmul.f32 0.5, %v3106_v18 }
 0xf8b   :  { %v3063_v3 = vadd.f32 %v3047_v6, %v2965_v59  ;;  %v3125_v58 = vmul.f32 0.5, %v3109_v44 }
 0xf8c   :  { %v3064_v16 = vadd.f32 %v3048_v51, %v2984_v41  ;;  %v3138_v27 = vmul.f32 %v3122_v30, %v6365_v8 }
 0xf8d   :  { %v5077_v35 = vpop.eup %5076  ;;  %v3079_v21 = vmul.f32 0.7978846, %v3063_v3  ;;  %v3141_v4 = vmul.f32 %v3125_v58, %v6368_v14 }
 0xf8e   :  { %v5079_v22 = vpop.eup %5078  ;;  %v3080_v1 = vmul.f32 0.7978846, %v3064_v16  ;;  %v3107_v7 = vadd.f32 1.0, %v5077_v35 }
 0xf8f   :  { %v5081_v31 = vpop.eup %5080  ;;  %5084 = vtanh.f32 %v3079_v21  ;;  %v3108_v42 = vadd.f32 1.0, %v5079_v22 }
 0xf90   :  { %v5083_v12 = vpop.eup %5082  ;;  %v3110_v15 = vadd.f32 1.0, %v5081_v31  ;;  %5086 = vtanh.f32 %v3080_v1  ;;  %v3123_v33 = vmul.f32 0.5, %v3107_v7 }
 0xf91   :  { %v3113_v24 = vadd.f32 1.0, %v5083_v12  ;;  %v3124_v53 = vmul.f32 0.5, %v3108_v42 }
 0xf92   :  { %v3126_v60 = vmul.f32 0.5, %v3110_v15  ;;  %v3139_v8 = vmul.f32 %v3123_v33, %v6381_v62 }
 0xf93   :  { %v3129_v36 = vmul.f32 0.5, %v3113_v24 }
 0xf94   :  { %v3142_v63 = vmul.f32 %v3126_v60, %v6390_v61  ;;  %v3140_v61 = vmul.f32 %v3124_v53, %v6384_v39 }
 0xf95   :  { %v5085_v46 = vpop.eup %5084  ;;  %v3145_v2 = vmul.f32 %v3129_v36, %v6396_v57 }
 0xf96   :  { %v5087_v29 = vpop.eup %5086  ;;  %v3154_v34 = vpack.c.bf16 %v3142_v63, %v3138_v27  ;;  %v3111_v52 = vadd.f32 1.0, %v5085_v46 }
 0xf97   :  { %v3157_v56 = vpack.c.bf16 %v3145_v2, %v3141_v4  ;;  %v3112_v20 = vadd.f32 1.0, %v5087_v29 }
 0xf98   :  { %v3127_v25 = vmul.f32 0.5, %v3111_v52  ;;  %3432 = vmatmul.bf16.vlgmr.msra.gmra.mxu1 %v3154_v34 }
 0xf99   :  { %v3128_v0 = vmul.f32 0.5, %v3112_v20  ;;  %3489 = vmatmul.bf16.vlgmr.msrb.gmra.mxu0 %v3157_v56 }
 0xf9a   :  { %v3143_v23 = vmul.f32 %v3127_v25, %v2965_v59 }
 0xf9b   :  { %v3144_v54 = vmul.f32 %v3128_v0, %v2984_v41 }
 0xf9c   :  { %v3155_v14 = vpack.c.bf16 %v3143_v23, %v3139_v8 }
 0xf9d   :  { %v3156_v38 = vpack.c.bf16 %v3144_v54, %v3140_v61 }
 0xf9e   :  { %3451 = vmatmul.bf16.vlgmr.msrb.gmra.mxu2 %v3155_v14 }
 0xf9f   :  { %3470 = vmatmul.bf16.vlgmr.msrb.gmra.mxu3 %v3156_v38 }
 0xfb4   :  { %v2948_v57 = vpop.f32.mrf.mxu1 }
 0xfb5   :  { %v6419_v45 = vadd.f32 %v2948_v57, %v6360_v19  ;;  %v3005_v48 = vpop.f32.mrf.mxu0 }
 0xfb6   :  { %v6422_v17 = vadd.f32 %v3005_v48, %v6362_v50 }
 0xfb7   :  { %v3018_v37 = vmul.f32 %v6419_v45, %v6419_v45 }
 0xfb8   :  { %v3021_v62 = vmul.f32 %v6422_v17, %v6422_v17 }
 0xfb9   :  { %v3034_v39 = vmul.f32 %v3018_v37, %v6419_v45 }
 0xfba   :  { %v3037_v59 = vmul.f32 %v3021_v62, %v6422_v17  ;;  %v2967_v41 = vpop.f32.mrf.mxu2 }
 0xfbb   :  { %v3050_v47 = vmul.f32 0.044715, %v3034_v39  ;;  %v6431_v13 = vadd.f32 %v2967_v41, %v6372_v28  ;;  %v2986_v55 = vpop.f32.mrf.mxu3 }
 0xfbc   :  { %v3053_v40 = vmul.f32 0.044715, %v3037_v59  ;;  %v6434_v32 = vadd.f32 %v2986_v55, %v6376_v11  ;;  %v2950_v6 = vpop.f32.mrf.mxu1 }
 0xfbd   :  { %v3066_v5 = vadd.f32 %v3050_v47, %v6419_v45  ;;  %v3019_v51 = vmul.f32 %v6431_v13, %v6431_v13  ;;  %v6440_v3 = vadd.f32 %v2950_v6, %v6360_v19  ;;  %v3007_v18 = vpop.f32.mrf.mxu0 }
 0xfbe   :  { %v3069_v16 = vadd.f32 %v3053_v40, %v6422_v17  ;;  %v3020_v35 = vmul.f32 %v6434_v32, %v6434_v32  ;;  %v6446_v44 = vadd.f32 %v3007_v18, %v6362_v50 }
 0xfbf   :  { %v3082_v21 = vmul.f32 0.7978846, %v3066_v5  ;;  %v3035_v22 = vmul.f32 %v3019_v51, %v6431_v13  ;;  %v3022_v1 = vmul.f32 %v6440_v3, %v6440_v3 }
 0xfc0   :  { %v3085_v31 = vmul.f32 0.7978846, %v3069_v16  ;;  %v3036_v12 = vmul.f32 %v3020_v35, %v6434_v32  ;;  %v3025_v19 = vmul.f32 %v6446_v44, %v6446_v44 }
 0xfc1   :  { %v3051_v30 = vmul.f32 0.044715, %v3035_v22  ;;  %v3038_v15 = vmul.f32 %v3022_v1, %v6440_v3  ;;  %5088 = vtanh.f32 %v3082_v21 }
 0xfc2   :  { %v3052_v58 = vmul.f32 0.044715, %v3036_v12  ;;  %v3041_v24 = vmul.f32 %v3025_v19, %v6446_v44  ;;  %v2969_v50 = vpop.f32.mrf.mxu2  ;;  %5090 = vtanh.f32 %v3085_v31 }
 0xfc3   :  { %v3067_v7 = vadd.f32 %v3051_v30, %v6431_v13  ;;  %v3054_v60 = vmul.f32 0.044715, %v3038_v15  ;;  %v2970_v42 = vadd.f32 %v2969_v50, %v6372_v28  ;;  %v2988_v36 = vpop.f32.mrf.mxu3 }
 0xfc4   :  { %v3068_v27 = vadd.f32 %v3052_v58, %v6434_v32  ;;  %v3057_v63 = vmul.f32 0.044715, %v3041_v24  ;;  %v2989_v46 = vadd.f32 %v2988_v36, %v6376_v11 }
 0xfc5   :  { %v3083_v4 = vmul.f32 0.7978846, %v3067_v7  ;;  %v3070_v2 = vadd.f32 %v3054_v60, %v6440_v3  ;;  %v3023_v29 = vmul.f32 %v2970_v42, %v2970_v42 }
 0xfc6   :  { %v3084_v33 = vmul.f32 0.7978846, %v3068_v27  ;;  %v3073_v34 = vadd.f32 %v3057_v63, %v6446_v44  ;;  %v3024_v52 = vmul.f32 %v2989_v46, %v2989_v46  ;;  %v4938_v27 = vld [vmem:[%s6567_s14 + $0x1] ss:$0 sm:$0xff] }
 0xfc7   :  { %5092 = vtanh.f32 %v3083_v4  ;;  %v3086_v53 = vmul.f32 0.7978846, %v3070_v2  ;;  %v3039_v56 = vmul.f32 %v3023_v29, %v2970_v42  ;;  %v5089_v25 = vpop.eup %5088 }
 0xfc8   :  { %5094 = vtanh.f32 %v3084_v33  ;;  %v3089_v28 = vmul.f32 0.7978846, %v3073_v34  ;;  %v3040_v20 = vmul.f32 %v3024_v52, %v2989_v46  ;;  %v5091_v8 = vpop.eup %5090  ;;  %v3114_v54 = vadd.f32 1.0, %v5089_v25 }
 0xfc9   :  { %5096 = vtanh.f32 %v3086_v53  ;;  %v3055_v0 = vmul.f32 0.044715, %v3039_v56  ;;  %v3117_v57 = vadd.f32 1.0, %v5091_v8 }
 0xfca   :  { %5098 = vtanh.f32 %v3089_v28  ;;  %v3056_v11 = vmul.f32 0.044715, %v3040_v20  ;;  %v3130_v41 = vmul.f32 0.5, %v3114_v54 }
 0xfcb   :  { %v3071_v23 = vadd.f32 %v3055_v0, %v2970_v42  ;;  %v3133_v55 = vmul.f32 0.5, %v3117_v57 }
 0xfcc   :  { %v3072_v61 = vadd.f32 %v3056_v11, %v2989_v46  ;;  %v3146_v18 = vmul.f32 %v3130_v41, %v6419_v45 }
 0xfcd   :  { %v5093_v14 = vpop.eup %5092  ;;  %v3087_v38 = vmul.f32 0.7978846, %v3071_v23  ;;  %v3149_v21 = vmul.f32 %v3133_v55, %v6422_v17 }
 0xfce   :  { %v5095_v48 = vpop.eup %5094  ;;  %v3088_v37 = vmul.f32 0.7978846, %v3072_v61  ;;  %v3115_v6 = vadd.f32 1.0, %v5093_v14 }
 0xfcf   :  { %v5097_v62 = vpop.eup %5096  ;;  %5100 = vtanh.f32 %v3087_v38  ;;  %v3116_v51 = vadd.f32 1.0, %v5095_v48 }
 0xfd0   :  { %v5099_v39 = vpop.eup %5098  ;;  %5102 = vtanh.f32 %v3088_v37  ;;  %v3118_v59 = vadd.f32 1.0, %v5097_v62  ;;  %v3131_v19 = vmul.f32 0.5, %v3115_v6 }
 0xfd1   :  { %v3121_v47 = vadd.f32 1.0, %v5099_v39  ;;  %v3132_v58 = vmul.f32 0.5, %v3116_v51 }
 0xfd2   :  { %v3134_v40 = vmul.f32 0.5, %v3118_v59  ;;  %v3147_v45 = vmul.f32 %v3131_v19, %v6431_v13 }
 0xfd3   :  { %v3137_v5 = vmul.f32 0.5, %v3121_v47 }
 0xfd4   :  { %v3150_v16 = vmul.f32 %v3134_v40, %v6440_v3  ;;  %v3148_v3 = vmul.f32 %v3132_v58, %v6434_v32  ;;  %v4883_v58 = vld [vmem:[%s6570_s17 + $0x30] sm:$0xff] }
 0xfd5   :  { %v5101_v35 = vpop.eup %5100  ;;  %v3153_v22 = vmul.f32 %v3137_v5, %v6446_v44 }
 0xfd6   :  { %v5103_v1 = vpop.eup %5102  ;;  %v3158_v31 = vpack.c.bf16 %v3150_v16, %v3146_v18  ;;  %v3119_v12 = vadd.f32 1.0, %v5101_v35 }
 0xfd7   :  { %v3161_v30 = vpack.c.bf16 %v3153_v22, %v3149_v21  ;;  %v3120_v15 = vadd.f32 1.0, %v5103_v1 }
 0xfd8   :  { %3437 = vmatmul.bf16.gmra.mxu1 %v3158_v31  ;;  %v3135_v24 = vmul.f32 0.5, %v3119_v12 }
 0xfd9   :  { %3494 = vmatmul.bf16.gmra.mxu0 %v3161_v30  ;;  %v3136_v50 = vmul.f32 0.5, %v3120_v15  ;;  %v4884_v15 = vld [vmem:[%s6570_s17 + $0x38] sm:$0xff] }
 0xfda   :  { %v3151_v7 = vmul.f32 %v3135_v24, %v2970_v42  ;;  %3672 = vmatpush.bf16.msrb.mxu1 %v4884_v15  ;;  %v4882_v24 = vld [vmem:[%s6570_s17 + $0x28] sm:$0xff] }
 0xfdb   :  { %v3152_v60 = vmul.f32 %v3136_v50, %v2989_v46  ;;  %v4881_v50 = vld [vmem:[%s6570_s17 + $0x20] sm:$0xff] }
 0xfdc   :  { %v3159_v17 = vpack.c.bf16 %v3151_v7, %v3147_v45  ;;  %v4880_v45 = vld [vmem:[%s6570_s17 + $0x18] sm:$0xff]  ;;  %v4879_v7 = vld [vmem:[%s6570_s17 + $0x10] sm:$0xff] }
 0xfdd   :  { %v3160_v36 = vpack.c.bf16 %v3152_v60, %v3148_v3  ;;  %v4878_v60 = vld [vmem:[%s6570_s17 + $0x8] sm:$0xff] }
 0xfde   :  { %3456 = vmatmul.bf16.gmra.mxu2 %v3159_v17  ;;  %3673 = vmatpush.bf16.msrb.mxu1 %v4883_v58 }
 0xfdf   :  { %3475 = vmatmul.bf16.gmra.mxu3 %v3160_v36 }
 0xfe2   :  { %3674 = vmatpush.bf16.msrb.mxu1 %v4882_v24  ;;  %v4941_v24 = vld [vmem:[%s6571_s18] ss:$0 sm:$0xff] }
 0xfe6   :  { %3675 = vmatpush.bf16.msrb.mxu1 %v4881_v50 }
 0xfea   :  { %3676 = vmatpush.bf16.msrb.mxu1 %v4880_v45 }
 0xfee   :  { %3677 = vmatpush.bf16.msrb.mxu1 %v4879_v7 }
 0xff2   :  { %3678 = vmatpush.bf16.msrb.mxu1 %v4878_v60 }
0x1015   :  { %v3433_v44 = vpop.f32.mrf.mxu1 }
0x1016   :  { %v3434_v63 = vadd.f32 %v4938_v27, %v3433_v44  ;;  %v3490_v33 = vpop.f32.mrf.mxu0  ;;  %v4877_v44 = vld [vmem:[%s6570_s17] sm:$0xff] }
0x1017   :  { %3679 = vmatpush.bf16.msrb.mxu1 %v4877_v44 }
0x101d   :  { %v3435_v13 = vpop.f32.mrf.mxu1 }
0x101e   :  { %v3436_v52 = vadd.f32 %v4938_v27, %v3435_v13  ;;  %v3492_v20 = vpop.f32.mrf.mxu0 }
0x1021   :  { %v3452_v4 = vpop.f32.mrf.mxu2 }
0x1022   :  { %v3453_v2 = vadd.f32 %v3452_v4, %v3434_v63  ;;  %v3471_v29 = vpop.f32.mrf.mxu3 }
0x1024   :  { %v3472_v34 = vadd.f32 %v3471_v29, %v3453_v2 }
0x1026   :  { %v3491_v42 = vadd.f32 %v3490_v33, %v3472_v34 }
0x1028   :  { %v3500_v32 = vadd.f32 %v3491_v42, %v6341_v9 }
0x1029   :  { %v3454_v46 = vpop.f32.mrf.mxu2 }
0x102a   :  { %v3455_v53 = vadd.f32 %v3454_v46, %v3436_v52  ;;  %3508 = vadd.xlane.f32.xlu2 %v3500_v32  ;;  %v3473_v56 = vpop.f32.mrf.mxu3 }
0x102c   :  { %v3474_v28 = vadd.f32 %v3473_v56, %v3455_v53 }
0x102e   :  { %v3493_v25 = vadd.f32 %v3492_v20, %v3474_v28  ;;  %v4939_v20 = vld [vmem:[%s6568_s15 + $0x1] ss:$0 sm:$0xff] }
0x1030   :  { %v3501_v0 = vadd.f32 %v3493_v25, %v6343_v49 }
0x1032   :  { %3510 = vadd.xlane.f32.xlu0 %v3501_v0 }
0x1055   :  { %v3438_v8 = vpop.f32.mrf.mxu1 }
0x1056   :  { %v3439_v11 = vadd.f32 %v4938_v27, %v3438_v8  ;;  %v3495_v14 = vpop.f32.mrf.mxu0 }
0x105d   :  { %v3440_v57 = vpop.f32.mrf.mxu1 }
0x105e   :  { %v3441_v9 = vadd.f32 %v4938_v27, %v3440_v57  ;;  %v3497_v47 = vpop.f32.mrf.mxu0 }
0x1061   :  { %v3457_v23 = vpop.f32.mrf.mxu2 }
0x1062   :  { %v3458_v61 = vadd.f32 %v3457_v23, %v3439_v11  ;;  %v3476_v54 = vpop.f32.mrf.mxu3  ;;  %v4940_v11 = vld [vmem:[%s6569_s16 + $0x1] ss:$0 sm:$0xff] }
0x1064   :  { %v3477_v38 = vadd.f32 %v3476_v54, %v3458_v61 }
0x1066   :  { %v3496_v48 = vadd.f32 %v3495_v14, %v3477_v38 }
0x1068   :  { %v3502_v37 = vadd.f32 %v3496_v48, %v6350_v43 }
0x1069   :  { %v3459_v62 = vpop.f32.mrf.mxu2 }
0x106a   :  { %v3460_v39 = vadd.f32 %v3459_v62, %v3441_v9  ;;  %3512 = vadd.xlane.f32.xlu1 %v3502_v37  ;;  %v3478_v59 = vpop.f32.mrf.mxu3 }
0x106c   :  { %v3479_v41 = vadd.f32 %v3478_v59, %v3460_v39 }
0x106e   :  { %v3498_v49 = vadd.f32 %v3497_v47, %v3479_v41 }
0x1070   :  { %v3503_v55 = vadd.f32 %v3498_v49, %v6353_v26 }
0x1072   :  { %3514 = vadd.xlane.f32.xlu2 %v3503_v55 }
0x109d   :  { %v3509_v40 = vpop.xlane.xlu2 %3508 }
0x109e   :  { %v3516_v6 = vmul.f32 %v3509_v40, %v5347_v10 }
0x10a0   :  { %v3520_v5 = vsub.f32 %v3500_v32, %v3516_v6 }
0x10a2   :  { %v3524_v51 = vmul.f32 %v3520_v5, %v3520_v5 }
0x10a4   :  { %3528 = vadd.xlane.f32.xlu0 %v3524_v51 }
0x10a5   :  { %v3511_v18 = vpop.xlane.xlu0 %3510 }
0x10a6   :  { %v3517_v16 = vmul.f32 %v3511_v18, %v5347_v10 }
0x10a8   :  { %v3521_v43 = vsub.f32 %v3501_v0, %v3517_v16 }
0x10aa   :  { %v3525_v35 = vmul.f32 %v3521_v43, %v3521_v43 }
0x10ac   :  { %3530 = vadd.xlane.f32.xlu1 %v3525_v35 }
0x10dd   :  { %v3513_v21 = vpop.xlane.xlu1 %3512 }
0x10de   :  { %v3518_v22 = vmul.f32 %v3513_v21, %v5347_v10 }
0x10e0   :  { %v6478_v1 = vsub.f32 %v3502_v37, %v3518_v22 }
0x10e2   :  { %v3526_v26 = vmul.f32 %v6478_v1, %v6478_v1 }
0x10e4   :  { %3532 = vadd.xlane.f32.xlu2 %v3526_v26 }
0x10e5   :  { %v3515_v31 = vpop.xlane.xlu2 %3514 }
0x10e6   :  { %v3519_v12 = vmul.f32 %v3515_v31, %v5347_v10 }
0x10e8   :  { %v6483_v19 = vsub.f32 %v3503_v55, %v3519_v12 }
0x10ea   :  { %v3527_v30 = vmul.f32 %v6483_v19, %v6483_v19 }
0x10ec   :  { %3534 = vadd.xlane.f32.xlu0 %v3527_v30 }
0x1117   :  { %v3529_v3 = vpop.xlane.xlu0 %3528 }
0x1118   :  { %v3536_v17 = vmul.f32 %v3529_v3, %v5347_v10 }
0x111a   :  { %v3540_v36 = vadd.f32 1e-12, %v3536_v17 }
0x111c   :  { %5104 = vrsqrt.f32 %v3540_v36  ;;  %vm3550_vm0 = vweird.f32 %v3540_v36 }
0x111f   :  { %v3531_v27 = vpop.xlane.xlu1 %3530 }
0x1120   :  { %v3537_v63 = vmul.f32 %v3531_v27, %v5347_v10 }
0x1122   :  { %v5105_v4 = vpop.eup %5104  ;;  %v3541_v2 = vadd.f32 1e-12, %v3537_v63 }
0x1123   :  { %v3545_v29 = vmul.f32 %v5105_v4, %v3540_v36  ;;  %vm3551_vm15 = vweird.f32 %v5105_v4 }
0x1124   :  { %5106 = vrsqrt.f32 %v3541_v2  ;;  %vm3552_vm1 = vmor %vm3550_vm0, %vm3551_vm15  ;;  %vm3560_vm13 = vweird.f32 %v3541_v2  ;;  %vm3789_vm15 = vcmask 0  }
0x1125   :  { %v3546_v33 = vmul.f32 %v5105_v4, %v3545_v29 }
0x1127   :  { %v3547_v34 = vmul.f32 0.5, %v3546_v33 }
0x1129   :  { %v3548_v13 = vsub.f32 1.5, %v3547_v34 }
0x112a   :  { %v5107_v42 = vpop.eup %5106 }
0x112b   :  { %v3549_v52 = vmul.f32 %v5105_v4, %v3548_v13  ;;  %v3555_v32 = vmul.f32 %v5107_v42, %v3541_v2  ;;  %vm3561_vm2 = vweird.f32 %v5107_v42 }
0x112c   :  { %vm3562_vm14 = vmor %vm3560_vm13, %vm3561_vm2 }
0x112d   :  { %v3556_v46 = vmul.f32 %v5107_v42, %v3555_v32  ;;  %v3553_v53 = vsel %vm3552_vm1, %v5105_v4, %v3549_v52 }
0x112e   :  { %v3584_v25 = vmul.f32 %v3553_v53, %v3520_v5 }
0x112f   :  { %v3557_v56 = vmul.f32 0.5, %v3556_v46 }
0x1130   :  { %v3591_v23 = vmul.f32 %v4939_v20, %v3584_v25 }
0x1131   :  { %v3558_v28 = vsub.f32 1.5, %v3557_v56 }
0x1132   :  { %v3598_v14 = vadd.f32 %v4940_v11, %v3591_v23 }
0x1133   :  { %v3559_v0 = vmul.f32 %v5107_v42, %v3558_v28  ;;  %v3735_v28 = vld [vmem:[%s6591_s29] sm:$0xff] }
0x1135   :  { %v3563_v8 = vsel %vm3562_vm14, %v5107_v42, %v3559_v0  ;;  %v3737_v0 = vld [vmem:[%s6591_s29 + $0x10] sm:$0xff] }
0x1136   :  { %v3585_v61 = vmul.f32 %v3563_v8, %v3521_v43 }
0x1138   :  { %v3592_v54 = vmul.f32 %v4939_v20, %v3585_v61 }
0x113a   :  { %v3599_v38 = vadd.f32 %v4940_v11, %v3592_v54 }
0x113c   :  { %v3602_v57 = vpack.c.bf16 %v3599_v38, %v3598_v14 }
0x113e   :  { %3680 = vmatmul.bf16.vlgmr.msrb.gmra.mxu1 %v3602_v57 }
0x1157   :  { %v3533_v48 = vpop.xlane.xlu2 %3532 }
0x1158   :  { %v3538_v9 = vmul.f32 %v3533_v48, %v5347_v10 }
0x115a   :  { %v3542_v37 = vadd.f32 1e-12, %v3538_v9 }
0x115c   :  { %5108 = vrsqrt.f32 %v3542_v37  ;;  %vm3570_vm4 = vweird.f32 %v3542_v37 }
0x115f   :  { %v3535_v62 = vpop.xlane.xlu0 %3534 }
0x1160   :  { %v3539_v39 = vmul.f32 %v3535_v62, %v5347_v10 }
0x1162   :  { %v5109_v59 = vpop.eup %5108  ;;  %v3543_v41 = vadd.f32 1e-12, %v3539_v39 }
0x1163   :  { %v3565_v47 = vmul.f32 %v5109_v59, %v3542_v37  ;;  %vm3571_vm3 = vweird.f32 %v5109_v59 }
0x1164   :  { %5110 = vrsqrt.f32 %v3543_v41  ;;  %vm3572_vm5 = vmor %vm3570_vm4, %vm3571_vm3  ;;  %vm3580_vm7 = vweird.f32 %v3543_v41 }
0x1165   :  { %v3566_v49 = vmul.f32 %v5109_v59, %v3565_v47 }
0x1167   :  { %v3567_v55 = vmul.f32 0.5, %v3566_v49 }
0x1169   :  { %v3568_v40 = vsub.f32 1.5, %v3567_v55 }
0x116a   :  { %v5111_v6 = vpop.eup %5110 }
0x116b   :  { %v3569_v5 = vmul.f32 %v5109_v59, %v3568_v40  ;;  %v3575_v51 = vmul.f32 %v5111_v6, %v3543_v41  ;;  %vm3581_vm6 = vweird.f32 %v5111_v6 }
0x116c   :  { %vm3582_vm8 = vmor %vm3580_vm7, %vm3581_vm6 }
0x116d   :  { %v3573_v18 = vsel %vm3572_vm5, %v5109_v59, %v3569_v5  ;;  %v3576_v16 = vmul.f32 %v5111_v6, %v3575_v51 }
0x116e   :  { %v3586_v43 = vmul.f32 %v3573_v18, %v6478_v1 }
0x116f   :  { %v3577_v35 = vmul.f32 0.5, %v3576_v16 }
0x1170   :  { %v3593_v21 = vmul.f32 %v4939_v20, %v3586_v43 }
0x1171   :  { %v3578_v10 = vsub.f32 1.5, %v3577_v35 }
0x1172   :  { %v3600_v22 = vadd.f32 %v4940_v11, %v3593_v21 }
0x1173   :  { %v3579_v26 = vmul.f32 %v5111_v6, %v3578_v10 }
0x1175   :  { %v3583_v31 = vsel %vm3582_vm8, %v5111_v6, %v3579_v26 }
0x1176   :  { %v3587_v12 = vmul.f32 %v3583_v31, %v6483_v19 }
0x1178   :  { %v3594_v30 = vmul.f32 %v4939_v20, %v3587_v12  ;;  %v3736_v20 = vld [vmem:[%s6591_s29 + $0x8] sm:$0xff] }
0x1179   :  { %v3759_v25 = vadd.f32 %v3736_v20, %v3735_v28 }
0x117a   :  { %v3601_v15 = vadd.f32 %v4940_v11, %v3594_v30  ;;  %v3738_v11 = vld [vmem:[%s6591_s29 + $0x18] sm:$0xff] }
0x117b   :  { %v3760_v8 = vadd.f32 %v3759_v25, %v3737_v0 }
0x117c   :  { %v3603_v58 = vpack.c.bf16 %v3601_v15, %v3600_v22 }
0x117d   :  { %v3761_v23 = vadd.f32 %v3760_v8, %v3738_v11 }
0x117e   :  { %3685 = vmatmul.bf16.gmra.mxu1 %v3603_v58 }
0x11bb   :  { %v3681_v1 = vpop.f32.mrf.mxu1 }
0x11bc   :  { %v3682_v50 = vadd.f32 %v4941_v24, %v3681_v1 }
0x11be   :  { %3691 = vst [vmem:[%s6572_s19] sm:$0xff] %v3682_v50  ;;  %3695 = vmax.xlane.f32.xlu1 %v3682_v50 }
0x11c3   :  { %v3683_v45 = vpop.f32.mrf.mxu1 }
0x11c4   :  { %v3684_v7 = vadd.f32 %v4941_v24, %v3683_v45 }
0x11c6   :  { %3692 = vst [vmem:[%s6572_s19 + $0x8] sm:$0xff] %v3684_v7  ;;  %3697 = vmax.xlane.f32.xlu2 %v3684_v7 }
0x11fb   :  { %v3686_v19 = vpop.f32.mrf.mxu1 }
0x11fc   :  { %v3687_v3 = vadd.f32 %v4941_v24, %v3686_v19 }
0x11fe   :  { %3693 = vst [vmem:[%s6572_s19 + $0x10] sm:$0xff] %v3687_v3  ;;  %3699 = vmax.xlane.f32.xlu0 %v3687_v3 }
0x1203   :  { %v3688_v60 = vpop.f32.mrf.mxu1 }
0x1204   :  { %v3689_v17 = vadd.f32 %v4941_v24, %v3688_v60 }
0x1206   :  { %3694 = vst [vmem:[%s6572_s19 + $0x18] sm:$0xff] %v3689_v17  ;;  %3701 = vmax.xlane.f32.xlu1 %v3689_v17 }
0x1231   :  { %v3696_v36 = vpop.xlane.xlu1 %3695 }
0x1232   :  { %v3703_v44 = vsub.f32 %v3682_v50, %v3696_v36 }
0x1234   :  { %v3707_v27 = vmul.f32 1.442695, %v3703_v44 }
0x1236   :  { %5112 = vpow2.f32 %v3707_v27 }
0x1239   :  { %v3698_v63 = vpop.xlane.xlu2 %3697 }
0x123a   :  { %v3704_v4 = vsub.f32 %v3684_v7, %v3698_v63 }
0x123c   :  { %v5113_v2 = vpop.eup %5112  ;;  %v3709_v29 = vmul.f32 1.442695, %v3704_v4 }
0x123d   :  { %3715 = vadd.xlane.f32.xlu2 %v5113_v2 }
0x123e   :  { %5114 = vpow2.f32 %v3709_v29 }
0x1244   :  { %v5115_v33 = vpop.eup %5114 }
0x1245   :  { %3717 = vadd.xlane.f32.xlu0 %v5115_v33 }
0x1271   :  { %v3700_v34 = vpop.xlane.xlu0 %3699 }
0x1272   :  { %v3705_v13 = vsub.f32 %v3687_v3, %v3700_v34 }
0x1274   :  { %v3711_v42 = vmul.f32 1.442695, %v3705_v13 }
0x1276   :  { %5116 = vpow2.f32 %v3711_v42 }
0x1279   :  { %v3702_v52 = vpop.xlane.xlu1 %3701 }
0x127a   :  { %v3706_v32 = vsub.f32 %v3689_v17, %v3702_v52 }
0x127c   :  { %v5117_v46 = vpop.eup %5116  ;;  %v3713_v53 = vmul.f32 1.442695, %v3706_v32 }
0x127d   :  { %3719 = vadd.xlane.f32.xlu1 %v5117_v46 }
0x127e   :  { %5118 = vpow2.f32 %v3713_v53 }
0x1284   :  { %v5119_v56 = vpop.eup %5118 }
0x1285   :  { %3721 = vadd.xlane.f32.xlu2 %v5119_v56  ;;  %3762 = vadd.xlane.f32.xlu1 %v3761_v23 }
0x12b0   :  { %v3716_v54 = vpop.xlane.xlu2 %3715 }
0x12b8   :  { %v3718_v61 = vpop.xlane.xlu0 %3717 }
0x12b9   :  { %5120 = vlog2.f32 %v3718_v61 }
0x12ba   :  { %5122 = vlog2.f32 %v3716_v54 }
0x12bf   :  { %v5121_v38 = vpop.eup %5120 }
0x12c0   :  { %v5123_v57 = vpop.eup %5122  ;;  %v3726_v48 = vmul.f32 0.6931472, %v5121_v38 }
0x12c1   :  { %v3724_v9 = vmul.f32 0.6931472, %v5123_v57 }
0x12c2   :  { %v3732_v62 = vsub.f32 %v3704_v4, %v3726_v48 }
0x12c3   :  { %v3731_v41 = vsub.f32 %v3703_v44, %v3724_v9 }
0x12c4   :  { %v3740_v49 = vsub.f32 0.0, %v3732_v62 }
0x12c5   :  { %v3739_v55 = vsub.f32 0.0, %v3731_v41 }
0x12c6   :  { %v3744_v51 = vmul.f32 %v3740_v49, %v3736_v20 }
0x12c7   :  { %v3743_v16 = vmul.f32 %v3739_v55, %v3735_v28 }
0x12c9   :  { %v3747_v21 = vadd.f32 %v3744_v51, %v3743_v16 }
0x12f0   :  { %v3720_v14 = vpop.xlane.xlu1 %3719 }
0x12f1   :  { %5124 = vlog2.f32 %v3720_v14 }
0x12f7   :  { %v5125_v37 = vpop.eup %5124 }
0x12f8   :  { %v3728_v39 = vmul.f32 0.6931472, %v5125_v37  ;;  %v3722_v59 = vpop.xlane.xlu2 %3721  ;;  %v3763_v31 = vpop.xlane.xlu1 %3762 }
0x12f9   :  { %5126 = vlog2.f32 %v3722_v59  ;;  %v3764_v12 = vrot.slane %v3763_v31, 4 }
0x12fa   :  { %v3733_v47 = vsub.f32 %v3705_v13, %v3728_v39 }
0x12fb   :  { %v3765_v30 = vadd.f32 %v3764_v12, %v3763_v31 }
0x12fc   :  { %v3741_v40 = vsub.f32 0.0, %v3733_v47 }
0x12fd   :  { %v3766_v58 = vrot.slane %v3765_v30, 2 }
0x12fe   :  { %v3745_v43 = vmul.f32 %v3741_v40, %v3737_v0 }
0x12ff   :  { %v5127_v6 = vpop.eup %5126  ;;  %v3767_v50 = vadd.f32 %v3766_v58, %v3765_v30 }
0x1300   :  { %v3730_v5 = vmul.f32 0.6931472, %v5127_v6  ;;  %v3748_v22 = vadd.f32 %v3747_v21, %v3745_v43 }
0x1301   :  { %v3768_v19 = vrot.slane %v3767_v50, 1 }
0x1302   :  { %v3734_v18 = vsub.f32 %v3706_v32, %v3730_v5 }
0x1303   :  { %v3769_v17 = vadd.f32 %v3768_v19, %v3767_v50 }
0x1304   :  { %v3742_v35 = vsub.f32 0.0, %v3734_v18 }
0x1306   :  { %v3746_v10 = vmul.f32 %v3742_v35, %v3738_v11 }
0x1308   :  { %v3749_v26 = vadd.f32 %v3748_v22, %v3746_v10 }
0x130a   :  { %3750 = vadd.xlane.f32.xlu0 %v3749_v26 }
0x137d   :  { %v3751_v15 = vpop.xlane.xlu0 %3750 }
0x137e   :  { %v3752_v24 = vrot.slane %v3751_v15, 4 }
0x1380   :  { %v3753_v1 = vadd.f32 %v3752_v24, %v3751_v15 }
0x1382   :  { %v3754_v45 = vrot.slane %v3753_v1, 2 }
0x1384   :  { %v3755_v7 = vadd.f32 %v3754_v45, %v3753_v1 }
0x1386   :  { %v3756_v3 = vrot.slane %v3755_v7, 1 }
0x1388   :  { %v3757_v60 = vadd.f32 %v3756_v3, %v3755_v7 }
0x138a   :  { %4893 = vpush %v3757_v60 }
0x138b   :  { %4895 = vpush %v3769_v17 }
0x13bb   :  { %s4894_s8 = spop %4893 }
0x13bc   :  { %s4896_s13 = spop %4895 }
0x13bd   :  { %v3771_v36 = vstv %s4896_s13 }
0x13be   :  { %5128 = vrcp.f32 %v3771_v36  ;;  %v3783_v4 = vand.u32 2147483648, %v3771_v36  ;;  %v3781_v29 = vand.u32 2147483647, %v3771_v36  ;;  %vm3777_vm10 = vweird.f32 %v3771_v36 }
0x13c0   :  { %v3784_v34 = vor.u32 1.1754944e-38, %v3783_v4  ;;  %vm3782_vm12 = vcmp.eq.f32.partialorder %v3781_v29, 8.507059e+37 }
0x13c4   :  { %v5129_v44 = vpop.eup %5128 }
0x13c5   :  { %v3773_v27 = vmul.f32 %v5129_v44, %v3771_v36  ;;  %vm3778_vm9 = vweird.f32 %v5129_v44 }
0x13c6   :  { %vm3779_vm11 = vmor %vm3777_vm10, %vm3778_vm9 }
0x13c7   :  { %v3774_v63 = vsub.f32 1.0, %v3773_v27 }
0x13c9   :  { %v3775_v2 = vmul.f32 %v5129_v44, %v3774_v63 }
0x13cb   :  { %v3776_v33 = vadd.f32 %v5129_v44, %v3775_v2 }
0x13cd   :  { %v3780_v13 = vsel %vm3779_vm11, %v5129_v44, %v3776_v33 }
0x13ce   :  { %v3785_v42 = vsel %vm3782_vm12, %v3784_v34, %v3780_v13 }
0x13cf   :  { %4897 = vpush %v3785_v42 }
0x1400   :  { %s4898_s17 = spop %4897 }
0x1401   :  { %s3787_s25 = smul.f32 %s4898_s17, %s4894_s8 }
0x1403   :  { %v3788_v52 = vstv %s3787_s25 }
0x1404   :  { %3790 = vst.msk [vmem:[#allocation7] sm:$0x1] %vm3789_vm15, %v3788_v52 }
0x1405   :  { %3803 = dma.vmem_to_hbm [thread:$0]  %s3799_s22, 16, %s3801_s2, [#allocation4]  }
0x1406   :  { %5206 = dma.done.wait [#allocation4], 16  }
0x1407   :  { %5207 = vsyncadd [#allocation4], 4294967280 }
0x1408   :  { %3810 = vsyncpa [#allocation3], 1 }
0x1409   :  { %3811 = vsyncpa [#allocation6], 1 }
0x140a   :  { %3812 = vsyncpa [#allocation4], 1 }

</bundles_post_ra>
